<compile_context>
chip_gen: v6e
topology: v6e:2x2x1
jax: 0.10.0
libtpu: 0.0.40
codegen_flags: <defaults>
</compile_context>

<pallas_src>
import functools

import jax
import jax.numpy as jnp
from jax.experimental import pallas as pl
from jax.experimental.pallas import tpu as pltpu


def _round_up(x, m):
    return (x + m - 1) // m * m


def fused_conv3d_bn_relu_kernel(x_ref, w_ref, mask_ref, gamma_ref, beta_ref,
                                o_ref, p_ref, *, tap_starts, cin, count, eps):
    """Single-step fused Conv3d(k=3,s=1,p=1) + BatchNorm3d(batch stats) + ReLU.

    x_ref:     (Cin, margin + N*Ppad + margin)  halo'd flattened padded input
    w_ref:     (Cout, Kpad)   conv weights, tap-major (k = tap*Cin + ci), 0-pad
    mask_ref:  (1, N*Ppad)    1.0 at interior (valid output) columns, else 0.0
    gamma_ref: (Cout, 1)      BN scale
    beta_ref:  (Cout, 1)      BN shift
    o_ref:     (Cout, N*Ppad) output (interior columns hold the result)
    p_ref:     (Kpad, N*Ppad) VMEM scratch: im2col patch matrix
    """
    np_cols = o_ref.shape[1]
    kpad = p_ref.shape[0]
    k_used = len(tap_starts) * cin

    # 1) Build the im2col patch matrix entirely in VMEM: each 3x3x3 tap is a
    #    static lane-shifted slice of the halo'd flattened input.  The 27x
    #    blow-up never touches HBM.
    for t, start in enumerate(tap_starts):
        p_ref[t * cin:(t + 1) * cin, :] = x_ref[:, start:start + np_cols]
    if k_used < kpad:
        p_ref[k_used:, :] = jnp.zeros((kpad - k_used, np_cols),
                                      dtype=p_ref.dtype)

    # 2) Whole-batch conv as ONE lane-dense MXU matmul, bf16 operands with f32
    #    accumulation.  (Conv bias omitted: BN's mean subtraction cancels it.)
    y = jnp.dot(w_ref[...], p_ref[...], preferred_element_type=jnp.float32)

    # 3) Batch-norm batch statistics over the valid columns only (biased var,
    #    two-pass form to avoid E[x^2]-E[x]^2 cancellation).
    mask = mask_ref[...]
    inv_count = 1.0 / count
    mean = jnp.sum(y * mask, axis=1, keepdims=True) * inv_count      # (Cout,1)
    diff = (y - mean) * mask
    var = jnp.sum(diff * diff, axis=1, keepdims=True) * inv_count    # (Cout,1)
    inv_std = jax.lax.rsqrt(var + eps)

    # 4) BN affine + ReLU; full-lane unmasked stores (last dim % 128 == 0).
    scale = gamma_ref[...] * inv_std
    shift = beta_ref[...] - mean * scale
    o_ref[...] = jnp.maximum(y * scale + shift, 0.0)


@functools.partial(jax.jit, static_argnames=("eps", "compute_dtype"))
def conv3d_bn_relu(x, weight, bias, gamma, beta, eps=1e-5,
                   compute_dtype=jnp.bfloat16):
    """Forward of UNet_3D.conv3d: Conv3d(k=3,s=1,p=1) -> BatchNorm3d -> ReLU.

    x:      (N, Cin, D, H, W) float32 (PyTorch NCDHW layout)
    weight: (Cout, Cin, 3, 3, 3)      (PyTorch OIDHW layout)
    bias, gamma, beta: (Cout,)

    `bias` is accepted for interface parity but unused: BatchNorm's mean
    subtraction cancels the conv bias exactly, so dropping it saves a VPU add
    per output element without changing the forward output.
    """
    del bias
    N, Cin, D, H, W = x.shape
    Cout = weight.shape[0]
    Dp, Hp, Wp = D + 2, H + 2, W + 2
    p3 = Dp * Hp * Wp                      # flattened padded volume size
    ppad = _round_up(p3, 128)              # lane-dense per-sample stride
    np_cols = N * ppad                     # matmul RHS width
    k = 27 * Cin
    kpad = _round_up(k, 128)               # pad contraction dim to MXU tile
    max_shift = Hp * Wp + Wp + 1           # largest |tap shift|
    margin = _round_up(max_shift, 128)     # halo so every tap slice is in-bounds

    # --- layout glue (plain XLA, ~1x the input size; NO 27x im2col) --------
    xp = jnp.pad(x, ((0, 0), (0, 0), (1, 1), (1, 1), (1, 1)))   # spatial halo
    xf = xp.reshape(N, Cin, p3)
    xf = jnp.pad(xf, ((0, 0), (0, 0), (0, ppad - p3)))          # lane pad
    xf = xf.transpose(1, 0, 2).reshape(Cin, np_cols)            # (Cin, N*Ppad)
    xh = jnp.pad(xf, ((0, 0), (margin, margin))).astype(compute_dtype)

    # Weights as (Cout, Kpad), tap-major: k = (kd*9 + kh*3 + kw)*Cin + ci.
    wmat = weight.transpose(0, 2, 3, 4, 1).reshape(Cout, k)
    wmat = jnp.pad(wmat, ((0, 0), (0, kpad - k))).astype(compute_dtype)

    # Interior-column mask: selects real output voxels for the BN statistics.
    m3 = jnp.zeros((Dp, Hp, Wp), jnp.float32)
    m3 = m3.at[1:1 + D, 1:1 + H, 1:1 + W].set(1.0)
    mask = jnp.pad(m3.reshape(p3), (0, ppad - p3))
    mask = jnp.tile(mask, (N,)).reshape(1, np_cols)

    gamma2 = gamma.reshape(Cout, 1).astype(jnp.float32)
    beta2 = beta.reshape(Cout, 1).astype(jnp.float32)

    # Per-tap static lane-shift starts into the halo'd flattened input.
    tap_starts = tuple(
        margin + (kd - 1) * Hp * Wp + (kh - 1) * Wp + (kw - 1)
        for kd in range(3) for kh in range(3) for kw in range(3))

    out = pl.pallas_call(
        functools.partial(fused_conv3d_bn_relu_kernel,
                          tap_starts=tap_starts, cin=Cin,
                          count=float(N * D * H * W), eps=eps),
        out_shape=jax.ShapeDtypeStruct((Cout, np_cols), jnp.float32),
        grid_spec=pltpu.PrefetchScalarGridSpec(
            num_scalar_prefetch=0,
            grid=(1,),                      # single step: no grid overhead
            in_specs=[
                pl.BlockSpec((Cin, xh.shape[1]), lambda i: (0, 0)),
                pl.BlockSpec((Cout, kpad), lambda i: (0, 0)),
                pl.BlockSpec((1, np_cols), lambda i: (0, 0)),
                pl.BlockSpec((Cout, 1), lambda i: (0, 0)),
                pl.BlockSpec((Cout, 1), lambda i: (0, 0)),
            ],
            out_specs=pl.BlockSpec((Cout, np_cols), lambda i: (0, 0)),
            scratch_shapes=[pltpu.VMEM((kpad, np_cols), compute_dtype)],
        ),
        compiler_params=pltpu.CompilerParams(
            dimension_semantics=("arbitrary",),
            vmem_limit_bytes=32 * 1024 * 1024,
        ),
    )(xh, wmat, mask, gamma2, beta2)

    # Extract the interior voxels; result is already channel-major.
    y = out.reshape(Cout, N, ppad)[:, :, :p3].reshape(Cout, N, Dp, Hp, Wp)
    y = y[:, :, 1:1 + D, 1:1 + H, 1:1 + W]
    return jnp.transpose(y, (1, 0, 2, 3, 4))


def reference(x, weight, bias, gamma, beta, eps=1e-5, conv_dtype=jnp.float32):
    """Pure-JAX (XLA) reference of the PyTorch module forward.

    `conv_dtype=jnp.bfloat16` builds a reference whose conv uses the same bf16
    operand rounding (with f32 accumulation) as the kernel's MXU matmul.
    """
    y = jax.lax.conv_general_dilated(
        x.astype(conv_dtype), weight.astype(conv_dtype),
        window_strides=(1, 1, 1), padding=[(1, 1)] * 3,
        dimension_numbers=("NCDHW", "OIDHW", "NCDHW"),
        preferred_element_type=jnp.float32)
    y = y + bias.reshape(1, -1, 1, 1, 1)
    mean = jnp.mean(y, axis=(0, 2, 3, 4), keepdims=True)
    var = jnp.mean((y - mean) ** 2, axis=(0, 2, 3, 4), keepdims=True)  # biased
    yn = (y - mean) / jnp.sqrt(var + eps)
    yn = yn * gamma.reshape(1, -1, 1, 1, 1) + beta.reshape(1, -1, 1, 1, 1)
    return jnp.maximum(yn, 0.0)


if __name__ == "__main__":
    key = jax.random.PRNGKey(0)
    N, Cin, Cout, D, H, W = 2, 4, 8, 8, 8, 8
    k1, k2, k3, k4, k5 = jax.random.split(key, 5)

    x = jax.random.normal(k1, (N, Cin, D, H, W), dtype=jnp.float32)
    conv_w = 0.1 * jax.random.normal(k2, (Cout, Cin, 3, 3, 3), dtype=jnp.float32)
    conv_b = 0.1 * jax.random.normal(k3, (Cout,), dtype=jnp.float32)
    bn_gamma = 1.0 + 0.1 * jax.random.normal(k4, (Cout,), dtype=jnp.float32)
    bn_beta = 0.1 * jax.random.normal(k5, (Cout,), dtype=jnp.float32)

    out = conv3d_bn_relu(x, conv_w, conv_b, bn_gamma, bn_beta)
    out = jax.block_until_ready(out)
    assert out.shape == (N, Cout, D, H, W), out.shape

    # Tight check vs a reference whose conv uses the same bf16 operand
    # rounding (f32 accumulation) as the kernel's MXU matmul.
    ref_bf16 = reference(x, conv_w, conv_b, bn_gamma, bn_beta,
                         conv_dtype=jnp.bfloat16)
    err_bf16 = float(jnp.max(jnp.abs(out - ref_bf16)))
    assert err_bf16 < 5e-3, f"max abs error vs bf16-conv reference {err_bf16}"

    # Loose sanity check vs the full-f32 reference (difference is only the
    # bf16 operand rounding of the MXU matmul).
    ref_f32 = reference(x, conv_w, conv_b, bn_gamma, bn_beta,
                        conv_dtype=jnp.float32)
    err_f32 = float(jnp.max(jnp.abs(out - ref_f32)))
    assert err_f32 < 5e-2, f"max abs error vs f32 reference {err_f32}"

    print("KERNEL_OK")
</pallas_src>

<mosaic_0001>
module attributes {stable_mosaic.version = 11 : i64} {
  func.func @fused_conv3d_bn_relu_kernel(%arg0: i32, %arg1: memref<4x2304xbf16, #tpu.memory_space<vmem>>, %arg2: memref<8x128xbf16, #tpu.memory_space<vmem>>, %arg3: memref<1x2048xf32, #tpu.memory_space<vmem>>, %arg4: memref<8x1xf32, #tpu.memory_space<vmem>>, %arg5: memref<8x1xf32, #tpu.memory_space<vmem>>, %arg6: memref<8x2048xf32, #tpu.memory_space<vmem>>, %arg7: memref<128x2048xbf16, #tpu.memory_space<vmem>>) attributes {dimension_semantics = [#tpu.dimension_semantics<arbitrary>], iteration_bounds = array<i64: 1>, scalar_prefetch = 0 : i64, scratch_operands = 1 : i64, tpu.core_type = #tpu.core_type<tc>, window_params = [{pipeline_mode = #tpu.pipeline_mode<synchronous>, transform_indices = @transform_0, window_bounds = array<i64: 4, 2304>}, {pipeline_mode = #tpu.pipeline_mode<synchronous>, transform_indices = @transform_1, window_bounds = array<i64: 8, 128>}, {pipeline_mode = #tpu.pipeline_mode<synchronous>, transform_indices = @transform_2, window_bounds = array<i64: 1, 2048>}, {pipeline_mode = #tpu.pipeline_mode<synchronous>, transform_indices = @transform_3, window_bounds = array<i64: 8, 1>}, {pipeline_mode = #tpu.pipeline_mode<synchronous>, transform_indices = @transform_4, window_bounds = array<i64: 8, 1>}, {pipeline_mode = #tpu.pipeline_mode<synchronous>, transform_indices = @transform_5, window_bounds = array<i64: 8, 2048>}]} {
    %c0 = arith.constant 0 : index
    %c17 = arith.constant 17 : index
    %0 = vector.load %arg1[%c0, %c17] : memref<4x2304xbf16, #tpu.memory_space<vmem>>, vector<4x2048xbf16>
    %c0_0 = arith.constant 0 : index
    %c0_1 = arith.constant 0 : index
    %1 = vector.load %arg7[%c0_0, %c0_1] : memref<128x2048xbf16, #tpu.memory_space<vmem>>, vector<4x2048xbf16>
    tpu.vector_store %arg7[%c0_0, %c0_1], %0 {strides = array<i32>} : memref<128x2048xbf16, #tpu.memory_space<vmem>>, vector<4x2048xbf16>,
    %c0_2 = arith.constant 0 : index
    %c18 = arith.constant 18 : index
    %2 = vector.load %arg1[%c0_2, %c18] : memref<4x2304xbf16, #tpu.memory_space<vmem>>, vector<4x2048xbf16>
    %c4 = arith.constant 4 : index
    %c0_3 = arith.constant 0 : index
    %3 = vector.load %arg7[%c4, %c0_3] : memref<128x2048xbf16, #tpu.memory_space<vmem>>, vector<4x2048xbf16>
    tpu.vector_store %arg7[%c4, %c0_3], %2 {strides = array<i32>} : memref<128x2048xbf16, #tpu.memory_space<vmem>>, vector<4x2048xbf16>,
    %c0_4 = arith.constant 0 : index
    %c19 = arith.constant 19 : index
    %4 = vector.load %arg1[%c0_4, %c19] : memref<4x2304xbf16, #tpu.memory_space<vmem>>, vector<4x2048xbf16>
    %c8 = arith.constant 8 : index
    %c0_5 = arith.constant 0 : index
    %5 = vector.load %arg7[%c8, %c0_5] : memref<128x2048xbf16, #tpu.memory_space<vmem>>, vector<4x2048xbf16>
    tpu.vector_store %arg7[%c8, %c0_5], %4 {strides = array<i32>} : memref<128x2048xbf16, #tpu.memory_space<vmem>>, vector<4x2048xbf16>,
    %c0_6 = arith.constant 0 : index
    %c27 = arith.constant 27 : index
    %6 = vector.load %arg1[%c0_6, %c27] : memref<4x2304xbf16, #tpu.memory_space<vmem>>, vector<4x2048xbf16>
    %c12 = arith.constant 12 : index
    %c0_7 = arith.constant 0 : index
    %7 = vector.load %arg7[%c12, %c0_7] : memref<128x2048xbf16, #tpu.memory_space<vmem>>, vector<4x2048xbf16>
    tpu.vector_store %arg7[%c12, %c0_7], %6 {strides = array<i32>} : memref<128x2048xbf16, #tpu.memory_space<vmem>>, vector<4x2048xbf16>,
    %c0_8 = arith.constant 0 : index
    %c28 = arith.constant 28 : index
    %8 = vector.load %arg1[%c0_8, %c28] : memref<4x2304xbf16, #tpu.memory_space<vmem>>, vector<4x2048xbf16>
    %c16 = arith.constant 16 : index
    %c0_9 = arith.constant 0 : index
    %9 = vector.load %arg7[%c16, %c0_9] : memref<128x2048xbf16, #tpu.memory_space<vmem>>, vector<4x2048xbf16>
    tpu.vector_store %arg7[%c16, %c0_9], %8 {strides = array<i32>} : memref<128x2048xbf16, #tpu.memory_space<vmem>>, vector<4x2048xbf16>,
    %c0_10 = arith.constant 0 : index
    %c29 = arith.constant 29 : index
    %10 = vector.load %arg1[%c0_10, %c29] : memref<4x2304xbf16, #tpu.memory_space<vmem>>, vector<4x2048xbf16>
    %c20 = arith.constant 20 : index
    %c0_11 = arith.constant 0 : index
    %11 = vector.load %arg7[%c20, %c0_11] : memref<128x2048xbf16, #tpu.memory_space<vmem>>, vector<4x2048xbf16>
    tpu.vector_store %arg7[%c20, %c0_11], %10 {strides = array<i32>} : memref<128x2048xbf16, #tpu.memory_space<vmem>>, vector<4x2048xbf16>,
    %c0_12 = arith.constant 0 : index
    %c37 = arith.constant 37 : index
    %12 = vector.load %arg1[%c0_12, %c37] : memref<4x2304xbf16, #tpu.memory_space<vmem>>, vector<4x2048xbf16>
    %c24 = arith.constant 24 : index
    %c0_13 = arith.constant 0 : index
    %13 = vector.load %arg7[%c24, %c0_13] : memref<128x2048xbf16, #tpu.memory_space<vmem>>, vector<4x2048xbf16>
    tpu.vector_store %arg7[%c24, %c0_13], %12 {strides = array<i32>} : memref<128x2048xbf16, #tpu.memory_space<vmem>>, vector<4x2048xbf16>,
    %c0_14 = arith.constant 0 : index
    %c38 = arith.constant 38 : index
    %14 = vector.load %arg1[%c0_14, %c38] : memref<4x2304xbf16, #tpu.memory_space<vmem>>, vector<4x2048xbf16>
    %c28_15 = arith.constant 28 : index
    %c0_16 = arith.constant 0 : index
    %15 = vector.load %arg7[%c28_15, %c0_16] : memref<128x2048xbf16, #tpu.memory_space<vmem>>, vector<4x2048xbf16>
    tpu.vector_store %arg7[%c28_15, %c0_16], %14 {strides = array<i32>} : memref<128x2048xbf16, #tpu.memory_space<vmem>>, vector<4x2048xbf16>,
    %c0_17 = arith.constant 0 : index
    %c39 = arith.constant 39 : index
    %16 = vector.load %arg1[%c0_17, %c39] : memref<4x2304xbf16, #tpu.memory_space<vmem>>, vector<4x2048xbf16>
    %c32 = arith.constant 32 : index
    %c0_18 = arith.constant 0 : index
    %17 = vector.load %arg7[%c32, %c0_18] : memref<128x2048xbf16, #tpu.memory_space<vmem>>, vector<4x2048xbf16>
    tpu.vector_store %arg7[%c32, %c0_18], %16 {strides = array<i32>} : memref<128x2048xbf16, #tpu.memory_space<vmem>>, vector<4x2048xbf16>,
    %c0_19 = arith.constant 0 : index
    %c117 = arith.constant 117 : index
    %18 = vector.load %arg1[%c0_19, %c117] : memref<4x2304xbf16, #tpu.memory_space<vmem>>, vector<4x2048xbf16>
    %c36 = arith.constant 36 : index
    %c0_20 = arith.constant 0 : index
    %19 = vector.load %arg7[%c36, %c0_20] : memref<128x2048xbf16, #tpu.memory_space<vmem>>, vector<4x2048xbf16>
    tpu.vector_store %arg7[%c36, %c0_20], %18 {strides = array<i32>} : memref<128x2048xbf16, #tpu.memory_space<vmem>>, vector<4x2048xbf16>,
    %c0_21 = arith.constant 0 : index
    %c118 = arith.constant 118 : index
    %20 = vector.load %arg1[%c0_21, %c118] : memref<4x2304xbf16, #tpu.memory_space<vmem>>, vector<4x2048xbf16>
    %c40 = arith.constant 40 : index
    %c0_22 = arith.constant 0 : index
    %21 = vector.load %arg7[%c40, %c0_22] : memref<128x2048xbf16, #tpu.memory_space<vmem>>, vector<4x2048xbf16>
    tpu.vector_store %arg7[%c40, %c0_22], %20 {strides = array<i32>} : memref<128x2048xbf16, #tpu.memory_space<vmem>>, vector<4x2048xbf16>,
    %c0_23 = arith.constant 0 : index
    %c119 = arith.constant 119 : index
    %22 = vector.load %arg1[%c0_23, %c119] : memref<4x2304xbf16, #tpu.memory_space<vmem>>, vector<4x2048xbf16>
    %c44 = arith.constant 44 : index
    %c0_24 = arith.constant 0 : index
    %23 = vector.load %arg7[%c44, %c0_24] : memref<128x2048xbf16, #tpu.memory_space<vmem>>, vector<4x2048xbf16>
    tpu.vector_store %arg7[%c44, %c0_24], %22 {strides = array<i32>} : memref<128x2048xbf16, #tpu.memory_space<vmem>>, vector<4x2048xbf16>,
    %c0_25 = arith.constant 0 : index
    %c127 = arith.constant 127 : index
    %24 = vector.load %arg1[%c0_25, %c127] : memref<4x2304xbf16, #tpu.memory_space<vmem>>, vector<4x2048xbf16>
    %c48 = arith.constant 48 : index
    %c0_26 = arith.constant 0 : index
    %25 = vector.load %arg7[%c48, %c0_26] : memref<128x2048xbf16, #tpu.memory_space<vmem>>, vector<4x2048xbf16>
    tpu.vector_store %arg7[%c48, %c0_26], %24 {strides = array<i32>} : memref<128x2048xbf16, #tpu.memory_space<vmem>>, vector<4x2048xbf16>,
    %c0_27 = arith.constant 0 : index
    %c128 = arith.constant 128 : index
    %26 = vector.load %arg1[%c0_27, %c128] : memref<4x2304xbf16, #tpu.memory_space<vmem>>, vector<4x2048xbf16>
    %c52 = arith.constant 52 : index
    %c0_28 = arith.constant 0 : index
    %27 = vector.load %arg7[%c52, %c0_28] : memref<128x2048xbf16, #tpu.memory_space<vmem>>, vector<4x2048xbf16>
    tpu.vector_store %arg7[%c52, %c0_28], %26 {strides = array<i32>} : memref<128x2048xbf16, #tpu.memory_space<vmem>>, vector<4x2048xbf16>,
    %c0_29 = arith.constant 0 : index
    %c129 = arith.constant 129 : index
    %28 = vector.load %arg1[%c0_29, %c129] : memref<4x2304xbf16, #tpu.memory_space<vmem>>, vector<4x2048xbf16>
    %c56 = arith.constant 56 : index
    %c0_30 = arith.constant 0 : index
    %29 = vector.load %arg7[%c56, %c0_30] : memref<128x2048xbf16, #tpu.memory_space<vmem>>, vector<4x2048xbf16>
    tpu.vector_store %arg7[%c56, %c0_30], %28 {strides = array<i32>} : memref<128x2048xbf16, #tpu.memory_space<vmem>>, vector<4x2048xbf16>,
    %c0_31 = arith.constant 0 : index
    %c137 = arith.constant 137 : index
    %30 = vector.load %arg1[%c0_31, %c137] : memref<4x2304xbf16, #tpu.memory_space<vmem>>, vector<4x2048xbf16>
    %c60 = arith.constant 60 : index
    %c0_32 = arith.constant 0 : index
    %31 = vector.load %arg7[%c60, %c0_32] : memref<128x2048xbf16, #tpu.memory_space<vmem>>, vector<4x2048xbf16>
    tpu.vector_store %arg7[%c60, %c0_32], %30 {strides = array<i32>} : memref<128x2048xbf16, #tpu.memory_space<vmem>>, vector<4x2048xbf16>,
    %c0_33 = arith.constant 0 : index
    %c138 = arith.constant 138 : index
    %32 = vector.load %arg1[%c0_33, %c138] : memref<4x2304xbf16, #tpu.memory_space<vmem>>, vector<4x2048xbf16>
    %c64 = arith.constant 64 : index
    %c0_34 = arith.constant 0 : index
    %33 = vector.load %arg7[%c64, %c0_34] : memref<128x2048xbf16, #tpu.memory_space<vmem>>, vector<4x2048xbf16>
    tpu.vector_store %arg7[%c64, %c0_34], %32 {strides = array<i32>} : memref<128x2048xbf16, #tpu.memory_space<vmem>>, vector<4x2048xbf16>,
    %c0_35 = arith.constant 0 : index
    %c139 = arith.constant 139 : index
    %34 = vector.load %arg1[%c0_35, %c139] : memref<4x2304xbf16, #tpu.memory_space<vmem>>, vector<4x2048xbf16>
    %c68 = arith.constant 68 : index
    %c0_36 = arith.constant 0 : index
    %35 = vector.load %arg7[%c68, %c0_36] : memref<128x2048xbf16, #tpu.memory_space<vmem>>, vector<4x2048xbf16>
    tpu.vector_store %arg7[%c68, %c0_36], %34 {strides = array<i32>} : memref<128x2048xbf16, #tpu.memory_space<vmem>>, vector<4x2048xbf16>,
    %c0_37 = arith.constant 0 : index
    %c217 = arith.constant 217 : index
    %36 = vector.load %arg1[%c0_37, %c217] : memref<4x2304xbf16, #tpu.memory_space<vmem>>, vector<4x2048xbf16>
    %c72 = arith.constant 72 : index
    %c0_38 = arith.constant 0 : index
    %37 = vector.load %arg7[%c72, %c0_38] : memref<128x2048xbf16, #tpu.memory_space<vmem>>, vector<4x2048xbf16>
    tpu.vector_store %arg7[%c72, %c0_38], %36 {strides = array<i32>} : memref<128x2048xbf16, #tpu.memory_space<vmem>>, vector<4x2048xbf16>,
    %c0_39 = arith.constant 0 : index
    %c218 = arith.constant 218 : index
    %38 = vector.load %arg1[%c0_39, %c218] : memref<4x2304xbf16, #tpu.memory_space<vmem>>, vector<4x2048xbf16>
    %c76 = arith.constant 76 : index
    %c0_40 = arith.constant 0 : index
    %39 = vector.load %arg7[%c76, %c0_40] : memref<128x2048xbf16, #tpu.memory_space<vmem>>, vector<4x2048xbf16>
    tpu.vector_store %arg7[%c76, %c0_40], %38 {strides = array<i32>} : memref<128x2048xbf16, #tpu.memory_space<vmem>>, vector<4x2048xbf16>,
    %c0_41 = arith.constant 0 : index
    %c219 = arith.constant 219 : index
    %40 = vector.load %arg1[%c0_41, %c219] : memref<4x2304xbf16, #tpu.memory_space<vmem>>, vector<4x2048xbf16>
    %c80 = arith.constant 80 : index
    %c0_42 = arith.constant 0 : index
    %41 = vector.load %arg7[%c80, %c0_42] : memref<128x2048xbf16, #tpu.memory_space<vmem>>, vector<4x2048xbf16>
    tpu.vector_store %arg7[%c80, %c0_42], %40 {strides = array<i32>} : memref<128x2048xbf16, #tpu.memory_space<vmem>>, vector<4x2048xbf16>,
    %c0_43 = arith.constant 0 : index
    %c227 = arith.constant 227 : index
    %42 = vector.load %arg1[%c0_43, %c227] : memref<4x2304xbf16, #tpu.memory_space<vmem>>, vector<4x2048xbf16>
    %c84 = arith.constant 84 : index
    %c0_44 = arith.constant 0 : index
    %43 = vector.load %arg7[%c84, %c0_44] : memref<128x2048xbf16, #tpu.memory_space<vmem>>, vector<4x2048xbf16>
    tpu.vector_store %arg7[%c84, %c0_44], %42 {strides = array<i32>} : memref<128x2048xbf16, #tpu.memory_space<vmem>>, vector<4x2048xbf16>,
    %c0_45 = arith.constant 0 : index
    %c228 = arith.constant 228 : index
    %44 = vector.load %arg1[%c0_45, %c228] : memref<4x2304xbf16, #tpu.memory_space<vmem>>, vector<4x2048xbf16>
    %c88 = arith.constant 88 : index
    %c0_46 = arith.constant 0 : index
    %45 = vector.load %arg7[%c88, %c0_46] : memref<128x2048xbf16, #tpu.memory_space<vmem>>, vector<4x2048xbf16>
    tpu.vector_store %arg7[%c88, %c0_46], %44 {strides = array<i32>} : memref<128x2048xbf16, #tpu.memory_space<vmem>>, vector<4x2048xbf16>,
    %c0_47 = arith.constant 0 : index
    %c229 = arith.constant 229 : index
    %46 = vector.load %arg1[%c0_47, %c229] : memref<4x2304xbf16, #tpu.memory_space<vmem>>, vector<4x2048xbf16>
    %c92 = arith.constant 92 : index
    %c0_48 = arith.constant 0 : index
    %47 = vector.load %arg7[%c92, %c0_48] : memref<128x2048xbf16, #tpu.memory_space<vmem>>, vector<4x2048xbf16>
    tpu.vector_store %arg7[%c92, %c0_48], %46 {strides = array<i32>} : memref<128x2048xbf16, #tpu.memory_space<vmem>>, vector<4x2048xbf16>,
    %c0_49 = arith.constant 0 : index
    %c237 = arith.constant 237 : index
    %48 = vector.load %arg1[%c0_49, %c237] : memref<4x2304xbf16, #tpu.memory_space<vmem>>, vector<4x2048xbf16>
    %c96 = arith.constant 96 : index
    %c0_50 = arith.constant 0 : index
    %49 = vector.load %arg7[%c96, %c0_50] : memref<128x2048xbf16, #tpu.memory_space<vmem>>, vector<4x2048xbf16>
    tpu.vector_store %arg7[%c96, %c0_50], %48 {strides = array<i32>} : memref<128x2048xbf16, #tpu.memory_space<vmem>>, vector<4x2048xbf16>,
    %c0_51 = arith.constant 0 : index
    %c238 = arith.constant 238 : index
    %50 = vector.load %arg1[%c0_51, %c238] : memref<4x2304xbf16, #tpu.memory_space<vmem>>, vector<4x2048xbf16>
    %c100 = arith.constant 100 : index
    %c0_52 = arith.constant 0 : index
    %51 = vector.load %arg7[%c100, %c0_52] : memref<128x2048xbf16, #tpu.memory_space<vmem>>, vector<4x2048xbf16>
    tpu.vector_store %arg7[%c100, %c0_52], %50 {strides = array<i32>} : memref<128x2048xbf16, #tpu.memory_space<vmem>>, vector<4x2048xbf16>,
    %c0_53 = arith.constant 0 : index
    %c239 = arith.constant 239 : index
    %52 = vector.load %arg1[%c0_53, %c239] : memref<4x2304xbf16, #tpu.memory_space<vmem>>, vector<4x2048xbf16>
    %c104 = arith.constant 104 : index
    %c0_54 = arith.constant 0 : index
    %53 = vector.load %arg7[%c104, %c0_54] : memref<128x2048xbf16, #tpu.memory_space<vmem>>, vector<4x2048xbf16>
    tpu.vector_store %arg7[%c104, %c0_54], %52 {strides = array<i32>} : memref<128x2048xbf16, #tpu.memory_space<vmem>>, vector<4x2048xbf16>,
    %cst = arith.constant 0.000000e+00 : bf16
    %54 = vector.broadcast %cst : bf16 to vector<20x2048xbf16>
    %c108 = arith.constant 108 : index
    %c0_55 = arith.constant 0 : index
    %55 = vector.load %arg7[%c108, %c0_55] : memref<128x2048xbf16, #tpu.memory_space<vmem>>, vector<20x2048xbf16>
    tpu.vector_store %arg7[%c108, %c0_55], %54 {strides = array<i32>} : memref<128x2048xbf16, #tpu.memory_space<vmem>>, vector<20x2048xbf16>,
    %c0_56 = arith.constant 0 : index
    %c0_57 = arith.constant 0 : index
    %56 = vector.load %arg2[%c0_56, %c0_57] : memref<8x128xbf16, #tpu.memory_space<vmem>>, vector<8x128xbf16>
    %c0_58 = arith.constant 0 : index
    %c0_59 = arith.constant 0 : index
    %57 = vector.load %arg7[%c0_58, %c0_59] : memref<128x2048xbf16, #tpu.memory_space<vmem>>, vector<128x2048xbf16>
    %cst_60 = arith.constant dense<0.000000e+00> : vector<8x2048xf32>
    %58 = tpu.matmul %56, %57, %cst_60 {dimension_numbers = #tpu.dot_dimension_numbers<[1], [0], [0], [1], [0, 0, 1, 1], [], []>} : vector<8x128xbf16>, vector<128x2048xbf16>, vector<8x2048xf32> -> vector<8x2048xf32>
    %c0_61 = arith.constant 0 : index
    %c0_62 = arith.constant 0 : index
    %59 = vector.load %arg3[%c0_61, %c0_62] : memref<1x2048xf32, #tpu.memory_space<vmem>>, vector<1x2048xf32>
    %60 = vector.broadcast %59 : vector<1x2048xf32> to vector<8x2048xf32>
    %61 = arith.mulf %58, %60 : vector<8x2048xf32>
    %cst_63 = arith.constant dense<0.000000e+00> : vector<8xf32>
    %62 = vector.multi_reduction <add>, %61, %cst_63 [1] : vector<8x2048xf32> to vector<8xf32>
    %63 = vector.shape_cast %62 : vector<8xf32> to vector<8x1xf32>
    %cst_64 = arith.constant 9.765625E-4 : f32
    %64 = vector.broadcast %cst_64 : f32 to vector<8x1xf32>
    %65 = arith.mulf %63, %64 : vector<8x1xf32>
    %66 = vector.broadcast %65 : vector<8x1xf32> to vector<8x2048xf32>
    %67 = arith.subf %58, %66 : vector<8x2048xf32>
    %68 = vector.broadcast %59 : vector<1x2048xf32> to vector<8x2048xf32>
    %69 = arith.mulf %67, %68 : vector<8x2048xf32>
    %70 = arith.mulf %69, %69 : vector<8x2048xf32>
    %cst_65 = arith.constant dense<0.000000e+00> : vector<8xf32>
    %71 = vector.multi_reduction <add>, %70, %cst_65 [1] : vector<8x2048xf32> to vector<8xf32>
    %72 = vector.shape_cast %71 : vector<8xf32> to vector<8x1xf32>
    %cst_66 = arith.constant 9.765625E-4 : f32
    %73 = vector.broadcast %cst_66 : f32 to vector<8x1xf32>
    %74 = arith.mulf %72, %73 : vector<8x1xf32>
    %cst_67 = arith.constant 9.99999974E-6 : f32
    %75 = vector.broadcast %cst_67 : f32 to vector<8x1xf32>
    %76 = arith.addf %74, %75 : vector<8x1xf32>
    %77 = math.rsqrt %76 : vector<8x1xf32>
    %c0_68 = arith.constant 0 : index
    %c0_69 = arith.constant 0 : index
    %78 = vector.load %arg4[%c0_68, %c0_69] : memref<8x1xf32, #tpu.memory_space<vmem>>, vector<8x1xf32>
    %79 = arith.mulf %78, %77 : vector<8x1xf32>
    %c0_70 = arith.constant 0 : index
    %c0_71 = arith.constant 0 : index
    %80 = vector.load %arg5[%c0_70, %c0_71] : memref<8x1xf32, #tpu.memory_space<vmem>>, vector<8x1xf32>
    %81 = arith.mulf %65, %79 : vector<8x1xf32>
    %82 = arith.subf %80, %81 : vector<8x1xf32>
    %83 = vector.broadcast %79 : vector<8x1xf32> to vector<8x2048xf32>
    %84 = arith.mulf %58, %83 : vector<8x2048xf32>
    %85 = vector.broadcast %82 : vector<8x1xf32> to vector<8x2048xf32>
    %86 = arith.addf %84, %85 : vector<8x2048xf32>
    %cst_72 = arith.constant 0.000000e+00 : f32
    %87 = vector.broadcast %cst_72 : f32 to vector<8x2048xf32>
    %88 = arith.maximumf %86, %87 : vector<8x2048xf32>
    %c0_73 = arith.constant 0 : index
    %c0_74 = arith.constant 0 : index
    %89 = vector.load %arg6[%c0_73, %c0_74] : memref<8x2048xf32, #tpu.memory_space<vmem>>, vector<8x2048xf32>
    tpu.vector_store %arg6[%c0_73, %c0_74], %88 {strides = array<i32>} : memref<8x2048xf32, #tpu.memory_space<vmem>>, vector<8x2048xf32>,
    return
  }
  func.func @transform_0(%arg0: i32) -> (i32, i32) {
    %c0_i32 = arith.constant 0 : i32
    %c0_i32_0 = arith.constant 0 : i32
    %c0_i32_1 = arith.constant 0 : i32
    return %c0_i32, %c0_i32_0 : i32, i32
  }
  func.func @transform_1(%arg0: i32) -> (i32, i32) {
    %c0_i32 = arith.constant 0 : i32
    %c0_i32_0 = arith.constant 0 : i32
    %c0_i32_1 = arith.constant 0 : i32
    return %c0_i32, %c0_i32_0 : i32, i32
  }
  func.func @transform_2(%arg0: i32) -> (i32, i32) {
    %c0_i32 = arith.constant 0 : i32
    %c0_i32_0 = arith.constant 0 : i32
    %c0_i32_1 = arith.constant 0 : i32
    return %c0_i32, %c0_i32_0 : i32, i32
  }
  func.func @transform_3(%arg0: i32) -> (i32, i32) {
    %c0_i32 = arith.constant 0 : i32
    %c0_i32_0 = arith.constant 0 : i32
    %c0_i32_1 = arith.constant 0 : i32
    return %c0_i32, %c0_i32_0 : i32, i32
  }
  func.func @transform_4(%arg0: i32) -> (i32, i32) {
    %c0_i32 = arith.constant 0 : i32
    %c0_i32_0 = arith.constant 0 : i32
    %c0_i32_1 = arith.constant 0 : i32
    return %c0_i32, %c0_i32_0 : i32, i32
  }
  func.func @transform_5(%arg0: i32) -> (i32, i32) {
    %c0_i32 = arith.constant 0 : i32
    %c0_i32_0 = arith.constant 0 : i32
    %c0_i32_1 = arith.constant 0 : i32
    return %c0_i32, %c0_i32_0 : i32, i32
  }
}

</mosaic_0001>

<bundles_post_ra>
// kernel: conv3d_bn_relu.1
= control target key start
LH: loop header
LB: loop body
LE: loop exit
PB: predicated region body
PF: predicated region fallthrough
CT: control target
= control target key end

     0   :  { %v35_v0 = vlaneseq  ;;  %v5284_v1 = vmov 1983009808   ;;  %s5285_s20 = smov 18   ;;  %s5286_s21 = smov 19   ;;  %v5287_v12 = vmov 0   ;;  %vm125_vm0 = vcmask 1043456   ;;  %s8112_s0 = inlined_call_operand.vmem [shape: bf16[4,2304], index: 0, kind: input, shape index: {}]   ;;  %s8113_s1 = inlined_call_operand.vmem [shape: bf16[8,128], index: 1, kind: input, shape index: {}]   ;;  %s8114_s2 = inlined_call_operand.vmem [shape: f32[1,2048], index: 2, kind: input, shape index: {}]   ;;  %s8115_s3 = inlined_call_operand.vmem [shape: f32[8,1], index: 3, kind: input, shape index: {}]   ;;  %s8116_s4 = inlined_call_operand.vmem [shape: f32[8,1], index: 4, kind: input, shape index: {}]   ;;  %s8117_s5 = inlined_call_operand.vmem [shape: f32[8,2048], index: 5, kind: output, shape index: {}]  }
   0x1   :  { %v33_v2 = vunpack.c.l.s4 %v5284_v1  ;;  %v3405_v3 = vld [vmem:[%s8112_s0 + $0x2] sm:$0xff]  ;;  %3688 = vst [vmem:[#allocation2 + $0x380] sm:$0xff] %v5287_v12  ;;  %3680 = vst [vmem:[#allocation2 + $0x340] sm:$0xcc] %v5287_v12  ;;  %4505 = vmatprep.mubr.bf16.mxu0 %v5287_v12  ;;  %4546 = vmatprep.mubr.bf16.mxu1 %v5287_v12  ;;  %v5205_v13 = vcombine.high %v5287_v12, %v5287_v12  ;;  %v5204_v14 = vcombine.low %v5287_v12, %v5287_v12  ;;  %s5288_s22 = smov 17   ;;  %s5289_s23 = smov 37  }
   0x2   :  { %v5345_v4 = vshrl.u32 %v35_v0, 7  ;;  %v3415_v6 = vcombine.low %v3405_v3, %v3405_v3  ;;  %v3278_v8 = vcombine.high %v3405_v3, %v3405_v3  ;;  %3681 = vst [vmem:[#allocation2 + $0x348] sm:$0xcc] %v5287_v12  ;;  %3682 = vst [vmem:[#allocation2 + $0x350] sm:$0xcc] %v5287_v12  ;;  %5248 = vset.pattern.permute.xlu0 %v5287_v12  ;;  %5249 = vset.pattern.permute.xlu1 %v5287_v12  ;;  %s5290_s24 = smov 29  }
   0x3   :  { %v34_v5 = vunpack.c.0.s8 %v33_v2  ;;  %3683 = vst [vmem:[#allocation2 + $0x358] sm:$0xcc] %v5287_v12  ;;  %3684 = vst [vmem:[#allocation2 + $0x360] sm:$0xcc] %v5287_v12  ;;  %4473 = vmatprep.subr.bf16.mxu0 %v5205_v13  ;;  %4514 = vmatprep.subr.bf16.mxu1 %v5205_v13  ;;  %v5382_v15 = vld [vmem:[%s8112_s0 + $0xa] sm:$0xff]  ;;  %s5291_s27 = smov 28  }
   0x4   :  { %3685 = vst [vmem:[#allocation2 + $0x368] sm:$0xcc] %v5287_v12  ;;  %3686 = vst [vmem:[#allocation2 + $0x370] sm:$0xcc] %v5287_v12  ;;  %4474 = vmatpush1.bf16.msra.mxu0 %v5204_v14  ;;  %4515 = vmatpush1.bf16.msra.mxu1 %v5204_v14  ;;  %v3430_v16 = vcombine.low %v5382_v15, %v5382_v15  ;;  %s5292_s28 = smov 27   ;;  %s5293_s29 = smov 118  }
   0x5   :  { %v5348_v7 = vsub.s32 %v34_v5, %v5345_v4  ;;  %3687 = vst [vmem:[#allocation2 + $0x378] sm:$0xcc] %v5287_v12  ;;  %s5294_s30 = smov 117   ;;  %s5295_s6 = smov 39   ;;  %v1809_v19 = vld [vmem:[%s8112_s0 + $0x2] sm:$0xff]  ;;  %vm8161_vm1 = vcmask 146432  }
   0x6   :  { %s5296_s7 = smov 38   ;;  %v1672_v20 = vld [vmem:[%s8112_s0] sm:$0xff]  ;;  %v1817_v21 = vcombine.low %v1809_v19, %v1809_v19  ;;  %5078 = vst.sshfl [vmem:[#allocation2 + $0x188] sm:$0xf0 pattern:$0x76325410] %v1809_v19 }
   0x7   :  { %v5351_v9 = vrot.slane %v3415_v6, %v5348_v7  ;;  %v5354_v10 = vrot.slane %v3405_v3, %v5348_v7  ;;  %v5361_v11 = vrot.slane %v3278_v8, %v5348_v7  ;;  %v5396_v17 = vrot.slane %v5382_v15, %v5348_v7  ;;  %s5297_s12 = smov 1   ;;  %s5298_s13 = smov 127   ;;  %v5472_v27 = vld [vmem:[%s8112_s0 + $0x8] sm:$0xff] }
   0x8   :  { %v3437_v18 = vrot.slane %v3430_v16, %v5348_v7  ;;  %5077 = vst.sshfl [vmem:[#allocation2 + $0x180] sm:$0xf0 pattern:$0x76325410] %v1817_v21  ;;  %v5432_v22 = vrot.slane %v1672_v20, %v5348_v7  ;;  %v1682_v23 = vcombine.high %v1672_v20, %v1672_v20  ;;  %s8183_s14 = smov 119   ;;  %v1269_v25 = vcombine.low %v1672_v20, %v1672_v20  ;;  %s8181_s15 = smov 89  }
   0x9   :  { %3483 = vrot.lane.b32.xlu1 %v5351_v9, %s5285_s20  ;;  %3345 = vrot.lane.b32.xlu0 %v5354_v10, %s5286_s21  ;;  %s8171_s16 = smov 11   ;;  %s8136_s17 = smov 10   ;;  %v5480_v28 = vrot.slane %v5472_v27, %v5348_v7  ;;  %v1284_v29 = vcombine.low %v5472_v27, %v5472_v27  ;;  %vm3373_vm2 = vcmask 154624   ;;  %vm8160_vm3 = vcmask 138240  }
   0xa   :  { %v5438_v24 = vrot.slane %v1682_v23, %v5348_v7  ;;  %v5459_v26 = vrot.slane %v1269_v25, %v5348_v7  ;;  %s8118_s25 = smov 9   ;;  %s8179_s26 = smov 100   ;;  %vm2823_vm4 = vcmask 302080   ;;  %vm2961_vm5 = vcmask 236544  }
   0xb   :  { %s8177_s8 = smov 99   ;;  %s8151_s9 = smov 91   ;;  %v5508_v30 = vrot.slane %v1284_v29, %v5348_v7  ;;  %vm3098_vm6 = vcmask 228352   ;;  %vm3236_vm7 = vcmask 220160   ;;  %vm8130_vm8 = vcmask 965632  }
   0xc   :  { %s8149_s10 = smov 90   ;;  %s8146_s11 = smov 111   ;;  %vm8126_vm9 = vcmask 957440   ;;  %vm8125_vm10 = vcmask 318464   ;;  %vm8124_vm11 = vcmask 310272   ;;  %vm8127_vm12 = vcmask 7168  }
   0xd   :  { %3485 = vrot.lane.b32.xlu1 %v5354_v10, %s5285_s20  ;;  %3347 = vrot.lane.b32.xlu0 %v5361_v11, %s5286_s21  ;;  %s8144_s18 = smov 110   ;;  %s8122_s19 = smov 109   ;;  %vm8129_vm13 = vcmask 1039360   ;;  %vm8128_vm14 = vcmask 973824   ;;  %vm8140_vm15 = vcmask 728064  }
  0x11   :  { %3622 = vrot.lane.b32.xlu1 %v5361_v11, %s5288_s22  ;;  %3620 = vrot.lane.b32.xlu0 %v5354_v10, %s5288_s22 }
  0x15   :  { %2795 = vrot.lane.b32.xlu0 %v5354_v10, %s5289_s23  ;;  %2797 = vrot.lane.b32.xlu1 %v5361_v11, %s5289_s23 }
  0x19   :  { %2933 = vrot.lane.b32.xlu0 %v5351_v9, %s5290_s24  ;;  %2935 = vrot.lane.b32.xlu1 %v5354_v10, %s5290_s24 }
  0x1d   :  { %3070 = vrot.lane.b32.xlu0 %v5354_v10, %s5291_s27  ;;  %3072 = vrot.lane.b32.xlu1 %v5361_v11, %s5291_s27 }
  0x21   :  { %3208 = vrot.lane.b32.xlu0 %v5351_v9, %s5292_s28  ;;  %3210 = vrot.lane.b32.xlu1 %v5354_v10, %s5292_s28 }
  0x25   :  { %3349 = vrot.lane.b32.xlu0 %v5396_v17, %s5286_s21  ;;  %3487 = vrot.lane.b32.xlu1 %v3437_v18, %s5285_s20 }
  0x29   :  { %3624 = vrot.lane.b32.xlu0 %v5396_v17, %s5288_s22  ;;  %2245 = vrot.lane.b32.xlu1 %v5354_v10, %s5293_s29 }
  0x2d   :  { %2383 = vrot.lane.b32.xlu1 %v5351_v9, %s5294_s30  ;;  %2247 = vrot.lane.b32.xlu0 %v5361_v11, %s5293_s29 }
  0x31   :  { %2520 = vrot.lane.b32.xlu1 %v5354_v10, %s5295_s6  ;;  %2385 = vrot.lane.b32.xlu0 %v5354_v10, %s5294_s30 }
  0x35   :  { %2658 = vrot.lane.b32.xlu1 %v5351_v9, %s5296_s7  ;;  %2522 = vrot.lane.b32.xlu0 %v5361_v11, %s5295_s6 }
  0x39   :  { %2799 = vrot.lane.b32.xlu1 %v5396_v17, %s5289_s23  ;;  %2660 = vrot.lane.b32.xlu0 %v5354_v10, %s5296_s7 }
  0x3d   :  { %3074 = vrot.lane.b32.xlu1 %v5396_v17, %s5291_s27  ;;  %2937 = vrot.lane.b32.xlu0 %v3437_v18, %s5290_s24 }
  0x41   :  { %3212 = vrot.lane.b32.xlu0 %v3437_v18, %s5292_s28  ;;  %1749 = vrot.lane.b32.xlu1 %v5432_v22, %s5297_s12 }
  0x45   :  { %1970 = vrot.lane.b32.xlu1 %v5354_v10, %s5298_s13  ;;  %1751 = vrot.lane.b32.xlu0 %v5438_v24, %s5297_s12 }
  0x49   :  { %2108 = vrot.lane.b32.xlu1 %v5351_v9, %s8183_s14  ;;  %1972 = vrot.lane.b32.xlu0 %v5361_v11, %s5298_s13 }
  0x4d   :  { %2249 = vrot.lane.b32.xlu1 %v5396_v17, %s5293_s29  ;;  %2110 = vrot.lane.b32.xlu0 %v5354_v10, %s8183_s14 }
  0x51   :  { %2524 = vrot.lane.b32.xlu1 %v5396_v17, %s5295_s6  ;;  %2387 = vrot.lane.b32.xlu0 %v3437_v18, %s5294_s30 }
  0x55   :  { %2662 = vrot.lane.b32.xlu0 %v3437_v18, %s5296_s7  ;;  %1199 = vrot.lane.b32.xlu1 %v5432_v22, %s8181_s15 }
  0x59   :  { %1337 = vrot.lane.b32.xlu1 %v5459_v26, %s8171_s16  ;;  %1201 = vrot.lane.b32.xlu0 %v5438_v24, %s8181_s15 }
  0x5d   :  { %1474 = vrot.lane.b32.xlu1 %v5432_v22, %s8136_s17  ;;  %1339 = vrot.lane.b32.xlu0 %v5432_v22, %s8171_s16 }
  0x61   :  { %1612 = vrot.lane.b32.xlu1 %v5459_v26, %s8118_s25  ;;  %1476 = vrot.lane.b32.xlu0 %v5438_v24, %s8136_s17 }
  0x65   :  { %1753 = vrot.lane.b32.xlu1 %v5480_v28, %s5297_s12  ;;  %1614 = vrot.lane.b32.xlu0 %v5432_v22, %s8118_s25 }
  0x69   :  { %2112 = vrot.lane.b32.xlu1 %v3437_v18, %s8183_s14  ;;  %1974 = vrot.lane.b32.xlu0 %v5396_v17, %s5298_s13 }
  0x6d   :  { %649 = vrot.lane.b32.xlu0 %v5432_v22, %s8179_s26  ;;  %651 = vrot.lane.b32.xlu1 %v5438_v24, %s8179_s26 }
  0x71   :  { %787 = vrot.lane.b32.xlu0 %v5459_v26, %s8177_s8  ;;  %789 = vrot.lane.b32.xlu1 %v5432_v22, %s8177_s8 }
  0x75   :  { %924 = vrot.lane.b32.xlu0 %v5432_v22, %s8151_s9  ;;  %926 = vrot.lane.b32.xlu1 %v5438_v24, %s8151_s9 }
  0x79   :  { %1062 = vrot.lane.b32.xlu0 %v5459_v26, %s8149_s10  ;;  %1064 = vrot.lane.b32.xlu1 %v5432_v22, %s8149_s10 }
  0x7b   :  { %v3484_v31 = vpop.permute.xlu1 %3483  ;;  %v3346_v32 = vpop.permute.xlu0 %3345 }
  0x7c   :  { %v3501_v35 = vrot.slane %v3484_v31, 4  ;;  %v3363_v36 = vrot.slane %v3346_v32, 4 }
  0x7d   :  { %1203 = vrot.lane.b32.xlu0 %v5480_v28, %s8181_s15  ;;  %1341 = vrot.lane.b32.xlu1 %v5508_v30, %s8171_s16 }
  0x7f   :  { %v5514_v33 = vpop.permute.xlu1 %3485  ;;  %v5516_v34 = vpop.permute.xlu0 %3347 }
  0x80   :  { %v3502_v37 = vrot.slane %v5514_v33, 4  ;;  %v3364_v38 = vrot.slane %v5516_v34, 4 }
  0x81   :  { %1478 = vrot.lane.b32.xlu0 %v5480_v28, %s8136_s17  ;;  %1616 = vrot.lane.b32.xlu1 %v5508_v30, %s8118_s25  ;;  %s8120_s25 = smov 101  }
  0x82   :  { %v3510_v39 = vsel %vm125_vm0, %v3501_v35, %v3502_v37  ;;  %v3372_v40 = vsel %vm125_vm0, %v3363_v36, %v3364_v38 }
  0x83   :  { %v3512_v41 = vsel %vm8161_vm1, %v3484_v31, %v3510_v39  ;;  %v3374_v42 = vsel %vm3373_vm2, %v3346_v32, %v3372_v40  ;;  %v5532_v43 = vpop.permute.xlu1 %3622  ;;  %v3621_v44 = vpop.permute.xlu0 %3620  ;;  %v3293_v31 = vcombine.high %v5382_v15, %v5382_v15 }
  0x84   :  { %3535 = vst [vmem:[#allocation2 + $0x300] sm:$0xcc] %v3512_v41  ;;  %3397 = vst [vmem:[#allocation2 + $0x300] sm:$0x33] %v3374_v42  ;;  %v3639_v45 = vrot.slane %v5532_v43, 4  ;;  %v3638_v46 = vrot.slane %v3621_v44, 4 }
  0x85   :  { %98 = vrot.lane.b32.xlu0 %v5432_v22, %s8146_s11  ;;  %100 = vrot.lane.b32.xlu1 %v5438_v24, %s8146_s11  ;;  %v5635_v41 = vrot.slane %v3293_v31, %v5348_v7 }
  0x86   :  { %v3647_v47 = vsel %vm125_vm0, %v3638_v46, %v3639_v45 }
  0x87   :  { %v3649_v48 = vsel %vm8160_vm3, %v3621_v44, %v3647_v47  ;;  %v2796_v49 = vpop.permute.xlu0 %2795  ;;  %v5543_v50 = vpop.permute.xlu1 %2797 }
  0x88   :  { %3672 = vst [vmem:[#allocation2 + $0x340] sm:$0x33] %v3649_v48  ;;  %v2813_v51 = vrot.slane %v2796_v49, 4  ;;  %v2814_v52 = vrot.slane %v5543_v50, 4 }
  0x89   :  { %237 = vrot.lane.b32.xlu0 %v5459_v26, %s8144_s18  ;;  %239 = vrot.lane.b32.xlu1 %v5432_v22, %s8144_s18 }
  0x8a   :  { %v2822_v53 = vsel %vm125_vm0, %v2813_v51, %v2814_v52 }
  0x8b   :  { %v2824_v54 = vsel %vm2823_vm4, %v2796_v49, %v2822_v53  ;;  %v2934_v55 = vpop.permute.xlu0 %2933  ;;  %v5554_v56 = vpop.permute.xlu1 %2935  ;;  %v3801_v63 = vld [vmem:[#allocation2 + $0x300] sm:$0xff] }
  0x8c   :  { %2847 = vst [vmem:[#allocation2 + $0x280] sm:$0x33] %v2824_v54  ;;  %v2951_v57 = vrot.slane %v2934_v55, 4  ;;  %v2952_v58 = vrot.slane %v5554_v56, 4 }
  0x8d   :  { %374 = vrot.lane.b32.xlu0 %v5432_v22, %s8122_s19  ;;  %376 = vrot.lane.b32.xlu1 %v5438_v24, %s8122_s19 }
  0x8e   :  { %v2960_v59 = vsel %vm125_vm0, %v2951_v57, %v2952_v58 }
  0x8f   :  { %v2962_v60 = vsel %vm2961_vm5, %v2934_v55, %v2960_v59  ;;  %v3071_v61 = vpop.permute.xlu0 %3070  ;;  %v5565_v62 = vpop.permute.xlu1 %3072  ;;  %v3809_v0 = vld [vmem:[#allocation2 + $0x340] sm:$0xff] }
  0x90   :  { %2985 = vst [vmem:[#allocation2 + $0x280] sm:$0xcc] %v2962_v60  ;;  %v3088_v1 = vrot.slane %v3071_v61, 4  ;;  %v3089_v2 = vrot.slane %v5565_v62, 4  ;;  %v5189_v3 = vcombine.high %v3801_v63, %v3809_v0  ;;  %v5188_v5 = vcombine.low %v3801_v63, %v3809_v0  ;;  %v5665_v63 = vld [vmem:[%s8112_s0 + $0x12] sm:$0xff] }
  0x91   :  { %512 = vrot.lane.b32.xlu0 %v5459_v26, %s8120_s25  ;;  %514 = vrot.lane.b32.xlu1 %v5432_v22, %s8120_s25 }
  0x92   :  { %v3097_v6 = vsel %vm125_vm0, %v3088_v1, %v3089_v2  ;;  %4475 = vmatprep.subr.bf16.mxu0 %v5189_v3 }
  0x93   :  { %v3099_v8 = vsel %vm3098_vm6, %v3071_v61, %v3097_v6  ;;  %4476 = vmatpush1.bf16.msra.mxu0 %v5188_v5  ;;  %v3209_v9 = vpop.permute.xlu0 %3208  ;;  %v5576_v10 = vpop.permute.xlu1 %3210 }
  0x94   :  { %3122 = vst [vmem:[#allocation2 + $0x2c0] sm:$0x33] %v3099_v8  ;;  %v3226_v11 = vrot.slane %v3209_v9, 4  ;;  %v3227_v12 = vrot.slane %v5576_v10, 4 }
  0x95   :  { %653 = vrot.lane.b32.xlu0 %v5480_v28, %s8179_s26  ;;  %791 = vrot.lane.b32.xlu1 %v5508_v30, %s8177_s8 }
  0x96   :  { %v3235_v13 = vsel %vm125_vm0, %v3226_v11, %v3227_v12  ;;  %v3445_v11 = vcombine.low %v5665_v63, %v5665_v63 }
  0x97   :  { %v3237_v14 = vsel %vm3236_vm7, %v3209_v9, %v3235_v13  ;;  %v5587_v16 = vpop.permute.xlu0 %3349  ;;  %v5589_v18 = vpop.permute.xlu1 %3487  ;;  %v3785_v36 = vld [vmem:[#allocation2 + $0x280] sm:$0xff]  ;;  %v5680_v9 = vrot.slane %v5665_v63, %v5348_v7 }
  0x98   :  { %3260 = vst [vmem:[#allocation2 + $0x2c0] sm:$0xcc] %v3237_v14  ;;  %v3365_v19 = vrot.slane %v5587_v16, 4  ;;  %v3503_v20 = vrot.slane %v5589_v18, 4 }
  0x99   :  { %928 = vrot.lane.b32.xlu0 %v5480_v28, %s8151_s9  ;;  %1066 = vrot.lane.b32.xlu1 %v5508_v30, %s8149_s10 }
  0x9a   :  { %v3375_v21 = vsel %vm125_vm0, %v3364_v38, %v3365_v19  ;;  %v3513_v22 = vsel %vm125_vm0, %v3502_v37, %v3503_v20 }
  0x9b   :  { %v3376_v23 = vsel %vm3373_vm2, %v5516_v34, %v3375_v21  ;;  %v3514_v24 = vsel %vm8161_vm1, %v5514_v33, %v3513_v22  ;;  %v5611_v25 = vpop.permute.xlu0 %3624  ;;  %v2246_v26 = vpop.permute.xlu1 %2245 }
  0x9c   :  { %3398 = vst [vmem:[#allocation2 + $0x308] sm:$0x33] %v3376_v23  ;;  %3536 = vst [vmem:[#allocation2 + $0x308] sm:$0xcc] %v3514_v24  ;;  %v3640_v29 = vrot.slane %v5611_v25, 4  ;;  %v2263_v38 = vrot.slane %v2246_v26, 4 }
  0x9d   :  { %102 = vrot.lane.b32.xlu0 %v5480_v28, %s8146_s11  ;;  %241 = vrot.lane.b32.xlu1 %v5508_v30, %s8144_s18 }
  0x9e   :  { %v3650_v32 = vsel %vm125_vm0, %v3639_v45, %v3640_v29 }
  0x9f   :  { %v3651_v33 = vsel %vm8160_vm3, %v5532_v43, %v3650_v32  ;;  %v2384_v34 = vpop.permute.xlu1 %2383  ;;  %v5627_v35 = vpop.permute.xlu0 %2247  ;;  %v3793_v37 = vld [vmem:[#allocation2 + $0x2c0] sm:$0xff] }
  0xa0   :  { %3673 = vst [vmem:[#allocation2 + $0x348] sm:$0x33] %v3651_v33  ;;  %v2264_v39 = vrot.slane %v5627_v35, 4  ;;  %v5173_v15 = vcombine.high %v3785_v36, %v3793_v37  ;;  %v5172_v40 = vcombine.low %v3785_v36, %v3793_v37  ;;  %v2401_v46 = vrot.slane %v2384_v34, 4 }
  0xa1   :  { %378 = vrot.lane.b32.xlu0 %v5480_v28, %s8122_s19  ;;  %516 = vrot.lane.b32.xlu1 %v5508_v30, %s8120_s25  ;;  %s8204_s25 = smov 9   ;;  %s8205_s19 = smov 109  }
  0xa2   :  { %v2272_v42 = vsel %vm125_vm0, %v2263_v38, %v2264_v39  ;;  %4477 = vmatprep.subr.bf16.mxu0 %v5173_v15 }
  0xa3   :  { %v2274_v43 = vsel %vm8130_vm8, %v2246_v26, %v2272_v42  ;;  %4478 = vmatpush1.bf16.msra.mxu0 %v5172_v40  ;;  %v2521_v44 = vpop.permute.xlu1 %2520  ;;  %v5641_v45 = vpop.permute.xlu0 %2385  ;;  %v3802_v53 = vld [vmem:[#allocation2 + $0x308] sm:$0xff] }
  0xa4   :  { %2297 = vst [vmem:[#allocation2 + $0x200] sm:$0x33] %v2274_v43  ;;  %v2402_v47 = vrot.slane %v5641_v45, 4  ;;  %v2538_v55 = vrot.slane %v2521_v44, 4 }
  0xa5   :  { %3351 = vrot.lane.b32.xlu0 %v5635_v41, %s5286_s21  ;;  %3489 = vrot.lane.b32.xlu1 %v5396_v17, %s5285_s20 }
  0xa6   :  { %v2410_v30 = vsel %vm125_vm0, %v2401_v46, %v2402_v47 }
  0xa7   :  { %v2412_v48 = vsel %vm8126_vm9, %v2384_v34, %v2410_v30  ;;  %v2659_v49 = vpop.permute.xlu1 %2658  ;;  %v5652_v51 = vpop.permute.xlu0 %2522  ;;  %v3810_v54 = vld [vmem:[#allocation2 + $0x348] sm:$0xff] }
  0xa8   :  { %2435 = vst [vmem:[#allocation2 + $0x200] sm:$0xcc] %v2412_v48  ;;  %v2539_v57 = vrot.slane %v5652_v51, 4  ;;  %v5191_v59 = vcombine.high %v3802_v53, %v3810_v54  ;;  %v5190_v60 = vcombine.low %v3802_v53, %v3810_v54  ;;  %v2676_v5 = vrot.slane %v2659_v49, 4  ;;  %v1810_v54 = vld [vmem:[%s8112_s0 + $0xa] sm:$0xff] }
  0xa9   :  { %3626 = vrot.lane.b32.xlu0 %v5635_v41, %s5288_s22  ;;  %2801 = vrot.lane.b32.xlu1 %v5635_v41, %s5289_s23  ;;  %5080 = vst.sshfl [vmem:[#allocation2 + $0x198] sm:$0xf0 pattern:$0x76325410] %v1810_v54 }
  0xaa   :  { %v2547_v61 = vsel %vm125_vm0, %v2538_v55, %v2539_v57  ;;  %4516 = vmatprep.subr.bf16.mxu1 %v5191_v59  ;;  %v1832_v59 = vcombine.low %v1810_v54, %v1810_v54 }
  0xab   :  { %v2549_v0 = vsel %vm8125_vm10, %v2521_v44, %v2547_v61  ;;  %4517 = vmatpush1.bf16.msra.mxu1 %v5190_v60  ;;  %v5668_v1 = vpop.permute.xlu1 %2799  ;;  %v5670_v3 = vpop.permute.xlu0 %2660 }
  0xac   :  { %2572 = vst [vmem:[#allocation2 + $0x240] sm:$0x33] %v2549_v0  ;;  %v2815_v6 = vrot.slane %v5668_v1, 4  ;;  %v2677_v8 = vrot.slane %v5670_v3, 4 }
  0xad   :  { %2939 = vrot.lane.b32.xlu0 %v5396_v17, %s5290_s24  ;;  %3076 = vrot.lane.b32.xlu1 %v5635_v41, %s5291_s27  ;;  %5079 = vst.sshfl [vmem:[#allocation2 + $0x190] sm:$0xf0 pattern:$0x76325410] %v1832_v59 }
  0xae   :  { %v2825_v13 = vsel %vm125_vm0, %v2814_v52, %v2815_v6  ;;  %v2685_v14 = vsel %vm125_vm0, %v2676_v5, %v2677_v8 }
  0xaf   :  { %v2826_v21 = vsel %vm2823_vm4, %v5543_v50, %v2825_v13  ;;  %v2687_v22 = vsel %vm8124_vm11, %v2659_v49, %v2685_v14  ;;  %v5695_v23 = vpop.permute.xlu1 %3074  ;;  %v5697_v24 = vpop.permute.xlu0 %2937  ;;  %v5706_v50 = vrot.slane %v3445_v11, %v5348_v7  ;;  %v3769_v15 = vld [vmem:[#allocation2 + $0x200] sm:$0xff] }
  0xb0   :  { %2848 = vst [vmem:[#allocation2 + $0x288] sm:$0x33] %v2826_v21  ;;  %2710 = vst [vmem:[#allocation2 + $0x240] sm:$0xcc] %v2687_v22  ;;  %v3090_v26 = vrot.slane %v5695_v23, 4  ;;  %v2953_v31 = vrot.slane %v5697_v24, 4 }
  0xb1   :  { %3214 = vrot.lane.b32.xlu0 %v5396_v17, %s5292_s28  ;;  %3353 = vrot.lane.b32.xlu1 %v5680_v9, %s5286_s21 }
  0xb2   :  { %v3100_v52 = vsel %vm125_vm0, %v3089_v2, %v3090_v26  ;;  %v2963_v32 = vsel %vm125_vm0, %v2952_v58, %v2953_v31 }
  0xb3   :  { %v3101_v33 = vsel %vm3098_vm6, %v5565_v62, %v3100_v52  ;;  %v2964_v34 = vsel %vm2961_vm5, %v5554_v56, %v2963_v32  ;;  %v5722_v36 = vpop.permute.xlu0 %3212  ;;  %v1750_v37 = vpop.permute.xlu1 %1749  ;;  %v1147_v32 = vcombine.high %v5472_v27, %v5472_v27 }
  0xb4   :  { %3123 = vst [vmem:[#allocation2 + $0x2c8] sm:$0x33] %v3101_v33  ;;  %2986 = vst [vmem:[#allocation2 + $0x288] sm:$0xcc] %v2964_v34  ;;  %v3228_v38 = vrot.slane %v5722_v36, 4  ;;  %v1767_v42 = vrot.slane %v1750_v37, 4 }
  0xb5   :  { %3491 = vrot.lane.b32.xlu0 %v5706_v50, %s5285_s20  ;;  %3628 = vrot.lane.b32.xlu1 %v5680_v9, %s5288_s22 }
  0xb6   :  { %v3238_v58 = vsel %vm125_vm0, %v3227_v12, %v3228_v38 }
  0xb7   :  { %v3239_v56 = vsel %vm3236_vm7, %v5576_v10, %v3238_v58  ;;  %v1971_v62 = vpop.permute.xlu1 %1970  ;;  %v5736_v2 = vpop.permute.xlu0 %1751  ;;  %v3777_v40 = vld [vmem:[#allocation2 + $0x240] sm:$0xff] }
  0xb8   :  { %3261 = vst [vmem:[#allocation2 + $0x2c8] sm:$0xcc] %v3239_v56  ;;  %v1768_v43 = vrot.slane %v5736_v2, 4  ;;  %v5157_v44 = vcombine.high %v3769_v15, %v3777_v40  ;;  %v5156_v46 = vcombine.low %v3769_v15, %v3777_v40  ;;  %v1988_v49 = vrot.slane %v1971_v62, 4 }
  0xb9   :  { %2251 = vrot.lane.b32.xlu0 %v5635_v41, %s5293_s29  ;;  %2389 = vrot.lane.b32.xlu1 %v5396_v17, %s5294_s30 }
  0xba   :  { %v1776_v10 = vsel %vm125_vm0, %v1767_v42, %v1768_v43  ;;  %4479 = vmatprep.subr.bf16.mxu0 %v5157_v44 }
  0xbb   :  { %v1778_v12 = vsel %vm8127_vm12, %v1750_v37, %v1776_v10  ;;  %4480 = vmatpush1.bf16.msra.mxu0 %v5156_v46  ;;  %v2109_v30 = vpop.permute.xlu1 %2108  ;;  %v5747_v48 = vpop.permute.xlu0 %1972  ;;  %v3786_v11 = vld [vmem:[#allocation2 + $0x288] sm:$0xff] }
  0xbc   :  { %1801 = vst [vmem:[#allocation2 + $0x180] sm:$0x33] %v1778_v12  ;;  %v1989_v53 = vrot.slane %v5747_v48, 4  ;;  %v2126_v60 = vrot.slane %v2109_v30, 4 }
  0xbd   :  { %2526 = vrot.lane.b32.xlu0 %v5635_v41, %s5295_s6  ;;  %2664 = vrot.lane.b32.xlu1 %v5396_v17, %s5296_s7 }
  0xbe   :  { %v1997_v55 = vsel %vm125_vm0, %v1988_v49, %v1989_v53 }
  0xbf   :  { %v1999_v61 = vsel %vm8129_vm13, %v1971_v62, %v1997_v55  ;;  %v5761_v0 = vpop.permute.xlu1 %2249  ;;  %v5763_v5 = vpop.permute.xlu0 %2110  ;;  %v3794_v13 = vld [vmem:[#allocation2 + $0x2c8] sm:$0xff] }
  0xc0   :  { %2022 = vst [vmem:[#allocation2 + $0x1c0] sm:$0x33] %v1999_v61  ;;  %v2265_v14 = vrot.slane %v5761_v0, 4  ;;  %v2127_v21 = vrot.slane %v5763_v5, 4  ;;  %v5175_v22 = vcombine.high %v3786_v11, %v3794_v13  ;;  %v5174_v52 = vcombine.low %v3786_v11, %v3794_v13 }
  0xc1   :  { %2803 = vrot.lane.b32.xlu0 %v5680_v9, %s5289_s23  ;;  %2941 = vrot.lane.b32.xlu1 %v5706_v50, %s5290_s24 }
  0xc2   :  { %v2275_v33 = vsel %vm125_vm0, %v2264_v39, %v2265_v14  ;;  %v2135_v34 = vsel %vm125_vm0, %v2126_v60, %v2127_v21  ;;  %4518 = vmatprep.subr.bf16.mxu1 %v5175_v22 }
  0xc3   :  { %v2276_v27 = vsel %vm8130_vm8, %v5627_v35, %v2275_v33  ;;  %v2137_v37 = vsel %vm8128_vm14, %v2109_v30, %v2135_v34  ;;  %4519 = vmatpush1.bf16.msra.mxu1 %v5174_v52  ;;  %v5784_v58 = vpop.permute.xlu1 %2524  ;;  %v5786_v56 = vpop.permute.xlu0 %2387  ;;  %v5795_v35 = vrot.slane %v1147_v32, %v5348_v7  ;;  %v3753_v30 = vld [vmem:[#allocation2 + $0x180] sm:$0xff]  ;;  %vm1090_vm8 = vcmask 736256  }
  0xc4   :  { %2298 = vst [vmem:[#allocation2 + $0x208] sm:$0x33] %v2276_v27  ;;  %2160 = vst [vmem:[#allocation2 + $0x1c0] sm:$0xcc] %v2137_v37  ;;  %v2540_v62 = vrot.slane %v5784_v58, 4  ;;  %v2403_v39 = vrot.slane %v5786_v56, 4 }
  0xc5   :  { %3078 = vrot.lane.b32.xlu0 %v5680_v9, %s5291_s27  ;;  %3216 = vrot.lane.b32.xlu1 %v5706_v50, %s5292_s28 }
  0xc6   :  { %v2550_v15 = vsel %vm125_vm0, %v2539_v57, %v2540_v62  ;;  %v2413_v40 = vsel %vm125_vm0, %v2402_v47, %v2403_v39 }
  0xc7   :  { %v2551_v42 = vsel %vm8125_vm10, %v5652_v51, %v2550_v15  ;;  %v2414_v44 = vsel %vm8126_vm9, %v5641_v45, %v2413_v40  ;;  %v5811_v46 = vpop.permute.xlu0 %2662  ;;  %v1200_v10 = vpop.permute.xlu1 %1199  ;;  %vm8139_vm10 = vcmask 80896   ;;  %vm8138_vm9 = vcmask 72704  }
  0xc8   :  { %2573 = vst [vmem:[#allocation2 + $0x248] sm:$0x33] %v2551_v42  ;;  %2436 = vst [vmem:[#allocation2 + $0x208] sm:$0xcc] %v2414_v44  ;;  %v2678_v12 = vrot.slane %v5811_v46, 4  ;;  %v1217_v54 = vrot.slane %v1200_v10, 4 }
  0xc9   :  { %1755 = vrot.lane.b32.xlu0 %v5795_v35, %s5297_s12  ;;  %1976 = vrot.lane.b32.xlu1 %v5635_v41, %s5298_s13  ;;  %v5860_v44 = vld [vmem:[%s8112_s0 + $0x10] sm:$0xff] }
  0xca   :  { %v2688_v47 = vsel %vm125_vm0, %v2677_v8, %v2678_v12 }
  0xcb   :  { %v2689_v45 = vsel %vm8124_vm11, %v5670_v3, %v2688_v47  ;;  %v1338_v51 = vpop.permute.xlu1 %1337  ;;  %v5825_v57 = vpop.permute.xlu0 %1201  ;;  %v3761_v49 = vld [vmem:[#allocation2 + $0x1c0] sm:$0xff]  ;;  %vm8131_vm11 = vcmask 89088  }
  0xcc   :  { %2711 = vst [vmem:[#allocation2 + $0x248] sm:$0xcc] %v2689_v45  ;;  %v1218_v55 = vrot.slane %v5825_v57, 4  ;;  %v5141_v41 = vcombine.high %v3753_v30, %v3761_v49  ;;  %v5140_v59 = vcombine.low %v3753_v30, %v3761_v49  ;;  %v1355_v11 = vrot.slane %v1338_v51, 4 }
  0xcd   :  { %2114 = vrot.lane.b32.xlu0 %v5396_v17, %s8183_s14  ;;  %2253 = vrot.lane.b32.xlu1 %v5680_v9, %s5293_s29 }
  0xce   :  { %v1226_v3 = vsel %vm125_vm0, %v1217_v54, %v1218_v55  ;;  %4481 = vmatprep.subr.bf16.mxu0 %v5141_v41  ;;  %v5875_v54 = vrot.slane %v5860_v44, %v5348_v7 }
  0xcf   :  { %v1228_v8 = vsel %vm8140_vm15, %v1200_v10, %v1226_v3  ;;  %4482 = vmatpush1.bf16.msra.mxu0 %v5140_v59  ;;  %v1475_v60 = vpop.permute.xlu1 %1474  ;;  %v5836_v61 = vpop.permute.xlu0 %1339  ;;  %v3770_v33 = vld [vmem:[#allocation2 + $0x208] sm:$0xff] }
  0xd0   :  { %1251 = vst [vmem:[#allocation2 + $0x100] sm:$0x33] %v1228_v8  ;;  %v1356_v13 = vrot.slane %v5836_v61, 4  ;;  %v1492_v27 = vrot.slane %v1475_v60, 4 }
  0xd1   :  { %2391 = vrot.lane.b32.xlu0 %v5706_v50, %s5294_s30  ;;  %2528 = vrot.lane.b32.xlu1 %v5680_v9, %s5295_s6 }
  0xd2   :  { %v1364_v17 = vsel %vm125_vm0, %v1355_v11, %v1356_v13 }
  0xd3   :  { %v1366_v22 = vsel %vm8131_vm11, %v1338_v51, %v1364_v17  ;;  %v1613_v52 = vpop.permute.xlu1 %1612  ;;  %v5847_v32 = vpop.permute.xlu0 %1476  ;;  %v3778_v34 = vld [vmem:[#allocation2 + $0x248] sm:$0xff] }
  0xd4   :  { %1389 = vst [vmem:[#allocation2 + $0x100] sm:$0xcc] %v1366_v22  ;;  %v1493_v37 = vrot.slane %v5847_v32, 4  ;;  %v5159_v15 = vcombine.high %v3770_v33, %v3778_v34  ;;  %v5158_v40 = vcombine.low %v3770_v33, %v3778_v34  ;;  %v1630_v51 = vrot.slane %v1613_v52, 4 }
  0xd5   :  { %2666 = vrot.lane.b32.xlu0 %v5706_v50, %s5296_s7  ;;  %1205 = vrot.lane.b32.xlu1 %v5795_v35, %s8181_s15 }
  0xd6   :  { %v1501_v42 = vsel %vm125_vm0, %v1492_v27, %v1493_v37  ;;  %4520 = vmatprep.subr.bf16.mxu1 %v5159_v15 }
  0xd7   :  { %v1503_v10 = vsel %vm8139_vm10, %v1475_v60, %v1501_v42  ;;  %4521 = vmatpush1.bf16.msra.mxu1 %v5158_v40  ;;  %v5863_v47 = vpop.permute.xlu1 %1753  ;;  %v5865_v45 = vpop.permute.xlu0 %1614 }
  0xd8   :  { %1526 = vst [vmem:[#allocation2 + $0x140] sm:$0x33] %v1503_v10  ;;  %v8159_v30 = vrot.slane %v5863_v47, 4  ;;  %v1631_v49 = vrot.slane %v5865_v45, 4 }
  0xd9   :  { %1343 = vrot.lane.b32.xlu0 %v5480_v28, %s8171_s16  ;;  %1480 = vrot.lane.b32.xlu1 %v5795_v35, %s8136_s17 }
  0xda   :  { %v1779_v41 = vsel %vm125_vm0, %v1768_v43, %v8159_v30  ;;  %v1639_v59 = vsel %vm125_vm0, %v1630_v51, %v1631_v49 }
  0xdb   :  { %v1780_v3 = vsel %vm8127_vm12, %v5736_v2, %v1779_v41  ;;  %v1641_v8 = vsel %vm8138_vm9, %v1613_v52, %v1639_v59  ;;  %v5888_v60 = vpop.permute.xlu1 %2112  ;;  %v5890_v11 = vpop.permute.xlu0 %1974  ;;  %vm677_vm12 = vcmask 818176   ;;  %v3737_v42 = vld [vmem:[#allocation2 + $0x100] sm:$0xff] }
  0xdc   :  { %1802 = vst [vmem:[#allocation2 + $0x188] sm:$0x33] %v1780_v3  ;;  %1664 = vst [vmem:[#allocation2 + $0x140] sm:$0xcc] %v1641_v8  ;;  %v8135_v17 = vrot.slane %v5888_v60, 4  ;;  %v8156_v22 = vrot.slane %v5890_v11, 4 }
  0xdd   :  { %1618 = vrot.lane.b32.xlu0 %v5480_v28, %s8204_s25  ;;  %1757 = vrot.lane.b32.xlu1 %v5875_v54, %s5297_s12 }
  0xde   :  { %v2138_v2 = vsel %vm125_vm0, %v2127_v21, %v8135_v17  ;;  %v2000_v43 = vsel %vm125_vm0, %v1989_v53, %v8156_v22 }
  0xdf   :  { %v2139_v52 = vsel %vm8128_vm14, %v5763_v5, %v2138_v2  ;;  %v2001_v33 = vsel %vm8129_vm13, %v5747_v48, %v2000_v43  ;;  %v650_v34 = vpop.permute.xlu0 %649  ;;  %v5912_v27 = vpop.permute.xlu1 %651  ;;  %vm815_vm14 = vcmask 809984   ;;  %vm952_vm13 = vcmask 744448  }
  0xe0   :  { %2161 = vst [vmem:[#allocation2 + $0x1c8] sm:$0xcc] %v2139_v52  ;;  %2023 = vst [vmem:[#allocation2 + $0x1c8] sm:$0x33] %v2001_v33  ;;  %v667_v15 = vrot.slane %v650_v34, 4  ;;  %v668_v21 = vrot.slane %v5912_v27, 4 }
  0xe1   :  { %1978 = vrot.lane.b32.xlu0 %v5680_v9, %s5298_s13  ;;  %2116 = vrot.lane.b32.xlu1 %v5706_v50, %s8183_s14  ;;  %v1299_v50 = vcombine.low %v5860_v44, %v5860_v44 }
  0xe2   :  { %v676_v53 = vsel %vm125_vm0, %v667_v15, %v668_v21 }
  0xe3   :  { %v678_v48 = vsel %vm677_vm12, %v650_v34, %v676_v53  ;;  %v788_v5 = vpop.permute.xlu0 %787  ;;  %v5923_v40 = vpop.permute.xlu1 %789  ;;  %v3745_v10 = vld [vmem:[#allocation2 + $0x140] sm:$0xff]  ;;  %v3754_v33 = vld [vmem:[#allocation2 + $0x188] sm:$0xff] }
  0xe4   :  { %701 = vst [vmem:[#allocation2 + $0x80] sm:$0x33] %v678_v48  ;;  %v805_v51 = vrot.slane %v788_v5, 4  ;;  %v806_v41 = vrot.slane %v5923_v40, 4  ;;  %v5125_v59 = vcombine.high %v3737_v42, %v3745_v10  ;;  %v5124_v3 = vcombine.low %v3737_v42, %v3745_v10 }
  0xe5   :  { %655 = vrot.lane.b32.xlu0 %v5795_v35, %s8179_s26  ;;  %793 = vrot.lane.b32.xlu1 %v5480_v28, %s8177_s8 }
  0xe6   :  { %v814_v8 = vsel %vm125_vm0, %v805_v51, %v806_v41  ;;  %4483 = vmatprep.subr.bf16.mxu0 %v5125_v59 }
  0xe7   :  { %v816_v2 = vsel %vm815_vm14, %v788_v5, %v814_v8  ;;  %4484 = vmatpush1.bf16.msra.mxu0 %v5124_v3  ;;  %v925_v43 = vpop.permute.xlu0 %924  ;;  %v5936_v52 = vpop.permute.xlu1 %926  ;;  %v3762_v34 = vld [vmem:[#allocation2 + $0x1c8] sm:$0xff]  ;;  %v5944_v5 = vrot.slane %v1299_v50, %v5348_v7 }
  0xe8   :  { %839 = vst [vmem:[#allocation2 + $0x80] sm:$0xcc] %v816_v2  ;;  %v942_v15 = vrot.slane %v925_v43, 4  ;;  %v943_v53 = vrot.slane %v5936_v52, 4  ;;  %v5143_v48 = vcombine.high %v3754_v33, %v3762_v34  ;;  %v5142_v42 = vcombine.low %v3754_v33, %v3762_v34 }
  0xe9   :  { %930 = vrot.lane.b32.xlu0 %v5795_v35, %s8151_s9  ;;  %1068 = vrot.lane.b32.xlu1 %v5480_v28, %s8149_s10 }
  0xea   :  { %v951_v10 = vsel %vm125_vm0, %v942_v15, %v943_v53  ;;  %4522 = vmatprep.subr.bf16.mxu1 %v5143_v48 }
  0xeb   :  { %v953_v51 = vsel %vm952_vm13, %v925_v43, %v951_v10  ;;  %4523 = vmatpush1.bf16.msra.mxu1 %v5142_v42  ;;  %v1063_v59 = vpop.permute.xlu0 %1062  ;;  %v5950_v3 = vpop.permute.xlu1 %1064 }
  0xec   :  { %976 = vst [vmem:[#allocation2 + $0xc0] sm:$0x33] %v953_v51  ;;  %v1080_v8 = vrot.slane %v1063_v59, 4  ;;  %v1081_v2 = vrot.slane %v5950_v3, 4 }
  0xed   :  { %1207 = vrot.lane.b32.xlu0 %v5875_v54, %s8181_s15  ;;  %1345 = vrot.lane.b32.xlu1 %v5944_v5, %s8171_s16 }
  0xee   :  { %v1089_v50 = vsel %vm125_vm0, %v1080_v8, %v1081_v2 }
  0xef   :  { %v1091_v43 = vsel %vm1090_vm8, %v1063_v59, %v1089_v50  ;;  %v5961_v33 = vpop.permute.xlu0 %1203  ;;  %v5963_v34 = vpop.permute.xlu1 %1341 }
  0xf0   :  { %1114 = vst [vmem:[#allocation2 + $0xc0] sm:$0xcc] %v1091_v43  ;;  %v8134_v15 = vrot.slane %v5961_v33, 4  ;;  %v8132_v48 = vrot.slane %v5963_v34, 4 }
  0xf1   :  { %1482 = vrot.lane.b32.xlu0 %v5875_v54, %s8136_s17  ;;  %1620 = vrot.lane.b32.xlu1 %v5944_v5, %s8204_s25  ;;  %s8206_s17 = smov 101  }
  0xf2   :  { %v1229_v42 = vsel %vm125_vm0, %v1218_v55, %v8134_v15  ;;  %v1367_v10 = vsel %vm125_vm0, %v1356_v13, %v8132_v48 }
  0xf3   :  { %v1230_v51 = vsel %vm8140_vm15, %v5825_v57, %v1229_v42  ;;  %v1368_v59 = vsel %vm8131_vm11, %v5836_v61, %v1367_v10  ;;  %v5985_v8 = vpop.permute.xlu0 %1478  ;;  %v5987_v50 = vpop.permute.xlu1 %1616  ;;  %vm127_vm11 = vcmask 908288   ;;  %vm540_vm15 = vcmask 826368  }
  0xf4   :  { %1252 = vst [vmem:[#allocation2 + $0x108] sm:$0x33] %v1230_v51  ;;  %1390 = vst [vmem:[#allocation2 + $0x108] sm:$0xcc] %v1368_v59  ;;  %v8133_v55 = vrot.slane %v5985_v8, 4  ;;  %v8143_v43 = vrot.slane %v5987_v50, 4 }
  0xf5   :  { %104 = vrot.lane.b32.xlu0 %v5795_v35, %s8146_s11  ;;  %243 = vrot.lane.b32.xlu1 %v5480_v28, %s8144_s18  ;;  %v3721_v59 = vld [vmem:[#allocation2 + $0x80] sm:$0xff] }
  0xf6   :  { %v1504_v57 = vsel %vm125_vm0, %v1493_v37, %v8133_v55  ;;  %v1642_v61 = vsel %vm125_vm0, %v1631_v49, %v8143_v43  ;;  %v6110_v43 = vld [vmem:[#allocation2 + $0x380] sm:$0xff] }
  0xf7   :  { %v1505_v13 = vsel %vm8139_vm10, %v5847_v32, %v1504_v57  ;;  %v1643_v42 = vsel %vm8138_vm9, %v5865_v45, %v1642_v61  ;;  %v99_v10 = vpop.permute.xlu0 %98  ;;  %v6009_v51 = vpop.permute.xlu1 %100  ;;  %v3729_v48 = vld [vmem:[#allocation2 + $0xc0] sm:$0xff]  ;;  %vm265_vm9 = vcmask 900096   ;;  %vm402_vm10 = vcmask 891904  }
  0xf8   :  { %1527 = vst [vmem:[#allocation2 + $0x148] sm:$0x33] %v1505_v13  ;;  %1665 = vst [vmem:[#allocation2 + $0x148] sm:$0xcc] %v1643_v42  ;;  %v116_v37 = vrot.slane %v99_v10, 4  ;;  %v117_v55 = vrot.slane %v6009_v51, 4  ;;  %v5109_v15 = vcombine.high %v3721_v59, %v3729_v48  ;;  %v5108_v17 = vcombine.low %v3721_v59, %v3729_v48 }
  0xf9   :  { %380 = vrot.lane.b32.xlu0 %v5795_v35, %s8205_s19  ;;  %518 = vrot.lane.b32.xlu1 %v5480_v28, %s8206_s17 }
  0xfa   :  { %v126_v32 = vsel %vm125_vm0, %v116_v37, %v117_v55  ;;  %4485 = vmatprep.subr.bf16.mxu0 %v5109_v15 }
  0xfb   :  { %v128_v45 = vsel %vm127_vm11, %v99_v10, %v126_v32  ;;  %4486 = vmatpush1.bf16.msra.mxu0 %v5108_v17  ;;  %v238_v49 = vpop.permute.xlu0 %237  ;;  %v6020_v57 = vpop.permute.xlu1 %239  ;;  %v3738_v13 = vld [vmem:[#allocation2 + $0x108] sm:$0xff] }
  0xfc   :  { %151 = vst [vmem:[#allocation2] sm:$0x33] %v128_v45  ;;  %v255_v61 = vrot.slane %v238_v49, 4  ;;  %v256_v48 = vrot.slane %v6020_v57, 4 }
  0xfd   :  { %657 = vrot.lane.b32.xlu0 %v5875_v54, %s8179_s26  ;;  %795 = vrot.lane.b32.xlu1 %v5944_v5, %s8177_s8 }
  0xfe   :  { %v264_v28 = vsel %vm125_vm0, %v255_v61, %v256_v48 }
  0xff   :  { %v266_v35 = vsel %vm265_vm9, %v238_v49, %v264_v28  ;;  %v375_v17 = vpop.permute.xlu0 %374  ;;  %v6031_v15 = vpop.permute.xlu1 %376  ;;  %v3746_v42 = vld [vmem:[#allocation2 + $0x148] sm:$0xff] }
 0x100   :  { %289 = vst [vmem:[#allocation2] sm:$0xcc] %v266_v35  ;;  %v392_v10 = vrot.slane %v375_v17, 4  ;;  %v393_v59 = vrot.slane %v6031_v15, 4  ;;  %v5127_v37 = vcombine.high %v3738_v13, %v3746_v42  ;;  %v5126_v32 = vcombine.low %v3738_v13, %v3746_v42 }
 0x101   :  { %932 = vrot.lane.b32.xlu0 %v5875_v54, %s8151_s9  ;;  %1070 = vrot.lane.b32.xlu1 %v5944_v5, %s8149_s10  ;;  %v3308_v42 = vcombine.high %v5665_v63, %v5665_v63  ;;  %s8215_s9 = smov 10   ;;  %s8228_s10 = smov 91  }
 0x102   :  { %v401_v45 = vsel %vm125_vm0, %v392_v10, %v393_v59  ;;  %4524 = vmatprep.subr.bf16.mxu1 %v5127_v37 }
 0x103   :  { %v403_v49 = vsel %vm402_vm10, %v375_v17, %v401_v45  ;;  %4525 = vmatpush1.bf16.msra.mxu1 %v5126_v32  ;;  %v513_v61 = vpop.permute.xlu0 %512  ;;  %v6042_v28 = vpop.permute.xlu1 %514 }
 0x104   :  { %426 = vst [vmem:[#allocation2 + $0x40] sm:$0x33] %v403_v49  ;;  %v530_v35 = vrot.slane %v513_v61, 4  ;;  %v531_v13 = vrot.slane %v6042_v28, 4  ;;  %v6066_v49 = vrot.slane %v3308_v42, %v5348_v7 }
 0x105   :  { %106 = vrot.lane.b32.xlu0 %v5875_v54, %s8146_s11  ;;  %245 = vrot.lane.b32.xlu1 %v5944_v5, %s8144_s18  ;;  %s8229_s11 = smov 90   ;;  %s8237_s18 = smov 111  }
 0x106   :  { %v539_v17 = vsel %vm125_vm0, %v530_v35, %v531_v13 }
 0x107   :  { %v541_v10 = vsel %vm540_vm15, %v513_v61, %v539_v17  ;;  %v6055_v37 = vpop.permute.xlu0 %653  ;;  %v6057_v32 = vpop.permute.xlu1 %791 }
 0x108   :  { %564 = vst [vmem:[#allocation2 + $0x40] sm:$0xcc] %v541_v10  ;;  %v8141_v45 = vrot.slane %v6055_v37, 4  ;;  %v8142_v63 = vrot.slane %v6057_v32, 4 }
 0x109   :  { %382 = vrot.lane.b32.xlu0 %v5875_v54, %s8205_s19  ;;  %520 = vrot.lane.b32.xlu1 %v5944_v5, %s8206_s17 }
 0x10a   :  { %v679_v61 = vsel %vm125_vm0, %v668_v21, %v8141_v45  ;;  %v817_v35 = vsel %vm125_vm0, %v806_v41, %v8142_v63 }
 0x10b   :  { %v680_v17 = vsel %vm677_vm12, %v5912_v27, %v679_v61  ;;  %v818_v5 = vsel %vm815_vm14, %v5923_v40, %v817_v35  ;;  %v6082_v42 = vpop.permute.xlu0 %928  ;;  %v6084_v10 = vpop.permute.xlu1 %1066 }
 0x10c   :  { %702 = vst [vmem:[#allocation2 + $0x88] sm:$0x33] %v680_v17  ;;  %840 = vst [vmem:[#allocation2 + $0x88] sm:$0xcc] %v818_v5  ;;  %v8155_v21 = vrot.slane %v6082_v42, 4  ;;  %v8148_v45 = vrot.slane %v6084_v10, 4 }
 0x10d   :  { %3355 = vrot.lane.b32.xlu0 %v6066_v49, %s5286_s21  ;;  %3493 = vrot.lane.b32.xlu1 %v5680_v9, %s5285_s20  ;;  %v3705_v5 = vld [vmem:[#allocation2] sm:$0xff] }
 0x10e   :  { %v954_v27 = vsel %vm125_vm0, %v943_v53, %v8155_v21  ;;  %v1092_v40 = vsel %vm125_vm0, %v1081_v2, %v8148_v45  ;;  %v6114_v53 = vcombine.high %v6110_v43, %v6110_v43 }
 0x10f   :  { %v955_v41 = vsel %vm952_vm13, %v5936_v52, %v954_v27  ;;  %v1093_v61 = vsel %vm1090_vm8, %v5950_v3, %v1092_v40  ;;  %v6106_v35 = vpop.permute.xlu0 %102  ;;  %v6108_v17 = vpop.permute.xlu1 %241  ;;  %v3713_v63 = vld [vmem:[#allocation2 + $0x40] sm:$0xff] }
 0x110   :  { %977 = vst [vmem:[#allocation2 + $0xc8] sm:$0x33] %v955_v41  ;;  %1115 = vst [vmem:[#allocation2 + $0xc8] sm:$0xcc] %v1093_v61  ;;  %v8154_v2 = vrot.slane %v6106_v35, 4  ;;  %v8153_v52 = vrot.slane %v6108_v17, 4  ;;  %v5093_v27 = vcombine.high %v3705_v5, %v3713_v63  ;;  %v5092_v3 = vcombine.low %v3705_v5, %v3713_v63 }
 0x111   :  { %3630 = vrot.lane.b32.xlu0 %v6066_v49, %s5288_s22  ;;  %2805 = vrot.lane.b32.xlu1 %v6066_v49, %s5289_s23  ;;  %v6135_v63 = vld [vmem:[%s8112_s0 + $0x1a] sm:$0xff] }
 0x112   :  { %v129_v40 = vsel %vm125_vm0, %v117_v55, %v8154_v2  ;;  %v267_v41 = vsel %vm125_vm0, %v256_v48, %v8153_v52  ;;  %4487 = vmatprep.subr.bf16.mxu0 %v5093_v27  ;;  %v6147_v48 = vcombine.low %v6110_v43, %v6110_v43  ;;  %v6152_v27 = vld [vmem:[%s8113_s1] sm:$0xf] }
 0x113   :  { %v130_v61 = vsel %vm127_vm11, %v6009_v51, %v129_v40  ;;  %v268_v5 = vsel %vm265_vm9, %v6020_v57, %v267_v41  ;;  %v6141_v45 = vpop.permute.xlu0 %378  ;;  %4488 = vmatpush1.bf16.msra.mxu0 %v5092_v3  ;;  %v6143_v55 = vpop.permute.xlu1 %516  ;;  %v6163_v3 = vrot.slane %v6135_v63, %v5348_v7  ;;  %v3460_v40 = vcombine.low %v6135_v63, %v6135_v63  ;;  %v3722_v22 = vld [vmem:[#allocation2 + $0x88] sm:$0xff] }
 0x114   :  { %152 = vst [vmem:[#allocation2 + $0x8] sm:$0x33] %v130_v61  ;;  %290 = vst [vmem:[#allocation2 + $0x8] sm:$0xcc] %v268_v5  ;;  %v8158_v51 = vrot.slane %v6141_v45, 4  ;;  %v8157_v57 = vrot.slane %v6143_v55, 4  ;;  %4555 = vmatprep.subr.bf16.mxu0 %v6114_v53 }
 0x115   :  { %2943 = vrot.lane.b32.xlu0 %v5680_v9, %s5290_s24  ;;  %3080 = vrot.lane.b32.xlu1 %v6066_v49, %s5291_s27 }
 0x116   :  { %v404_v41 = vsel %vm125_vm0, %v393_v59, %v8158_v51  ;;  %v542_v61 = vsel %vm125_vm0, %v531_v13, %v8157_v57  ;;  %4506 = vmatmul.mubr.bf16.vlgmr.msra.gmra.mxu0 %v6152_v27 }
 0x117   :  { %v405_v5 = vsel %vm402_vm10, %v6031_v15, %v404_v41  ;;  %v543_v52 = vsel %vm540_vm15, %v6042_v28, %v542_v61  ;;  %v6182_v2 = vpop.permute.xlu0 %3351  ;;  %v6184_v21 = vpop.permute.xlu1 %3489  ;;  %v3730_v59 = vld [vmem:[#allocation2 + $0xc8] sm:$0xff]  ;;  %4556 = vmatpush1.bf16.msra.mxu0 %v6147_v48  ;;  %4587 = vmatprep.mubr.bf16.mxu0 %v6110_v43  ;;  %v6195_v28 = vrot.slane %v3460_v40, %v5348_v7 }
 0x118   :  { %427 = vst [vmem:[#allocation2 + $0x48] sm:$0x33] %v405_v5  ;;  %565 = vst [vmem:[#allocation2 + $0x48] sm:$0xcc] %v543_v52  ;;  %v3366_v13 = vrot.slane %v6182_v2, 4  ;;  %v3504_v57 = vrot.slane %v6184_v21, 4  ;;  %v5111_v15 = vcombine.high %v3722_v22, %v3730_v59  ;;  %v5110_v41 = vcombine.low %v3722_v22, %v3730_v59 }
 0x119   :  { %3218 = vrot.lane.b32.xlu0 %v5680_v9, %s5292_s28  ;;  %3357 = vrot.lane.b32.xlu1 %v6163_v3, %s5286_s21 }
 0x11a   :  { %v3377_v61 = vsel %vm125_vm0, %v3365_v19, %v3366_v13  ;;  %v3515_v52 = vsel %vm125_vm0, %v3503_v20, %v3504_v57  ;;  %4526 = vmatprep.subr.bf16.mxu1 %v5111_v15 }
 0x11b   :  { %v3378_v22 = vsel %vm3373_vm2, %v5587_v16, %v3377_v61  ;;  %v3516_v5 = vsel %vm8161_vm1, %v5589_v18, %v3515_v52  ;;  %v6209_v59 = vpop.permute.xlu0 %3626  ;;  %4527 = vmatpush1.bf16.msra.mxu1 %v5110_v41  ;;  %v6211_v40 = vpop.permute.xlu1 %2801  ;;  %v3706_v52 = vld [vmem:[#allocation2 + $0x8] sm:$0xff] }
 0x11c   :  { %3399 = vst [vmem:[#allocation2 + $0x310] sm:$0x33] %v3378_v22  ;;  %3537 = vst [vmem:[#allocation2 + $0x310] sm:$0xcc] %v3516_v5  ;;  %v3641_v19 = vrot.slane %v6209_v59, 4  ;;  %v2816_v51 = vrot.slane %v6211_v40, 4 }
 0x11d   :  { %3495 = vrot.lane.b32.xlu0 %v6195_v28, %s5285_s20  ;;  %3632 = vrot.lane.b32.xlu1 %v6163_v3, %s5288_s22 }
 0x11e   :  { %v3652_v16 = vsel %vm125_vm0, %v3640_v29, %v3641_v19  ;;  %v2827_v18 = vsel %vm125_vm0, %v2815_v6, %v2816_v51 }
 0x11f   :  { %v3653_v20 = vsel %vm8160_vm3, %v5611_v25, %v3652_v16  ;;  %v2828_v15 = vsel %vm2823_vm4, %v5668_v1, %v2827_v18  ;;  %v6231_v41 = vpop.permute.xlu0 %2939  ;;  %v6233_v61 = vpop.permute.xlu1 %3076  ;;  %v3714_v22 = vld [vmem:[#allocation2 + $0x48] sm:$0xff] }
 0x120   :  { %3674 = vst [vmem:[#allocation2 + $0x350] sm:$0x33] %v3653_v20  ;;  %2849 = vst [vmem:[#allocation2 + $0x290] sm:$0x33] %v2828_v15  ;;  %v2954_v29 = vrot.slane %v6231_v41, 4  ;;  %v3091_v5 = vrot.slane %v6233_v61, 4  ;;  %v5095_v30 = vcombine.high %v3706_v52, %v3714_v22  ;;  %v5094_v6 = vcombine.low %v3706_v52, %v3714_v22 }
 0x121   :  { %2255 = vrot.lane.b32.xlu0 %v6066_v49, %s5293_s29  ;;  %2393 = vrot.lane.b32.xlu1 %v5680_v9, %s5294_s30 }
 0x122   :  { %v2965_v25 = vsel %vm125_vm0, %v2953_v31, %v2954_v29  ;;  %v3102_v1 = vsel %vm125_vm0, %v3090_v26, %v3091_v5  ;;  %4528 = vmatprep.subr.bf16.mxu1 %v5095_v30 }
 0x123   :  { %v2966_v16 = vsel %vm2961_vm5, %v5697_v24, %v2965_v25  ;;  %v3103_v18 = vsel %vm3098_vm6, %v5695_v23, %v3102_v1  ;;  %v6255_v20 = vpop.permute.xlu0 %3214  ;;  %4529 = vmatpush1.bf16.msra.mxu1 %v5094_v6  ;;  %v6257_v15 = vpop.permute.xlu1 %3353  ;;  %v1811_v23 = vld [vmem:[%s8112_s0 + $0x12] sm:$0xff] }
 0x124   :  { %2987 = vst [vmem:[#allocation2 + $0x290] sm:$0xcc] %v2966_v16  ;;  %3124 = vst [vmem:[#allocation2 + $0x2d0] sm:$0x33] %v3103_v18  ;;  %v3229_v31 = vrot.slane %v6255_v20, 4  ;;  %v3367_v52 = vrot.slane %v6257_v15, 4  ;;  %4596 = vmatprep.subr.bf16.mxu1 %v6114_v53  ;;  %v1847_v30 = vcombine.low %v1811_v23, %v1811_v23 }
 0x125   :  { %2530 = vrot.lane.b32.xlu0 %v6066_v49, %s5295_s6  ;;  %2668 = vrot.lane.b32.xlu1 %v5680_v9, %s5296_s7  ;;  %5082 = vst.sshfl [vmem:[#allocation2 + $0x1a8] sm:$0xf0 pattern:$0x76325410] %v1811_v23  ;;  %v3803_v16 = vld [vmem:[#allocation2 + $0x310] sm:$0xff] }
 0x126   :  { %v3240_v24 = vsel %vm125_vm0, %v3228_v38, %v3229_v31  ;;  %v3379_v26 = vsel %vm125_vm0, %v3366_v13, %v3367_v52  ;;  %4547 = vmatmul.mubr.bf16.vlgmr.msra.gmra.mxu1 %v6152_v27  ;;  %5081 = vst.sshfl [vmem:[#allocation2 + $0x1a0] sm:$0xf0 pattern:$0x76325410] %v1847_v30 }
 0x127   :  { %v3241_v22 = vsel %vm3236_vm7, %v5722_v36, %v3240_v24  ;;  %v3380_v6 = vsel %vm3373_vm2, %v6182_v2, %v3379_v26  ;;  %v6282_v25 = vpop.permute.xlu0 %3491  ;;  %v6284_v1 = vpop.permute.xlu1 %3628  ;;  %v3811_v38 = vld [vmem:[#allocation2 + $0x350] sm:$0xff]  ;;  %4597 = vmatpush1.bf16.msra.mxu1 %v6147_v48  ;;  %4628 = vmatprep.mubr.bf16.mxu1 %v6110_v43  ;;  %v1712_v2 = vcombine.high %v5860_v44, %v5860_v44 }
 0x128   :  { %3262 = vst [vmem:[#allocation2 + $0x2d0] sm:$0xcc] %v3241_v22  ;;  %3400 = vst [vmem:[#allocation2 + $0x318] sm:$0x33] %v3380_v6  ;;  %v3505_v13 = vrot.slane %v6282_v25, 4  ;;  %v8175_v18 = vrot.slane %v6284_v1, 4  ;;  %v5192_v36 = vcombine.low %v3803_v16, %v3811_v38  ;;  %v5193_v23 = vcombine.high %v3803_v16, %v3811_v38 }
 0x129   :  { %2807 = vrot.lane.b32.xlu0 %v6163_v3, %s5289_s23  ;;  %2945 = vrot.lane.b32.xlu1 %v6195_v28, %s5290_s24 }
 0x12a   :  { %v3517_v24 = vsel %vm125_vm0, %v3504_v57, %v3505_v13  ;;  %v3654_v26 = vsel %vm125_vm0, %v3641_v19, %v8175_v18  ;;  %4557 = vmatprep.subr.bf16.mxu0 %v5193_v23 }
 0x12b   :  { %v3518_v30 = vsel %vm8161_vm1, %v6184_v21, %v3517_v24  ;;  %v3655_v22 = vsel %vm8160_vm3, %v6209_v59, %v3654_v26  ;;  %v6308_v6 = vpop.permute.xlu0 %2251  ;;  %4558 = vmatpush1.bf16.msra.mxu0 %v5192_v36  ;;  %v6310_v44 = vpop.permute.xlu1 %2389  ;;  %v6319_v21 = vrot.slane %v1712_v2, %v5348_v7  ;;  %vm8207_vm3 = vcmask 965632   ;;  %v3787_v24 = vld [vmem:[#allocation2 + $0x290] sm:$0xff] }
 0x12c   :  { %3538 = vst [vmem:[#allocation2 + $0x318] sm:$0xcc] %v3518_v30  ;;  %3675 = vst [vmem:[#allocation2 + $0x358] sm:$0x33] %v3655_v22  ;;  %v2266_v57 = vrot.slane %v6308_v6, 4  ;;  %v2404_v16 = vrot.slane %v6310_v44, 4 }
 0x12d   :  { %3082 = vrot.lane.b32.xlu0 %v6163_v3, %s5291_s27  ;;  %3220 = vrot.lane.b32.xlu1 %v6195_v28, %s5292_s28  ;;  %vm8208_vm1 = vcmask 957440  }
 0x12e   :  { %v2277_v59 = vsel %vm125_vm0, %v2265_v14, %v2266_v57  ;;  %v2415_v19 = vsel %vm125_vm0, %v2403_v39, %v2404_v16 }
 0x12f   :  { %v2278_v38 = vsel %vm8207_vm3, %v5761_v0, %v2277_v59  ;;  %v2416_v36 = vsel %vm8208_vm1, %v5786_v56, %v2415_v19  ;;  %v6335_v23 = vpop.permute.xlu0 %2526  ;;  %v6337_v2 = vpop.permute.xlu1 %2664  ;;  %v3795_v26 = vld [vmem:[#allocation2 + $0x2d0] sm:$0xff]  ;;  %vm8209_vm1 = vcmask 318464   ;;  %vm8210_vm3 = vcmask 310272  }
 0x130   :  { %2299 = vst [vmem:[#allocation2 + $0x210] sm:$0x33] %v2278_v38  ;;  %2437 = vst [vmem:[#allocation2 + $0x210] sm:$0xcc] %v2416_v36  ;;  %v2541_v14 = vrot.slane %v6335_v23, 4  ;;  %v2679_v30 = vrot.slane %v6337_v2, 4  ;;  %v5176_v22 = vcombine.low %v3787_v24, %v3795_v26  ;;  %v5177_v39 = vcombine.high %v3787_v24, %v3795_v26 }
 0x131   :  { %1759 = vrot.lane.b32.xlu0 %v6319_v21, %s5297_s12  ;;  %1980 = vrot.lane.b32.xlu1 %v6066_v49, %s5298_s13 }
 0x132   :  { %v2552_v0 = vsel %vm125_vm0, %v2540_v62, %v2541_v14  ;;  %v2690_v56 = vsel %vm125_vm0, %v2678_v12, %v2679_v30  ;;  %4559 = vmatprep.subr.bf16.mxu0 %v5177_v39 }
 0x133   :  { %v2553_v59 = vsel %vm8209_vm1, %v5784_v58, %v2552_v0  ;;  %v2691_v19 = vsel %vm8210_vm3, %v5811_v46, %v2690_v56  ;;  %v6359_v49 = vpop.permute.xlu0 %2803  ;;  %4560 = vmatpush1.bf16.msra.mxu0 %v5176_v22  ;;  %v6361_v38 = vpop.permute.xlu1 %2941  ;;  %v3804_v36 = vld [vmem:[#allocation2 + $0x318] sm:$0xff]  ;;  %vm8213_vm1 = vcmask 7168   ;;  %vm8214_vm3 = vcmask 1039360  }
 0x134   :  { %v3812_v62 = vld [vmem:[#allocation2 + $0x358] sm:$0xff]  ;;  %2574 = vst [vmem:[#allocation2 + $0x250] sm:$0x33] %v2553_v59  ;;  %2712 = vst [vmem:[#allocation2 + $0x250] sm:$0xcc] %v2691_v19  ;;  %v8174_v24 = vrot.slane %v6359_v49, 4 }
 0x135   :  { %v8164_v12 = vrot.slane %v6361_v38, 4  ;;  %v5194_v26 = vcombine.low %v3804_v36, %v3812_v62  ;;  %v5195_v39 = vcombine.high %v3804_v36, %v3812_v62  ;;  %2118 = vrot.lane.b32.xlu0 %v5680_v9, %s8183_s14  ;;  %2257 = vrot.lane.b32.xlu1 %v6163_v3, %s5293_s29 }
 0x136   :  { %v2829_v58 = vsel %vm125_vm0, %v2816_v51, %v8174_v24 }
 0x137   :  { %v2967_v46 = vsel %vm125_vm0, %v2954_v29, %v8164_v12  ;;  %4598 = vmatprep.subr.bf16.mxu1 %v5195_v39  ;;  %v2830_v22 = vsel %vm2823_vm4, %v6211_v40, %v2829_v58  ;;  %v6383_v0 = vpop.permute.xlu0 %3078  ;;  %v6385_v56 = vpop.permute.xlu1 %3216 }
 0x138   :  { %v2968_v9 = vsel %vm2961_vm5, %v6231_v41, %v2967_v46  ;;  %4599 = vmatpush1.bf16.msra.mxu1 %v5194_v26  ;;  %2850 = vst [vmem:[#allocation2 + $0x298] sm:$0x33] %v2830_v22  ;;  %v8163_v51 = vrot.slane %v6383_v0, 4  ;;  %v8162_v59 = vrot.slane %v6385_v56, 4  ;;  %v3771_v26 = vld [vmem:[#allocation2 + $0x210] sm:$0xff]  ;;  %v8212_v22 = vrot.slane %v5890_v11, 4 }
 0x139   :  { %2988 = vst [vmem:[#allocation2 + $0x298] sm:$0xcc] %v2968_v9  ;;  %2395 = vrot.lane.b32.xlu0 %v6195_v28, %s5294_s30  ;;  %2532 = vrot.lane.b32.xlu1 %v6163_v3, %s5295_s6 }
 0x13a   :  { %v3104_v40 = vsel %vm125_vm0, %v3091_v5, %v8163_v51  ;;  %v3242_v41 = vsel %vm125_vm0, %v3229_v31, %v8162_v59 }
 0x13b   :  { %v3105_v29 = vsel %vm3098_vm6, %v6233_v61, %v3104_v40  ;;  %v3243_v19 = vsel %vm3236_vm7, %v6255_v20, %v3242_v41  ;;  %v6407_v36 = vpop.permute.xlu0 %1755  ;;  %v6409_v62 = vpop.permute.xlu1 %1976  ;;  %v3779_v39 = vld [vmem:[#allocation2 + $0x250] sm:$0xff]  ;;  %v8211_v61 = vrot.slane %v5863_v47, 4  ;;  %v6430_v40 = vld [vmem:[%s8112_s0 + $0x18] sm:$0xff] }
 0x13c   :  { %3125 = vst [vmem:[#allocation2 + $0x2d8] sm:$0x33] %v3105_v29  ;;  %3263 = vst [vmem:[#allocation2 + $0x2d8] sm:$0xcc] %v3243_v19  ;;  %v1770_v5 = vrot.slane %v6407_v36, 4  ;;  %v1991_v58 = vrot.slane %v6409_v62, 4  ;;  %v5160_v46 = vcombine.low %v3771_v26, %v3779_v39  ;;  %v5161_v31 = vcombine.high %v3771_v26, %v3779_v39 }
 0x13d   :  { %2670 = vrot.lane.b32.xlu0 %v6195_v28, %s5296_s7  ;;  %1209 = vrot.lane.b32.xlu1 %v6319_v21, %s8181_s15 }
 0x13e   :  { %v1781_v20 = vsel %vm125_vm0, %v8211_v61, %v1770_v5  ;;  %v2002_v9 = vsel %vm125_vm0, %v8212_v22, %v1991_v58  ;;  %4561 = vmatprep.subr.bf16.mxu0 %v5161_v31 }
 0x13f   :  { %v1782_v41 = vsel %vm8213_vm1, %v5863_v47, %v1781_v20  ;;  %v2003_v29 = vsel %vm8214_vm3, %v5890_v11, %v2002_v9  ;;  %v6436_v19 = vpop.permute.xlu0 %2114  ;;  %4562 = vmatpush1.bf16.msra.mxu0 %v5160_v46  ;;  %v6438_v26 = vpop.permute.xlu1 %2253  ;;  %v6448_v47 = vrot.slane %v6430_v40, %v5348_v7  ;;  %v8216_v11 = vrot.slane %v5888_v60, 4 }
 0x140   :  { %1803 = vst [vmem:[#allocation2 + $0x190] sm:$0x33] %v1782_v41  ;;  %2024 = vst [vmem:[#allocation2 + $0x1d0] sm:$0x33] %v2003_v29  ;;  %v2129_v39 = vrot.slane %v6436_v19, 4  ;;  %v8168_v31 = vrot.slane %v6438_v26, 4 }
 0x141   :  { %1347 = vrot.lane.b32.xlu0 %v5875_v54, %s8171_s16  ;;  %1484 = vrot.lane.b32.xlu1 %v6319_v21, %s8215_s9  ;;  %vm8217_vm1 = vcmask 973824   ;;  %vm8218_vm3 = vcmask 965632   ;;  %v3788_v29 = vld [vmem:[#allocation2 + $0x298] sm:$0xff] }
 0x142   :  { %v2140_v46 = vsel %vm125_vm0, %v8216_v11, %v2129_v39  ;;  %v2279_v61 = vsel %vm125_vm0, %v2266_v57, %v8168_v31 }
 0x143   :  { %v2141_v20 = vsel %vm8217_vm1, %v5888_v60, %v2140_v46  ;;  %v2280_v22 = vsel %vm8218_vm3, %v6308_v6, %v2279_v61  ;;  %v6464_v9 = vpop.permute.xlu0 %2391  ;;  %v6466_v41 = vpop.permute.xlu1 %2528  ;;  %v3796_v59 = vld [vmem:[#allocation2 + $0x2d8] sm:$0xff]  ;;  %vm8219_vm1 = vcmask 957440   ;;  %vm8220_vm3 = vcmask 318464  }
 0x144   :  { %2162 = vst [vmem:[#allocation2 + $0x1d0] sm:$0xcc] %v2141_v20  ;;  %2300 = vst [vmem:[#allocation2 + $0x218] sm:$0x33] %v2280_v22  ;;  %v8167_v11 = vrot.slane %v6464_v9, 4  ;;  %v8166_v51 = vrot.slane %v6466_v41, 4  ;;  %v5178_v12 = vcombine.low %v3788_v29, %v3796_v59  ;;  %v5179_v57 = vcombine.high %v3788_v29, %v3796_v59 }
 0x145   :  { %1622 = vrot.lane.b32.xlu0 %v5875_v54, %s8204_s25  ;;  %1761 = vrot.lane.b32.xlu1 %v6448_v47, %s5297_s12 }
 0x146   :  { %v2417_v60 = vsel %vm125_vm0, %v2404_v16, %v8167_v11  ;;  %v2554_v6 = vsel %vm125_vm0, %v2541_v14, %v8166_v51  ;;  %4600 = vmatprep.subr.bf16.mxu1 %v5179_v57 }
 0x147   :  { %v2418_v59 = vsel %vm8219_vm1, %v6310_v44, %v2417_v60  ;;  %v2555_v46 = vsel %vm8220_vm3, %v6335_v23, %v2554_v6  ;;  %v6488_v61 = vpop.permute.xlu0 %2666  ;;  %4601 = vmatpush1.bf16.msra.mxu1 %v5178_v12  ;;  %v6490_v20 = vpop.permute.xlu1 %1205  ;;  %v8221_v23 = vrot.slane %v5961_v33, 4  ;;  %vm8222_vm1 = vcmask 310272   ;;  %v3755_v60 = vld [vmem:[#allocation2 + $0x190] sm:$0xff] }
 0x148   :  { %2438 = vst [vmem:[#allocation2 + $0x218] sm:$0xcc] %v2418_v59  ;;  %2575 = vst [vmem:[#allocation2 + $0x258] sm:$0x33] %v2555_v46  ;;  %v8165_v16 = vrot.slane %v6488_v61, 4  ;;  %v1220_v22 = vrot.slane %v6490_v20, 4 }
 0x149   :  { %1982 = vrot.lane.b32.xlu0 %v6163_v3, %s5298_s13  ;;  %2120 = vrot.lane.b32.xlu1 %v6195_v28, %s8183_s14  ;;  %vm8223_vm3 = vcmask 728064  }
 0x14a   :  { %v2692_v44 = vsel %vm125_vm0, %v2679_v30, %v8165_v16  ;;  %v1231_v14 = vsel %vm125_vm0, %v8221_v23, %v1220_v22 }
 0x14b   :  { %v2693_v12 = vsel %vm8222_vm1, %v6337_v2, %v2692_v44  ;;  %v1232_v29 = vsel %vm8223_vm3, %v5961_v33, %v1231_v14  ;;  %v6512_v57 = vpop.permute.xlu0 %1343  ;;  %v6514_v28 = vpop.permute.xlu1 %1480  ;;  %v3763_v6 = vld [vmem:[#allocation2 + $0x1d0] sm:$0xff]  ;;  %v1314_v33 = vcombine.low %v6430_v40, %v6430_v40  ;;  %v8224_v2 = vrot.slane %v5963_v34, 4 }
 0x14c   :  { %2713 = vst [vmem:[#allocation2 + $0x258] sm:$0xcc] %v2693_v12  ;;  %1253 = vst [vmem:[#allocation2 + $0x110] sm:$0x33] %v1232_v29  ;;  %v1358_v30 = vrot.slane %v6512_v57, 4  ;;  %v1495_v59 = vrot.slane %v6514_v28, 4  ;;  %v5144_v46 = vcombine.low %v3755_v60, %v3763_v6  ;;  %v5145_v23 = vcombine.high %v3755_v60, %v3763_v6 }
 0x14d   :  { %659 = vrot.lane.b32.xlu0 %v6319_v21, %s8179_s26  ;;  %797 = vrot.lane.b32.xlu1 %v5875_v54, %s8177_s8  ;;  %v8225_v14 = vrot.slane %v5985_v8, 4  ;;  %vm8226_vm1 = vcmask 89088   ;;  %vm8227_vm3 = vcmask 80896  }
 0x14e   :  { %v1369_v44 = vsel %vm125_vm0, %v8224_v2, %v1358_v30  ;;  %4563 = vmatprep.subr.bf16.mxu0 %v5145_v23 }
 0x14f   :  { %v1506_v12 = vsel %vm125_vm0, %v8225_v14, %v1495_v59  ;;  %v1370_v29 = vsel %vm8226_vm1, %v5963_v34, %v1369_v44  ;;  %v6538_v6 = vpop.permute.xlu0 %1618  ;;  %4564 = vmatpush1.bf16.msra.mxu0 %v5144_v46  ;;  %v6540_v16 = vpop.permute.xlu1 %1757  ;;  %v6549_v34 = vrot.slane %v1314_v33, %v5348_v7  ;;  %vm8231_vm1 = vcmask 72704  }
 0x150   :  { %v1507_v60 = vsel %vm8227_vm3, %v5985_v8, %v1506_v12  ;;  %1391 = vst [vmem:[#allocation2 + $0x110] sm:$0xcc] %v1370_v29  ;;  %v1633_v2 = vrot.slane %v6538_v6, 4  ;;  %v8173_v51 = vrot.slane %v6540_v16, 4  ;;  %v8230_v8 = vrot.slane %v5987_v50, 4  ;;  %v3772_v29 = vld [vmem:[#allocation2 + $0x218] sm:$0xff] }
 0x151   :  { %1528 = vst [vmem:[#allocation2 + $0x150] sm:$0x33] %v1507_v60  ;;  %934 = vrot.lane.b32.xlu0 %v6319_v21, %s8228_s10  ;;  %1072 = vrot.lane.b32.xlu1 %v5875_v54, %s8229_s11  ;;  %vm8232_vm3 = vcmask 7168  }
 0x152   :  { %v1644_v46 = vsel %vm125_vm0, %v8230_v8, %v1633_v2  ;;  %v1783_v23 = vsel %vm125_vm0, %v1770_v5, %v8173_v51 }
 0x153   :  { %v1645_v44 = vsel %vm8231_vm1, %v5987_v50, %v1644_v46  ;;  %v1784_v14 = vsel %vm8232_vm3, %v6407_v36, %v1783_v23  ;;  %v6565_v33 = vpop.permute.xlu0 %1978  ;;  %v6567_v12 = vpop.permute.xlu1 %2116  ;;  %v3780_v60 = vld [vmem:[#allocation2 + $0x258] sm:$0xff]  ;;  %vm8233_vm1 = vcmask 1039360   ;;  %vm8234_vm3 = vcmask 973824  }
 0x154   :  { %1666 = vst [vmem:[#allocation2 + $0x150] sm:$0xcc] %v1645_v44  ;;  %1804 = vst [vmem:[#allocation2 + $0x198] sm:$0x33] %v1784_v14  ;;  %v8170_v8 = vrot.slane %v6565_v33, 4  ;;  %v8169_v11 = vrot.slane %v6567_v12, 4  ;;  %v5162_v31 = vcombine.low %v3772_v29, %v3780_v60  ;;  %v5163_v5 = vcombine.high %v3772_v29, %v3780_v60 }
 0x155   :  { %1211 = vrot.lane.b32.xlu0 %v6448_v47, %s8181_s15  ;;  %1349 = vrot.lane.b32.xlu1 %v6549_v34, %s8171_s16  ;;  %s8238_s16 = smov 110  }
 0x156   :  { %v2004_v50 = vsel %vm125_vm0, %v1991_v58, %v8170_v8  ;;  %v2142_v36 = vsel %vm125_vm0, %v2129_v39, %v8169_v11  ;;  %4602 = vmatprep.subr.bf16.mxu1 %v5163_v5  ;;  %v8236_v39 = vrot.slane %v6057_v32, 4 }
 0x157   :  { %v2005_v46 = vsel %vm8233_vm1, %v6409_v62, %v2004_v50  ;;  %v2143_v23 = vsel %vm8234_vm3, %v6436_v19, %v2142_v36  ;;  %v6589_v44 = vpop.permute.xlu0 %655  ;;  %4603 = vmatpush1.bf16.msra.mxu1 %v5162_v31  ;;  %v6591_v14 = vpop.permute.xlu1 %793  ;;  %v8235_v62 = vrot.slane %v6055_v37, 4  ;;  %vm8241_vm1 = vcmask 728064  }
 0x158   :  { %2025 = vst [vmem:[#allocation2 + $0x1d8] sm:$0x33] %v2005_v46  ;;  %2163 = vst [vmem:[#allocation2 + $0x1d8] sm:$0xcc] %v2143_v23  ;;  %v670_v58 = vrot.slane %v6589_v44, 4  ;;  %v808_v29 = vrot.slane %v6591_v14, 4 }
 0x159   :  { %1486 = vrot.lane.b32.xlu0 %v6448_v47, %s8215_s9  ;;  %1624 = vrot.lane.b32.xlu1 %v6549_v34, %s8204_s25  ;;  %v3739_v46 = vld [vmem:[#allocation2 + $0x110] sm:$0xff]  ;;  %vm8242_vm3 = vcmask 89088  }
 0x15a   :  { %v681_v19 = vsel %vm125_vm0, %v8235_v62, %v670_v58  ;;  %v819_v31 = vsel %vm125_vm0, %v8236_v39, %v808_v29 }
 0x15b   :  { %v682_v60 = vsel %vm677_vm12, %v6055_v37, %v681_v19  ;;  %v820_v5 = vsel %vm815_vm14, %v6057_v32, %v819_v31  ;;  %v6613_v50 = vpop.permute.xlu0 %930  ;;  %v6615_v36 = vpop.permute.xlu1 %1068  ;;  %v3747_v23 = vld [vmem:[#allocation2 + $0x150] sm:$0xff]  ;;  %v8239_v37 = vrot.slane %v6082_v42, 4  ;;  %v8240_v19 = vrot.slane %v6084_v10, 4  ;;  %v3756_v51 = vld [vmem:[#allocation2 + $0x198] sm:$0xff] }
 0x15c   :  { %703 = vst [vmem:[#allocation2 + $0x90] sm:$0x33] %v682_v60  ;;  %841 = vst [vmem:[#allocation2 + $0x90] sm:$0xcc] %v820_v5  ;;  %v945_v62 = vrot.slane %v6613_v50, 4  ;;  %v1083_v11 = vrot.slane %v6615_v36, 4  ;;  %v5128_v8 = vcombine.low %v3739_v46, %v3747_v23  ;;  %v5129_v39 = vcombine.high %v3739_v46, %v3747_v23 }
 0x15d   :  { %108 = vrot.lane.b32.xlu0 %v6319_v21, %s8237_s18  ;;  %247 = vrot.lane.b32.xlu1 %v5875_v54, %s8238_s16 }
 0x15e   :  { %v956_v32 = vsel %vm125_vm0, %v8239_v37, %v945_v62  ;;  %v1094_v31 = vsel %vm125_vm0, %v8240_v19, %v1083_v11  ;;  %4565 = vmatprep.subr.bf16.mxu0 %v5129_v39 }
 0x15f   :  { %v957_v60 = vsel %vm952_vm13, %v6082_v42, %v956_v32  ;;  %v1095_v5 = vsel %vm1090_vm8, %v6084_v10, %v1094_v31  ;;  %v6637_v46 = vpop.permute.xlu0 %1207  ;;  %4566 = vmatpush1.bf16.msra.mxu0 %v5128_v8  ;;  %v6639_v23 = vpop.permute.xlu1 %1345  ;;  %v3764_v37 = vld [vmem:[#allocation2 + $0x1d8] sm:$0xff] }
 0x160   :  { %978 = vst [vmem:[#allocation2 + $0xd0] sm:$0x33] %v957_v60  ;;  %1116 = vst [vmem:[#allocation2 + $0xd0] sm:$0xcc] %v1095_v5  ;;  %v1221_v24 = vrot.slane %v6637_v46, 4  ;;  %v1359_v19 = vrot.slane %v6639_v23, 4  ;;  %v5146_v39 = vcombine.low %v3756_v51, %v3764_v37  ;;  %v5147_v18 = vcombine.high %v3756_v51, %v3764_v37 }
 0x161   :  { %384 = vrot.lane.b32.xlu0 %v6319_v21, %s8205_s19  ;;  %522 = vrot.lane.b32.xlu1 %v5875_v54, %s8206_s17 }
 0x162   :  { %v1233_v42 = vsel %vm125_vm0, %v1220_v22, %v1221_v24  ;;  %v1371_v10 = vsel %vm125_vm0, %v1358_v30, %v1359_v19  ;;  %4604 = vmatprep.subr.bf16.mxu1 %v5147_v18 }
 0x163   :  { %v1234_v51 = vsel %vm8241_vm1, %v6490_v20, %v1233_v42  ;;  %v1372_v21 = vsel %vm8242_vm3, %v6512_v57, %v1371_v10  ;;  %v6661_v54 = vpop.permute.xlu0 %1482  ;;  %4605 = vmatpush1.bf16.msra.mxu1 %v5146_v39  ;;  %v6663_v8 = vpop.permute.xlu1 %1620  ;;  %vm8243_vm1 = vcmask 80896   ;;  %vm8244_vm3 = vcmask 72704   ;;  %v3723_v5 = vld [vmem:[#allocation2 + $0x90] sm:$0xff] }
 0x164   :  { %1254 = vst [vmem:[#allocation2 + $0x118] sm:$0x33] %v1234_v51  ;;  %1392 = vst [vmem:[#allocation2 + $0x118] sm:$0xcc] %v1372_v21  ;;  %v1496_v22 = vrot.slane %v6661_v54, 4  ;;  %v8176_v32 = vrot.slane %v6663_v8, 4 }
 0x165   :  { %661 = vrot.lane.b32.xlu0 %v6448_v47, %s8179_s26  ;;  %799 = vrot.lane.b32.xlu1 %v6549_v34, %s8177_s8  ;;  %v8246_v10 = vrot.slane %v6108_v17, 4 }
 0x166   :  { %v1508_v18 = vsel %vm125_vm0, %v1495_v59, %v1496_v22  ;;  %v1646_v20 = vsel %vm125_vm0, %v1633_v2, %v8176_v32 }
 0x167   :  { %v1509_v57 = vsel %vm8243_vm1, %v6514_v28, %v1508_v18  ;;  %v1647_v30 = vsel %vm8244_vm3, %v6538_v6, %v1646_v20  ;;  %v6685_v31 = vpop.permute.xlu0 %104  ;;  %v6687_v60 = vpop.permute.xlu1 %243  ;;  %v3731_v37 = vld [vmem:[#allocation2 + $0xd0] sm:$0xff]  ;;  %v8245_v28 = vrot.slane %v6106_v35, 4  ;;  %vm8249_vm1 = vcmask 146432  }
 0x168   :  { %1529 = vst [vmem:[#allocation2 + $0x158] sm:$0x33] %v1509_v57  ;;  %1667 = vst [vmem:[#allocation2 + $0x158] sm:$0xcc] %v1647_v30  ;;  %v119_v59 = vrot.slane %v6685_v31, 4  ;;  %v258_v39 = vrot.slane %v6687_v60, 4  ;;  %v5112_v42 = vcombine.low %v3723_v5, %v3731_v37  ;;  %v5113_v2 = vcombine.high %v3723_v5, %v3731_v37 }
 0x169   :  { %936 = vrot.lane.b32.xlu0 %v6448_v47, %s8228_s10  ;;  %1074 = vrot.lane.b32.xlu1 %v6549_v34, %s8229_s11  ;;  %vm8252_vm3 = vcmask 138240  }
 0x16a   :  { %v131_v6 = vsel %vm125_vm0, %v8245_v28, %v119_v59  ;;  %v269_v51 = vsel %vm125_vm0, %v8246_v10, %v258_v39  ;;  %4567 = vmatprep.subr.bf16.mxu0 %v5113_v2 }
 0x16b   :  { %v132_v21 = vsel %vm127_vm11, %v6106_v35, %v131_v6  ;;  %v270_v18 = vsel %vm265_vm9, %v6108_v17, %v269_v51  ;;  %v6709_v20 = vpop.permute.xlu0 %380  ;;  %4568 = vmatpush1.bf16.msra.mxu0 %v5112_v42  ;;  %v6711_v57 = vpop.permute.xlu1 %518  ;;  %v3323_v35 = vcombine.high %v6135_v63, %v6135_v63  ;;  %v8247_v17 = vrot.slane %v6141_v45, 4  ;;  %v3740_v51 = vld [vmem:[#allocation2 + $0x118] sm:$0xff] }
 0x16c   :  { %153 = vst [vmem:[#allocation2 + $0x10] sm:$0x33] %v132_v21  ;;  %291 = vst [vmem:[#allocation2 + $0x10] sm:$0xcc] %v270_v18  ;;  %v395_v30 = vrot.slane %v6709_v20, 4  ;;  %v533_v5 = vrot.slane %v6711_v57, 4 }
 0x16d   :  { %110 = vrot.lane.b32.xlu0 %v6448_v47, %s8237_s18  ;;  %249 = vrot.lane.b32.xlu1 %v6549_v34, %s8238_s16  ;;  %v8248_v42 = vrot.slane %v6143_v55, 4 }
 0x16e   :  { %v406_v37 = vsel %vm125_vm0, %v8247_v17, %v395_v30 }
 0x16f   :  { %v544_v2 = vsel %vm125_vm0, %v8248_v42, %v533_v5  ;;  %v407_v28 = vsel %vm402_vm10, %v6141_v45, %v406_v37  ;;  %v6735_v10 = vpop.permute.xlu0 %657  ;;  %v6737_v63 = vpop.permute.xlu1 %795  ;;  %v3748_v21 = vld [vmem:[#allocation2 + $0x158] sm:$0xff]  ;;  %v6746_v45 = vrot.slane %v3323_v35, %v5348_v7 }
 0x170   :  { %v545_v6 = vsel %vm540_vm15, %v6143_v55, %v544_v2  ;;  %428 = vst [vmem:[#allocation2 + $0x50] sm:$0x33] %v407_v28  ;;  %v671_v18 = vrot.slane %v6735_v10, 4  ;;  %v809_v17 = vrot.slane %v6737_v63, 4  ;;  %v5130_v32 = vcombine.low %v3740_v51, %v3748_v21 }
 0x171   :  { %566 = vst [vmem:[#allocation2 + $0x50] sm:$0xcc] %v545_v6  ;;  %v5131_v42 = vcombine.high %v3740_v51, %v3748_v21  ;;  %386 = vrot.lane.b32.xlu0 %v6448_v47, %s8205_s19  ;;  %524 = vrot.lane.b32.xlu1 %v6549_v34, %s8206_s17 }
 0x172   :  { %v683_v55 = vsel %vm125_vm0, %v670_v58, %v671_v18  ;;  %v821_v37 = vsel %vm125_vm0, %v808_v29, %v809_v17 }
 0x173   :  { %4606 = vmatprep.subr.bf16.mxu1 %v5131_v42  ;;  %v684_v2 = vsel %vm677_vm12, %v6589_v44, %v683_v55  ;;  %v822_v34 = vsel %vm815_vm14, %v6591_v14, %v821_v37  ;;  %v6762_v35 = vpop.permute.xlu0 %932  ;;  %v6764_v28 = vpop.permute.xlu1 %1070  ;;  %v3707_v42 = vld [vmem:[#allocation2 + $0x10] sm:$0xff] }
 0x174   :  { %4607 = vmatpush1.bf16.msra.mxu1 %v5130_v32  ;;  %704 = vst [vmem:[#allocation2 + $0x98] sm:$0x33] %v684_v2  ;;  %842 = vst [vmem:[#allocation2 + $0x98] sm:$0xcc] %v822_v34  ;;  %v8190_v58 = vrot.slane %v6762_v35, 4  ;;  %v8189_v6 = vrot.slane %v6764_v28, 4 }
 0x175   :  { %3359 = vrot.lane.b32.xlu0 %v6746_v45, %s5286_s21  ;;  %3497 = vrot.lane.b32.xlu1 %v6163_v3, %s5285_s20 }
 0x176   :  { %v958_v44 = vsel %vm125_vm0, %v945_v62, %v8190_v58  ;;  %v1096_v14 = vsel %vm125_vm0, %v1083_v11, %v8189_v6  ;;  %v6955_v58 = vld [vmem:[#allocation2 + $0x380] sm:$0xff] }
 0x177   :  { %v959_v29 = vsel %vm952_vm13, %v6613_v50, %v958_v44  ;;  %v1097_v32 = vsel %vm1090_vm8, %v6615_v36, %v1096_v14  ;;  %v6786_v51 = vpop.permute.xlu0 %106  ;;  %v6788_v21 = vpop.permute.xlu1 %245 }
 0x178   :  { %v3715_v55 = vld [vmem:[#allocation2 + $0x50] sm:$0xff]  ;;  %979 = vst [vmem:[#allocation2 + $0xd8] sm:$0x33] %v959_v29  ;;  %1117 = vst [vmem:[#allocation2 + $0xd8] sm:$0xcc] %v1097_v32  ;;  %v8188_v62 = vrot.slane %v6786_v51, 4 }
 0x179   :  { %v8187_v37 = vrot.slane %v6788_v21, 4  ;;  %v5096_v2 = vcombine.low %v3707_v42, %v3715_v55  ;;  %v5097_v11 = vcombine.high %v3707_v42, %v3715_v55  ;;  %3634 = vrot.lane.b32.xlu0 %v6746_v45, %s5288_s22  ;;  %2809 = vrot.lane.b32.xlu1 %v6746_v45, %s5289_s23  ;;  %v6837_v42 = vld.sshfl [vmem:[%s8112_s0 + $0x22] sm:$0x3 pattern:$0x76325410] }
 0x17a   :  { %v133_v50 = vsel %vm125_vm0, %v119_v59, %v8188_v62 }
 0x17b   :  { %v271_v36 = vsel %vm125_vm0, %v258_v39, %v8187_v37  ;;  %4569 = vmatprep.subr.bf16.mxu0 %v5097_v11  ;;  %v134_v34 = vsel %vm127_vm11, %v6685_v31, %v133_v50  ;;  %v6810_v14 = vpop.permute.xlu0 %382  ;;  %v6812_v29 = vpop.permute.xlu1 %520  ;;  %v5265_v31 = vld [vmem:[%s8112_s0 + $0x22] ss:$0 sps:$4 sm:$0x33]   ;;  %v3724_v50 = vld [vmem:[#allocation2 + $0x98] sm:$0xff] }
 0x17c   :  { %v272_v44 = vsel %vm265_vm9, %v6687_v60, %v271_v36  ;;  %4570 = vmatpush1.bf16.msra.mxu0 %v5096_v2  ;;  %154 = vst [vmem:[#allocation2 + $0x18] sm:$0x33] %v134_v34  ;;  %v8186_v59 = vrot.slane %v6810_v14, 4  ;;  %v8185_v32 = vrot.slane %v6812_v29, 4 }
 0x17d   :  { %292 = vst [vmem:[#allocation2 + $0x18] sm:$0xcc] %v272_v44  ;;  %4637 = vmatprep.subr.bf16.mxu0 %v6114_v53  ;;  %2947 = vrot.lane.b32.xlu0 %v6163_v3, %s5290_s24 }
 0x17e   :  { %3084 = vrot.lane.b32.xlu1 %v6746_v45, %s5291_s27  ;;  %v408_v60 = vsel %vm125_vm0, %v395_v30, %v8186_v59  ;;  %v546_v39 = vsel %vm125_vm0, %v533_v5, %v8185_v32 }
 0x17f   :  { %4588 = vmatmul.mubr.bf16.vlgmr.msra.gmra.mxu0 %v6152_v27  ;;  %v409_v55 = vsel %vm402_vm10, %v6709_v20, %v408_v60  ;;  %v547_v2 = vsel %vm540_vm15, %v6711_v57, %v546_v39  ;;  %v6844_v30 = vpop.permute.xlu0 %3355  ;;  %v6846_v11 = vpop.permute.xlu1 %3493  ;;  %v3732_v36 = vld [vmem:[#allocation2 + $0xd8] sm:$0xff]  ;;  %v3482_v57 = vrot.slane %v5265_v31, %v5348_v7 }
 0x180   :  { %4638 = vmatpush1.bf16.msra.mxu0 %v6147_v48  ;;  %4669 = vmatprep.mubr.bf16.mxu0 %v6110_v43  ;;  %429 = vst [vmem:[#allocation2 + $0x58] sm:$0x33] %v409_v55  ;;  %567 = vst [vmem:[#allocation2 + $0x58] sm:$0xcc] %v547_v2  ;;  %v3368_v5 = vrot.slane %v6844_v30, 4  ;;  %v3506_v34 = vrot.slane %v6846_v11, 4  ;;  %v5114_v20 = vcombine.low %v3724_v50, %v3732_v36 }
 0x181   :  { %v5115_v44 = vcombine.high %v3724_v50, %v3732_v36  ;;  %3222 = vrot.lane.b32.xlu0 %v6163_v3, %s5292_s28 }
 0x182   :  { %3361 = vrot.lane.b32.xlu1 %v6837_v42, %s5286_s21  ;;  %v3381_v43 = vsel %vm125_vm0, %v3367_v52, %v3368_v5  ;;  %v3519_v60 = vsel %vm125_vm0, %v3505_v13, %v3506_v34  ;;  %v8251_v13 = vrot.slane %v6359_v49, 4 }
 0x183   :  { %4608 = vmatprep.subr.bf16.mxu1 %v5115_v44  ;;  %v3382_v39 = vsel %vm3373_vm2, %v6257_v15, %v3381_v43  ;;  %v3520_v55 = vsel %vm8249_vm1, %v6282_v25, %v3519_v60  ;;  %v6869_v2 = vpop.permute.xlu0 %3630  ;;  %v6871_v31 = vpop.permute.xlu1 %2805  ;;  %v8250_v15 = vrot.slane %v6284_v1, 4 }
 0x184   :  { %4609 = vmatpush1.bf16.msra.mxu1 %v5114_v20  ;;  %3401 = vst [vmem:[#allocation2 + $0x320] sm:$0x33] %v3382_v39  ;;  %3539 = vst [vmem:[#allocation2 + $0x320] sm:$0xcc] %v3520_v55  ;;  %v3643_v52 = vrot.slane %v6869_v2, 4  ;;  %v2818_v50 = vrot.slane %v6871_v31, 4 }
 0x185   :  { %3499 = vrot.lane.b32.xlu0 %v3482_v57, %s5285_s20  ;;  %v3708_v60 = vld [vmem:[#allocation2 + $0x18] sm:$0xff] }
 0x186   :  { %3636 = vrot.lane.b32.xlu1 %v6837_v42, %s5288_s22  ;;  %v3656_v25 = vsel %vm125_vm0, %v8250_v15, %v3643_v52  ;;  %v2831_v36 = vsel %vm125_vm0, %v8251_v13, %v2818_v50 }
 0x187   :  { %v3657_v20 = vsel %vm8252_vm3, %v6284_v1, %v3656_v25  ;;  %v2832_v44 = vsel %vm2823_vm4, %v6359_v49, %v2831_v36  ;;  %v6892_v57 = vpop.permute.xlu0 %2943  ;;  %v6894_v43 = vpop.permute.xlu1 %3080  ;;  %v3716_v39 = vld [vmem:[#allocation2 + $0x58] sm:$0xff]  ;;  %v5266_v1 = vld [vmem:[%s8112_s0 + $0x22] ss:$0 sps:$4 sm:$0x33]   ;;  %v8253_v49 = vrot.slane %v6361_v38, 4  ;;  %v8254_v36 = vrot.slane %v6383_v0, 4 }
 0x188   :  { %3676 = vst [vmem:[#allocation2 + $0x360] sm:$0x33] %v3657_v20  ;;  %2851 = vst [vmem:[#allocation2 + $0x2a0] sm:$0x33] %v2832_v44  ;;  %v2956_v55 = vrot.slane %v6892_v57, 4  ;;  %v3093_v15 = vrot.slane %v6894_v43, 4  ;;  %v5098_v32 = vcombine.low %v3708_v60, %v3716_v39  ;;  %v5099_v13 = vcombine.high %v3708_v60, %v3716_v39 }
 0x189   :  { %2259 = vrot.lane.b32.xlu0 %v6746_v45, %s5293_s29 }
 0x18a   :  { %2397 = vrot.lane.b32.xlu1 %v6163_v3, %s5294_s30  ;;  %v2969_v25 = vsel %vm125_vm0, %v8253_v49, %v2956_v55  ;;  %v3106_v20 = vsel %vm125_vm0, %v8254_v36, %v3093_v15  ;;  %4610 = vmatprep.subr.bf16.mxu1 %v5099_v13  ;;  %v8255_v13 = vrot.slane %v6385_v56, 4 }
 0x18b   :  { %v2970_v44 = vsel %vm2961_vm5, %v6361_v38, %v2969_v25  ;;  %v3107_v60 = vsel %vm3098_vm6, %v6383_v0, %v3106_v20  ;;  %v6919_v39 = vpop.permute.xlu0 %3218  ;;  %4611 = vmatpush1.bf16.msra.mxu1 %v5098_v32  ;;  %v6921_v59 = vpop.permute.xlu1 %3357  ;;  %v2932_v38 = vrot.slane %v5266_v1, %v5348_v7  ;;  %v5267_v0 = vld [vmem:[%s8112_s0 + $0x22] ss:$0 sps:$4 sm:$0x33]   ;;  %v1812_v32 = vld [vmem:[%s8112_s0 + $0x1a] sm:$0xff] }
 0x18c   :  { %2989 = vst [vmem:[#allocation2 + $0x2a0] sm:$0xcc] %v2970_v44  ;;  %3126 = vst [vmem:[#allocation2 + $0x2e0] sm:$0x33] %v3107_v60  ;;  %v3231_v49 = vrot.slane %v6919_v39, 4  ;;  %v8193_v37 = vrot.slane %v6921_v59, 4  ;;  %4678 = vmatprep.subr.bf16.mxu1 %v6114_v53  ;;  %v1862_v1 = vcombine.low %v1812_v32, %v1812_v32 }
 0x18d   :  { %2534 = vrot.lane.b32.xlu0 %v6746_v45, %s5295_s6  ;;  %5084 = vst.sshfl [vmem:[#allocation2 + $0x1b8] sm:$0xf0 pattern:$0x76325410] %v1812_v32  ;;  %v3805_v6 = vld [vmem:[#allocation2 + $0x320] sm:$0xff]  ;;  %v3207_v32 = vrot.slane %v5267_v0, %v5348_v7 }
 0x18e   :  { %2672 = vrot.lane.b32.xlu1 %v6163_v3, %s5296_s7  ;;  %v3244_v25 = vsel %vm125_vm0, %v8255_v13, %v3231_v49  ;;  %v3383_v36 = vsel %vm125_vm0, %v3368_v5, %v8193_v37  ;;  %4629 = vmatmul.mubr.bf16.vlgmr.msra.gmra.mxu1 %v6152_v27  ;;  %5083 = vst.sshfl [vmem:[#allocation2 + $0x1b0] sm:$0xf0 pattern:$0x76325410] %v1862_v1 }
 0x18f   :  { %v3245_v20 = vsel %vm3236_vm7, %v6385_v56, %v3244_v25  ;;  %v3384_v44 = vsel %vm3373_vm2, %v6844_v30, %v3383_v36  ;;  %v6950_v60 = vpop.permute.xlu0 %3495  ;;  %v6952_v62 = vpop.permute.xlu1 %3632  ;;  %v3813_v13 = vld [vmem:[#allocation2 + $0x360] sm:$0xff]  ;;  %4679 = vmatpush1.bf16.msra.mxu1 %v6147_v48  ;;  %4710 = vmatprep.mubr.bf16.mxu1 %v6955_v58  ;;  %v1727_v25 = vcombine.high %v6430_v40, %v6430_v40 }
 0x190   :  { %3264 = vst [vmem:[#allocation2 + $0x2e0] sm:$0xcc] %v3245_v20  ;;  %3402 = vst [vmem:[#allocation2 + $0x328] sm:$0x33] %v3384_v44  ;;  %v8192_v27 = vrot.slane %v6950_v60, 4  ;;  %v8191_v56 = vrot.slane %v6952_v62, 4  ;;  %v5196_v5 = vcombine.low %v3805_v6, %v3813_v13  ;;  %v5197_v30 = vcombine.high %v3805_v6, %v3813_v13 }
 0x191   :  { %2811 = vrot.lane.b32.xlu0 %v6837_v42, %s5289_s23  ;;  %v8257_v44 = vrot.slane %v6464_v9, 4 }
 0x192   :  { %2949 = vrot.lane.b32.xlu1 %v2932_v38, %s5290_s24  ;;  %v3521_v36 = vsel %vm125_vm0, %v3506_v34, %v8192_v27  ;;  %v3658_v6 = vsel %vm125_vm0, %v3643_v52, %v8191_v56  ;;  %4639 = vmatprep.subr.bf16.mxu0 %v5197_v30 }
 0x193   :  { %v3522_v38 = vsel %vm8249_vm1, %v6846_v11, %v3521_v36  ;;  %v3659_v0 = vsel %vm8252_vm3, %v6869_v2, %v3658_v6  ;;  %v6980_v40 = vpop.permute.xlu0 %2255  ;;  %4640 = vmatpush1.bf16.msra.mxu0 %v5196_v5  ;;  %v6982_v1 = vpop.permute.xlu1 %2393  ;;  %v6990_v11 = vrot.slane %v1727_v25, %v5348_v7  ;;  %v8256_v2 = vrot.slane %v6438_v26, 4  ;;  %v3789_v36 = vld [vmem:[#allocation2 + $0x2a0] sm:$0xff] }
 0x194   :  { %3540 = vst [vmem:[#allocation2 + $0x328] sm:$0xcc] %v3522_v38  ;;  %3677 = vst [vmem:[#allocation2 + $0x368] sm:$0x33] %v3659_v0  ;;  %v2268_v34 = vrot.slane %v6980_v40, 4  ;;  %v2406_v20 = vrot.slane %v6982_v1, 4 }
 0x195   :  { %3086 = vrot.lane.b32.xlu0 %v6837_v42, %s5291_s27  ;;  %vm8258_vm1 = vcmask 965632   ;;  %vm8259_vm3 = vcmask 957440   ;;  %s8264_s27 = smov 119  }
 0x196   :  { %3224 = vrot.lane.b32.xlu1 %v3207_v32, %s5292_s28  ;;  %v2281_v52 = vsel %vm125_vm0, %v8256_v2, %v2268_v34  ;;  %v2419_v13 = vsel %vm125_vm0, %v8257_v44, %v2406_v20 }
 0x197   :  { %v2282_v5 = vsel %vm8258_vm1, %v6438_v26, %v2281_v52  ;;  %v2420_v30 = vsel %vm8259_vm3, %v6464_v9, %v2419_v13  ;;  %v7006_v32 = vpop.permute.xlu0 %2530  ;;  %v7008_v25 = vpop.permute.xlu1 %2668  ;;  %v3797_v6 = vld [vmem:[#allocation2 + $0x2e0] sm:$0xff]  ;;  %v8260_v9 = vrot.slane %v6466_v41, 4  ;;  %v8261_v13 = vrot.slane %v6488_v61, 4 }
 0x198   :  { %2301 = vst [vmem:[#allocation2 + $0x220] sm:$0x33] %v2282_v5  ;;  %2439 = vst [vmem:[#allocation2 + $0x220] sm:$0xcc] %v2420_v30  ;;  %v2543_v38 = vrot.slane %v7006_v32, 4  ;;  %v2681_v0 = vrot.slane %v7008_v25, 4  ;;  %v5180_v2 = vcombine.low %v3789_v36, %v3797_v6  ;;  %v5181_v44 = vcombine.high %v3789_v36, %v3797_v6 }
 0x199   :  { %1763 = vrot.lane.b32.xlu0 %v6990_v11, %s5297_s12  ;;  %v5268_v26 = vld [vmem:[%s8112_s0 + $0x22] ss:$0 sps:$4 sm:$0x33]   ;;  %vm8262_vm1 = vcmask 318464   ;;  %vm8263_vm3 = vcmask 310272  }
 0x19a   :  { %1984 = vrot.lane.b32.xlu1 %v6746_v45, %s5298_s13  ;;  %v2556_v52 = vsel %vm125_vm0, %v8260_v9, %v2543_v38  ;;  %v2694_v5 = vsel %vm125_vm0, %v8261_v13, %v2681_v0  ;;  %4641 = vmatprep.subr.bf16.mxu0 %v5181_v44 }
 0x19b   :  { %v2557_v45 = vsel %vm8262_vm1, %v6466_v41, %v2556_v52  ;;  %v2695_v30 = vsel %vm8263_vm3, %v6488_v61, %v2694_v5  ;;  %v7033_v36 = vpop.permute.xlu0 %2807  ;;  %4642 = vmatpush1.bf16.msra.mxu0 %v5180_v2  ;;  %v7035_v6 = vpop.permute.xlu1 %2945  ;;  %v3806_v56 = vld [vmem:[#allocation2 + $0x328] sm:$0xff]  ;;  %v2382_v41 = vrot.slane %v5268_v26, %v5348_v7  ;;  %v5269_v61 = vld [vmem:[%s8112_s0 + $0x22] ss:$0 sps:$4 sm:$0x33]   ;;  %vm8268_vm1 = vcmask 7168  }
 0x19c   :  { %v3814_v9 = vld [vmem:[#allocation2 + $0x368] sm:$0xff]  ;;  %2576 = vst [vmem:[#allocation2 + $0x260] sm:$0x33] %v2557_v45  ;;  %2714 = vst [vmem:[#allocation2 + $0x260] sm:$0xcc] %v2695_v30  ;;  %v2819_v27 = vrot.slane %v7033_v36, 4 }
 0x19d   :  { %v2957_v13 = vrot.slane %v7035_v6, 4  ;;  %v5198_v44 = vcombine.low %v3806_v56, %v3814_v9  ;;  %v5199_v37 = vcombine.high %v3806_v56, %v3814_v9  ;;  %2122 = vrot.lane.b32.xlu0 %v6163_v3, %s8264_s27  ;;  %vm8269_vm3 = vcmask 1039360  }
 0x19e   :  { %2261 = vrot.lane.b32.xlu1 %v6837_v42, %s5293_s29  ;;  %v2833_v2 = vsel %vm125_vm0, %v2818_v50, %v2819_v27  ;;  %s8265_s29 = smov 89  }
 0x19f   :  { %v2971_v3 = vsel %vm125_vm0, %v2956_v55, %v2957_v13  ;;  %4680 = vmatprep.subr.bf16.mxu1 %v5199_v37  ;;  %v2834_v56 = vsel %vm2823_vm4, %v6871_v31, %v2833_v2  ;;  %v7061_v52 = vpop.permute.xlu0 %3082  ;;  %v7063_v5 = vpop.permute.xlu1 %3220  ;;  %v2657_v37 = vrot.slane %v5269_v61, %v5348_v7 }
 0x1a0   :  { %v2972_v26 = vsel %vm2961_vm5, %v6892_v57, %v2971_v3  ;;  %4681 = vmatpush1.bf16.msra.mxu1 %v5198_v44  ;;  %2852 = vst [vmem:[#allocation2 + $0x2a8] sm:$0x33] %v2834_v56  ;;  %v3094_v50 = vrot.slane %v7061_v52, 4  ;;  %v8195_v45 = vrot.slane %v7063_v5, 4  ;;  %v8267_v56 = vrot.slane %v6565_v33, 4 }
 0x1a1   :  { %2990 = vst [vmem:[#allocation2 + $0x2a8] sm:$0xcc] %v2972_v26  ;;  %2399 = vrot.lane.b32.xlu0 %v2382_v41, %s5294_s30  ;;  %v3773_v41 = vld [vmem:[#allocation2 + $0x220] sm:$0xff]  ;;  %s8270_s30 = smov 11  }
 0x1a2   :  { %2536 = vrot.lane.b32.xlu1 %v6837_v42, %s5295_s6  ;;  %v3108_v31 = vsel %vm125_vm0, %v3093_v15, %v3094_v50  ;;  %v3246_v57 = vsel %vm125_vm0, %v3231_v49, %v8195_v45 }
 0x1a3   :  { %v3109_v55 = vsel %vm3098_vm6, %v6894_v43, %v3108_v31  ;;  %v3247_v30 = vsel %vm3236_vm7, %v6919_v39, %v3246_v57  ;;  %v7085_v9 = vpop.permute.xlu0 %1759  ;;  %v7087_v44 = vpop.permute.xlu1 %1980  ;;  %v3781_v61 = vld [vmem:[#allocation2 + $0x260] sm:$0xff]  ;;  %v8266_v43 = vrot.slane %v6540_v16, 4 }
 0x1a4   :  { %3127 = vst [vmem:[#allocation2 + $0x2e8] sm:$0x33] %v3109_v55  ;;  %3265 = vst [vmem:[#allocation2 + $0x2e8] sm:$0xcc] %v3247_v30  ;;  %v1772_v15 = vrot.slane %v7085_v9, 4  ;;  %v1993_v2 = vrot.slane %v7087_v44, 4  ;;  %v5164_v3 = vcombine.low %v3773_v41, %v3781_v61  ;;  %v5165_v49 = vcombine.high %v3773_v41, %v3781_v61 }
 0x1a5   :  { %2674 = vrot.lane.b32.xlu0 %v2657_v37, %s5296_s7 }
 0x1a6   :  { %1213 = vrot.lane.b32.xlu1 %v6990_v11, %s8265_s29  ;;  %v1785_v39 = vsel %vm125_vm0, %v8266_v43, %v1772_v15  ;;  %v2006_v26 = vsel %vm125_vm0, %v8267_v56, %v1993_v2  ;;  %4643 = vmatprep.subr.bf16.mxu0 %v5165_v49  ;;  %v7134_v49 = vld.sshfl [vmem:[%s8112_s0 + $0x20] sm:$0x3 pattern:$0x76325410] }
 0x1a7   :  { %v1786_v31 = vsel %vm8268_vm1, %v6540_v16, %v1785_v39  ;;  %v2007_v37 = vsel %vm8269_vm3, %v6565_v33, %v2006_v26  ;;  %v7108_v57 = vpop.permute.xlu0 %2118  ;;  %4644 = vmatpush1.bf16.msra.mxu0 %v5164_v3  ;;  %v7110_v55 = vpop.permute.xlu1 %2257  ;;  %v5270_v16 = vld [vmem:[%s8112_s0 + $0x22] ss:$0 sps:$4 sm:$0x33]   ;;  %v8271_v33 = vrot.slane %v6567_v12, 4  ;;  %vm8272_vm1 = vcmask 973824  }
 0x1a8   :  { %1805 = vst [vmem:[#allocation2 + $0x1a0] sm:$0x33] %v1786_v31  ;;  %2026 = vst [vmem:[#allocation2 + $0x1e0] sm:$0x33] %v2007_v37  ;;  %v2131_v30 = vrot.slane %v7108_v57, 4  ;;  %v8194_v41 = vrot.slane %v7110_v55, 4 }
 0x1a9   :  { %1351 = vrot.lane.b32.xlu0 %v6448_v47, %s8270_s30  ;;  %vm8273_vm3 = vcmask 965632   ;;  %v3790_v31 = vld [vmem:[#allocation2 + $0x2a8] sm:$0xff] }
 0x1aa   :  { %1488 = vrot.lane.b32.xlu1 %v6990_v11, %s8215_s9  ;;  %v2144_v61 = vsel %vm125_vm0, %v8271_v33, %v2131_v30  ;;  %v2283_v3 = vsel %vm125_vm0, %v2268_v34, %v8194_v41 }
 0x1ab   :  { %v2145_v43 = vsel %vm8272_vm1, %v6567_v12, %v2144_v61  ;;  %v2284_v39 = vsel %vm8273_vm3, %v6980_v40, %v2283_v3  ;;  %v7140_v56 = vpop.permute.xlu0 %2395  ;;  %v7142_v26 = vpop.permute.xlu1 %2532  ;;  %v3798_v37 = vld [vmem:[#allocation2 + $0x2e8] sm:$0xff]  ;;  %v2107_v12 = vrot.slane %v5270_v16, %v5348_v7  ;;  %vm8274_vm1 = vcmask 957440  }
 0x1ac   :  { %2164 = vst [vmem:[#allocation2 + $0x1e0] sm:$0xcc] %v2145_v43  ;;  %2302 = vst [vmem:[#allocation2 + $0x228] sm:$0x33] %v2284_v39  ;;  %v2407_v34 = vrot.slane %v7140_v56, 4  ;;  %v2544_v33 = vrot.slane %v7142_v26, 4  ;;  %v5182_v41 = vcombine.low %v3790_v31, %v3798_v37  ;;  %v5183_v45 = vcombine.high %v3790_v31, %v3798_v37 }
 0x1ad   :  { %1626 = vrot.lane.b32.xlu0 %v6448_v47, %s8204_s25  ;;  %vm8275_vm3 = vcmask 318464  }
 0x1ae   :  { %1765 = vrot.lane.b32.xlu1 %v7134_v49, %s5297_s12  ;;  %v2421_v40 = vsel %vm125_vm0, %v2406_v20, %v2407_v34  ;;  %v2558_v61 = vsel %vm125_vm0, %v2543_v38, %v2544_v33  ;;  %4682 = vmatprep.subr.bf16.mxu1 %v5183_v45  ;;  %s8278_s12 = smov 100  }
 0x1af   :  { %v2422_v3 = vsel %vm8274_vm1, %v6982_v1, %v2421_v40  ;;  %v2559_v43 = vsel %vm8275_vm3, %v7006_v32, %v2558_v61  ;;  %v7165_v16 = vpop.permute.xlu0 %2670  ;;  %4683 = vmatpush1.bf16.msra.mxu1 %v5182_v41  ;;  %v7167_v39 = vpop.permute.xlu1 %1209  ;;  %vm8276_vm1 = vcmask 310272   ;;  %vm8277_vm3 = vcmask 728064   ;;  %v3757_v37 = vld [vmem:[#allocation2 + $0x1a0] sm:$0xff] }
 0x1b0   :  { %2440 = vst [vmem:[#allocation2 + $0x228] sm:$0xcc] %v2422_v3  ;;  %2577 = vst [vmem:[#allocation2 + $0x268] sm:$0x33] %v2559_v43  ;;  %v8196_v20 = vrot.slane %v7165_v16, 4  ;;  %v1222_v31 = vrot.slane %v7167_v39, 4 }
 0x1b1   :  { %1986 = vrot.lane.b32.xlu0 %v6837_v42, %s5298_s13  ;;  %s8279_s13 = smov 99  }
 0x1b2   :  { %2124 = vrot.lane.b32.xlu1 %v2107_v12, %s8264_s27  ;;  %v2696_v1 = vsel %vm125_vm0, %v2681_v0, %v8196_v20  ;;  %v1235_v32 = vsel %vm125_vm0, %v1221_v24, %v1222_v31 }
 0x1b3   :  { %v2697_v38 = vsel %vm8276_vm1, %v7008_v25, %v2696_v1  ;;  %v1236_v42 = vsel %vm8277_vm3, %v6637_v46, %v1235_v32  ;;  %v7188_v45 = vpop.permute.xlu0 %1347  ;;  %v7190_v41 = vpop.permute.xlu1 %1484  ;;  %v3765_v12 = vld [vmem:[#allocation2 + $0x1e0] sm:$0xff]  ;;  %vm8280_vm1 = vcmask 89088   ;;  %vm8281_vm3 = vcmask 80896  }
 0x1b4   :  { %2715 = vst [vmem:[#allocation2 + $0x268] sm:$0xcc] %v2697_v38  ;;  %1255 = vst [vmem:[#allocation2 + $0x120] sm:$0x33] %v1236_v42  ;;  %v1360_v0 = vrot.slane %v7188_v45, 4  ;;  %v1497_v40 = vrot.slane %v7190_v41, 4  ;;  %v5148_v61 = vcombine.low %v3757_v37, %v3765_v12  ;;  %v5149_v24 = vcombine.high %v3757_v37, %v3765_v12 }
 0x1b5   :  { %663 = vrot.lane.b32.xlu0 %v6990_v11, %s8278_s12  ;;  %v5272_v46 = vld [vmem:[%s8112_s0 + $0x20] ss:$0 sps:$4 sm:$0x33]  }
 0x1b6   :  { %801 = vrot.lane.b32.xlu1 %v6448_v47, %s8279_s13  ;;  %v1373_v25 = vsel %vm125_vm0, %v1359_v19, %v1360_v0  ;;  %v1510_v3 = vsel %vm125_vm0, %v1496_v22, %v1497_v40  ;;  %4645 = vmatprep.subr.bf16.mxu0 %v5149_v24  ;;  %v8282_v22 = vrot.slane %v6663_v8, 4 }
 0x1b7   :  { %v1374_v43 = vsel %vm8280_vm1, %v6639_v23, %v1373_v25  ;;  %v1511_v1 = vsel %vm8281_vm3, %v6661_v54, %v1510_v3  ;;  %v7215_v32 = vpop.permute.xlu0 %1622  ;;  %4646 = vmatpush1.bf16.msra.mxu0 %v5148_v61  ;;  %v7217_v38 = vpop.permute.xlu1 %1761  ;;  %v1336_v23 = vrot.slane %v5272_v46, %v5348_v7  ;;  %v5273_v54 = vld [vmem:[%s8112_s0 + $0x20] ss:$0 sps:$4 sm:$0x33]   ;;  %vm8283_vm1 = vcmask 72704   ;;  %v3774_v3 = vld [vmem:[#allocation2 + $0x228] sm:$0xff] }
 0x1b8   :  { %1393 = vst [vmem:[#allocation2 + $0x120] sm:$0xcc] %v1374_v43  ;;  %1530 = vst [vmem:[#allocation2 + $0x160] sm:$0x33] %v1511_v1  ;;  %v1635_v19 = vrot.slane %v7215_v32, 4  ;;  %v1773_v42 = vrot.slane %v7217_v38, 4 }
 0x1b9   :  { %938 = vrot.lane.b32.xlu0 %v6990_v11, %s8228_s10  ;;  %vm8284_vm3 = vcmask 7168  }
 0x1ba   :  { %1076 = vrot.lane.b32.xlu1 %v6448_v47, %s8229_s11  ;;  %v1648_v37 = vsel %vm125_vm0, %v8282_v22, %v1635_v19  ;;  %v1787_v12 = vsel %vm125_vm0, %v1772_v15, %v1773_v42 }
 0x1bb   :  { %v1649_v61 = vsel %vm8283_vm1, %v6663_v8, %v1648_v37  ;;  %v1788_v24 = vsel %vm8284_vm3, %v7085_v9, %v1787_v12  ;;  %v7243_v46 = vpop.permute.xlu0 %1982  ;;  %v7245_v25 = vpop.permute.xlu1 %2120  ;;  %v3782_v43 = vld [vmem:[#allocation2 + $0x268] sm:$0xff]  ;;  %v1611_v8 = vrot.slane %v5273_v54, %v5348_v7  ;;  %vm8285_vm1 = vcmask 1039360  }
 0x1bc   :  { %1668 = vst [vmem:[#allocation2 + $0x160] sm:$0xcc] %v1649_v61  ;;  %1806 = vst [vmem:[#allocation2 + $0x1a8] sm:$0x33] %v1788_v24  ;;  %v8198_v1 = vrot.slane %v7243_v46, 4  ;;  %v8197_v22 = vrot.slane %v7245_v25, 4  ;;  %v5166_v20 = vcombine.low %v3774_v3, %v3782_v43  ;;  %v5167_v15 = vcombine.high %v3774_v3, %v3782_v43 }
 0x1bd   :  { %1215 = vrot.lane.b32.xlu0 %v7134_v49, %s8265_s29  ;;  %vm8286_vm3 = vcmask 973824  }
 0x1be   :  { %1353 = vrot.lane.b32.xlu1 %v1336_v23, %s8270_s30  ;;  %v2008_v9 = vsel %vm125_vm0, %v1993_v2, %v8198_v1  ;;  %v2146_v37 = vsel %vm125_vm0, %v2131_v30, %v8197_v22  ;;  %4684 = vmatprep.subr.bf16.mxu1 %v5167_v15 }
 0x1bf   :  { %v2009_v12 = vsel %vm8285_vm1, %v7087_v44, %v2008_v9  ;;  %v2147_v23 = vsel %vm8286_vm3, %v7108_v57, %v2146_v37  ;;  %v7267_v54 = vpop.permute.xlu0 %659  ;;  %4685 = vmatpush1.bf16.msra.mxu1 %v5166_v20  ;;  %v7269_v61 = vpop.permute.xlu1 %797  ;;  %v3741_v15 = vld [vmem:[#allocation2 + $0x120] sm:$0xff]  ;;  %vm8289_vm1 = vcmask 728064   ;;  %vm8290_vm3 = vcmask 89088  }
 0x1c0   :  { %2027 = vst [vmem:[#allocation2 + $0x1e8] sm:$0x33] %v2009_v12  ;;  %2165 = vst [vmem:[#allocation2 + $0x1e8] sm:$0xcc] %v2147_v23  ;;  %v672_v2 = vrot.slane %v7267_v54, 4  ;;  %v810_v24 = vrot.slane %v7269_v61, 4 }
 0x1c1   :  { %1490 = vrot.lane.b32.xlu0 %v7134_v49, %s8215_s9  ;;  %v8288_v23 = vrot.slane %v6764_v28, 4 }
 0x1c2   :  { %1628 = vrot.lane.b32.xlu1 %v1611_v8, %s8204_s25  ;;  %v685_v44 = vsel %vm125_vm0, %v671_v18, %v672_v2  ;;  %v823_v57 = vsel %vm125_vm0, %v809_v17, %v810_v24 }
 0x1c3   :  { %v686_v30 = vsel %vm677_vm12, %v6735_v10, %v685_v44  ;;  %v824_v20 = vsel %vm815_vm14, %v6737_v63, %v823_v57  ;;  %v7290_v3 = vpop.permute.xlu0 %934  ;;  %v7292_v43 = vpop.permute.xlu1 %1072  ;;  %v3749_v8 = vld [vmem:[#allocation2 + $0x160] sm:$0xff]  ;;  %v8287_v63 = vrot.slane %v6762_v35, 4 }
 0x1c4   :  { %705 = vst [vmem:[#allocation2 + $0xa0] sm:$0x33] %v686_v30  ;;  %843 = vst [vmem:[#allocation2 + $0xa0] sm:$0xcc] %v824_v20  ;;  %v947_v18 = vrot.slane %v7290_v3, 4  ;;  %v1085_v9 = vrot.slane %v7292_v43, 4  ;;  %v5132_v37 = vcombine.low %v3741_v15, %v3749_v8  ;;  %v5133_v17 = vcombine.high %v3741_v15, %v3749_v8 }
 0x1c5   :  { %112 = vrot.lane.b32.xlu0 %v6990_v11, %s8237_s18  ;;  %v5274_v10 = vld [vmem:[%s8112_s0 + $0x20] ss:$0 sps:$4 sm:$0x33]   ;;  %v3758_v8 = vld [vmem:[#allocation2 + $0x1a8] sm:$0xff] }
 0x1c6   :  { %251 = vrot.lane.b32.xlu1 %v6448_v47, %s8238_s16  ;;  %v960_v12 = vsel %vm125_vm0, %v8287_v63, %v947_v18  ;;  %v1098_v44 = vsel %vm125_vm0, %v8288_v23, %v1085_v9  ;;  %4647 = vmatprep.subr.bf16.mxu0 %v5133_v17 }
 0x1c7   :  { %v961_v57 = vsel %vm952_vm13, %v6762_v35, %v960_v12  ;;  %v1099_v30 = vsel %vm1090_vm8, %v6764_v28, %v1098_v44  ;;  %v7317_v20 = vpop.permute.xlu0 %1211  ;;  %4648 = vmatpush1.bf16.msra.mxu0 %v5132_v37  ;;  %v7319_v15 = vpop.permute.xlu1 %1349  ;;  %v3766_v63 = vld [vmem:[#allocation2 + $0x1e8] sm:$0xff]  ;;  %v786_v35 = vrot.slane %v5274_v10, %v5348_v7  ;;  %v5275_v28 = vld [vmem:[%s8112_s0 + $0x20] ss:$0 sps:$4 sm:$0x33]  }
 0x1c8   :  { %980 = vst [vmem:[#allocation2 + $0xe0] sm:$0x33] %v961_v57  ;;  %1118 = vst [vmem:[#allocation2 + $0xe0] sm:$0xcc] %v1099_v30  ;;  %v1223_v22 = vrot.slane %v7317_v20, 4  ;;  %v1361_v23 = vrot.slane %v7319_v15, 4  ;;  %v5150_v17 = vcombine.low %v3758_v8, %v3766_v63  ;;  %v5151_v1 = vcombine.high %v3758_v8, %v3766_v63 }
 0x1c9   :  { %388 = vrot.lane.b32.xlu0 %v6990_v11, %s8205_s19 }
 0x1ca   :  { %526 = vrot.lane.b32.xlu1 %v6448_v47, %s8206_s17  ;;  %v1237_v37 = vsel %vm125_vm0, %v1222_v31, %v1223_v22  ;;  %v1375_v11 = vsel %vm125_vm0, %v1360_v0, %v1361_v23  ;;  %4686 = vmatprep.subr.bf16.mxu1 %v5151_v1 }
 0x1cb   :  { %v1238_v47 = vsel %vm8289_vm1, %v7167_v39, %v1237_v37  ;;  %v1376_v10 = vsel %vm8290_vm3, %v7188_v45, %v1375_v11  ;;  %v7345_v12 = vpop.permute.xlu0 %1486  ;;  %4687 = vmatpush1.bf16.msra.mxu1 %v5150_v17  ;;  %v7347_v44 = vpop.permute.xlu1 %1624  ;;  %v1061_v39 = vrot.slane %v5275_v28, %v5348_v7  ;;  %v5276_v45 = vld [vmem:[%s8112_s0 + $0x20] ss:$0 sps:$4 sm:$0x33]   ;;  %vm8291_vm1 = vcmask 80896  }
 0x1cc   :  { %1256 = vst [vmem:[#allocation2 + $0x128] sm:$0x33] %v1238_v47  ;;  %1394 = vst [vmem:[#allocation2 + $0x128] sm:$0xcc] %v1376_v10  ;;  %v1498_v31 = vrot.slane %v7345_v12, 4  ;;  %v1636_v57 = vrot.slane %v7347_v44, 4 }
 0x1cd   :  { %665 = vrot.lane.b32.xlu0 %v7134_v49, %s8278_s12  ;;  %vm8292_vm3 = vcmask 72704   ;;  %v8293_v47 = vrot.slane %v6786_v51, 4 }
 0x1ce   :  { %803 = vrot.lane.b32.xlu1 %v786_v35, %s8279_s13  ;;  %v1512_v0 = vsel %vm125_vm0, %v1497_v40, %v1498_v31  ;;  %v1650_v1 = vsel %vm125_vm0, %v1635_v19, %v1636_v57  ;;  %v3725_v35 = vld [vmem:[#allocation2 + $0xa0] sm:$0xff] }
 0x1cf   :  { %v1513_v30 = vsel %vm8291_vm1, %v7190_v41, %v1512_v0  ;;  %v1651_v8 = vsel %vm8292_vm3, %v7215_v32, %v1650_v1  ;;  %v7372_v63 = vpop.permute.xlu0 %108  ;;  %v7374_v17 = vpop.permute.xlu1 %247  ;;  %v3733_v28 = vld [vmem:[#allocation2 + $0xe0] sm:$0xff]  ;;  %v236_v41 = vrot.slane %v5276_v45, %v5348_v7  ;;  %v8294_v0 = vrot.slane %v6788_v21, 4 }
 0x1d0   :  { %1531 = vst [vmem:[#allocation2 + $0x168] sm:$0x33] %v1513_v30  ;;  %1669 = vst [vmem:[#allocation2 + $0x168] sm:$0xcc] %v1651_v8  ;;  %v121_v40 = vrot.slane %v7372_v63, 4  ;;  %v260_v37 = vrot.slane %v7374_v17, 4  ;;  %v5116_v11 = vcombine.low %v3725_v35, %v3733_v28  ;;  %v5117_v19 = vcombine.high %v3725_v35, %v3733_v28 }
 0x1d1   :  { %940 = vrot.lane.b32.xlu0 %v7134_v49, %s8228_s10  ;;  %v5277_v32 = vld [vmem:[%s8112_s0 + $0x20] ss:$0 sps:$4 sm:$0x33]   ;;  %vm8299_vm1 = vcmask 146432   ;;  %vm8301_vm3 = vcmask 138240  }
 0x1d2   :  { %1078 = vrot.lane.b32.xlu1 %v1061_v39, %s8229_s11  ;;  %v135_v10 = vsel %vm125_vm0, %v8293_v47, %v121_v40  ;;  %v273_v1 = vsel %vm125_vm0, %v8294_v0, %v260_v37  ;;  %4649 = vmatprep.subr.bf16.mxu0 %v5117_v19  ;;  %v8296_v19 = vrot.slane %v6812_v29, 4 }
 0x1d3   :  { %v136_v39 = vsel %vm127_vm11, %v6786_v51, %v135_v10  ;;  %v274_v45 = vsel %vm265_vm9, %v6788_v21, %v273_v1  ;;  %v7399_v30 = vpop.permute.xlu0 %384  ;;  %4650 = vmatpush1.bf16.msra.mxu0 %v5116_v11  ;;  %v7401_v8 = vpop.permute.xlu1 %522  ;;  %v511_v51 = vrot.slane %v5277_v32, %v5348_v7  ;;  %v8295_v21 = vrot.slane %v6810_v14, 4  ;;  %v3742_v32 = vld [vmem:[#allocation2 + $0x128] sm:$0xff] }
 0x1d4   :  { %155 = vst [vmem:[#allocation2 + $0x20] sm:$0x33] %v136_v39  ;;  %293 = vst [vmem:[#allocation2 + $0x20] sm:$0xcc] %v274_v45  ;;  %v397_v35 = vrot.slane %v7399_v30, 4  ;;  %v535_v28 = vrot.slane %v7401_v8, 4 }
 0x1d5   :  { %114 = vrot.lane.b32.xlu0 %v7134_v49, %s8237_s18 }
 0x1d6   :  { %253 = vrot.lane.b32.xlu1 %v236_v41, %s8238_s16  ;;  %v410_v11 = vsel %vm125_vm0, %v8295_v21, %v397_v35  ;;  %v548_v47 = vsel %vm125_vm0, %v8296_v19, %v535_v28 }
 0x1d7   :  { %v411_v10 = vsel %vm402_vm10, %v6810_v14, %v410_v11  ;;  %v549_v41 = vsel %vm540_vm15, %v6812_v29, %v548_v47  ;;  %v7423_v0 = vpop.permute.xlu0 %661  ;;  %v7425_v7 = vpop.permute.xlu1 %799  ;;  %v3750_v1 = vld [vmem:[#allocation2 + $0x168] sm:$0xff] }
 0x1d8   :  { %430 = vst [vmem:[#allocation2 + $0x60] sm:$0x33] %v411_v10  ;;  %568 = vst [vmem:[#allocation2 + $0x60] sm:$0xcc] %v549_v41  ;;  %v673_v39 = vrot.slane %v7423_v0, 4  ;;  %v811_v45 = vrot.slane %v7425_v7, 4  ;;  %v5134_v21 = vcombine.low %v3742_v32, %v3750_v1  ;;  %v5135_v19 = vcombine.high %v3742_v32, %v3750_v1 }
 0x1d9   :  { %390 = vrot.lane.b32.xlu0 %v7134_v49, %s8205_s19 }
 0x1da   :  { %528 = vrot.lane.b32.xlu1 %v511_v51, %s8206_s17  ;;  %v687_v14 = vsel %vm125_vm0, %v672_v2, %v673_v39  ;;  %v825_v29 = vsel %vm125_vm0, %v810_v24, %v811_v45  ;;  %4688 = vmatprep.subr.bf16.mxu1 %v5135_v19  ;;  %v7462_v24 = vpop.f32.mrf.mxu0 }
 0x1db   :  { %v688_v11 = vsel %vm677_vm12, %v7267_v54, %v687_v14  ;;  %v826_v49 = vsel %vm815_vm14, %v7269_v61, %v825_v29  ;;  %v7446_v51 = vpop.permute.xlu0 %936  ;;  %4689 = vmatpush1.bf16.msra.mxu1 %v5134_v21  ;;  %v7448_v47 = vpop.permute.xlu1 %1074  ;;  %v3709_v19 = vld [vmem:[#allocation2 + $0x20] sm:$0xff] }
 0x1dc   :  { %706 = vst [vmem:[#allocation2 + $0xa8] sm:$0x33] %v688_v11  ;;  %844 = vst [vmem:[#allocation2 + $0xa8] sm:$0xcc] %v826_v49  ;;  %v948_v2 = vrot.slane %v7446_v51, 4  ;;  %v8203_v10 = vrot.slane %v7448_v47, 4  ;;  %v7474_v49 = vpop.f32.mrf.mxu0 }
 0x1de   :  { %v962_v54 = vsel %vm125_vm0, %v947_v18, %v948_v2  ;;  %v1100_v61 = vsel %vm125_vm0, %v1085_v9, %v8203_v10 }
 0x1df   :  { %v963_v41 = vsel %vm952_vm13, %v7290_v3, %v962_v54  ;;  %v1101_v32 = vsel %vm1090_vm8, %v7292_v43, %v1100_v61  ;;  %v7468_v1 = vpop.permute.xlu0 %110  ;;  %v7470_v21 = vpop.permute.xlu1 %249  ;;  %v3717_v18 = vld [vmem:[#allocation2 + $0x60] sm:$0xff] }
 0x1e0   :  { %981 = vst [vmem:[#allocation2 + $0xe8] sm:$0x33] %v963_v41  ;;  %1119 = vst [vmem:[#allocation2 + $0xe8] sm:$0xcc] %v1101_v32  ;;  %v8202_v14 = vrot.slane %v7468_v1, 4  ;;  %v8201_v9 = vrot.slane %v7470_v21, 4  ;;  %v5100_v29 = vcombine.low %v3709_v19, %v3717_v18  ;;  %v5101_v11 = vcombine.high %v3709_v19, %v3717_v18  ;;  %v4511_v54 = vpop.f32.mrf.mxu0 }
 0x1e2   :  { %v137_v3 = vsel %vm125_vm0, %v121_v40, %v8202_v14  ;;  %v275_v43 = vsel %vm125_vm0, %v260_v37, %v8201_v9  ;;  %4651 = vmatprep.subr.bf16.mxu0 %v5101_v11  ;;  %v4512_v37 = vpop.f32.mrf.mxu0 }
 0x1e3   :  { %v138_v61 = vsel %vm127_vm11, %v7372_v63, %v137_v3  ;;  %v276_v41 = vsel %vm265_vm9, %v7374_v17, %v275_v43  ;;  %v7490_v32 = vpop.permute.xlu0 %386  ;;  %4652 = vmatpush1.bf16.msra.mxu0 %v5100_v29  ;;  %v7492_v19 = vpop.permute.xlu1 %524  ;;  %v7510_v29 = vld [vmem:[%s8113_s1] sm:$0xf]  ;;  %v3726_v54 = vld [vmem:[#allocation2 + $0xa8] sm:$0xff] }
 0x1e4   :  { %156 = vst [vmem:[#allocation2 + $0x28] sm:$0x33] %v138_v61  ;;  %294 = vst [vmem:[#allocation2 + $0x28] sm:$0xcc] %v276_v41  ;;  %v8200_v40 = vrot.slane %v7490_v32, 4  ;;  %v8199_v18 = vrot.slane %v7492_v19, 4  ;;  %4719 = vmatprep.subr.bf16.mxu0 %v6114_v53 }
 0x1e6   :  { %v412_v63 = vsel %vm125_vm0, %v397_v35, %v8200_v40  ;;  %v550_v17 = vsel %vm125_vm0, %v535_v28, %v8199_v18  ;;  %4670 = vmatmul.mubr.bf16.vlgmr.msra.gmra.mxu0 %v7510_v29  ;;  %v7513_v53 = vpop.f32.mrf.mxu1 }
 0x1e7   :  { %v413_v11 = vsel %vm402_vm10, %v7399_v30, %v412_v63  ;;  %v551_v35 = vsel %vm540_vm15, %v7401_v8, %v550_v17  ;;  %v3360_v3 = vpop.permute.xlu0 %3359  ;;  %v7519_v43 = vpop.permute.xlu1 %3497  ;;  %v3734_v28 = vld [vmem:[#allocation2 + $0xe8] sm:$0xff]  ;;  %4720 = vmatpush1.bf16.msra.mxu0 %v6147_v48  ;;  %4751 = vmatprep.mubr.bf16.mxu0 %v6955_v58  ;;  %v8297_v8 = vrot.slane %v6921_v59, 4  ;;  %v8298_v17 = vrot.slane %v6950_v60, 4 }
 0x1e8   :  { %431 = vst [vmem:[#allocation2 + $0x68] sm:$0x33] %v413_v11  ;;  %569 = vst [vmem:[#allocation2 + $0x68] sm:$0xcc] %v551_v35  ;;  %v3370_v61 = vrot.slane %v3360_v3, 4  ;;  %v3508_v41 = vrot.slane %v7519_v43, 4  ;;  %v5118_v37 = vcombine.low %v3726_v54, %v3734_v28  ;;  %v5119_v18 = vcombine.high %v3726_v54, %v3734_v28  ;;  %v7524_v30 = vpop.f32.mrf.mxu1 }
 0x1ea   :  { %v3385_v63 = vsel %vm125_vm0, %v8297_v8, %v3370_v61  ;;  %v3523_v48 = vsel %vm125_vm0, %v8298_v17, %v3508_v41  ;;  %4690 = vmatprep.subr.bf16.mxu1 %v5119_v18  ;;  %v4552_v11 = vpop.f32.mrf.mxu1  ;;  %v8300_v17 = vrot.slane %v6952_v62, 4 }
 0x1eb   :  { %v3386_v35 = vsel %vm3373_vm2, %v6921_v59, %v3385_v63  ;;  %v3524_v54 = vsel %vm8299_vm1, %v6950_v60, %v3523_v48  ;;  %v3635_v28 = vpop.permute.xlu0 %3634  ;;  %4691 = vmatpush1.bf16.msra.mxu1 %v5118_v37  ;;  %v7538_v40 = vpop.permute.xlu1 %2809 }
 0x1ec   :  { %3403 = vst [vmem:[#allocation2 + $0x330] sm:$0x33] %v3386_v35  ;;  %3541 = vst [vmem:[#allocation2 + $0x330] sm:$0xcc] %v3524_v54  ;;  %v3645_v8 = vrot.slane %v3635_v28, 4  ;;  %v2820_v9 = vrot.slane %v7538_v40, 4  ;;  %v4553_v14 = vpop.f32.mrf.mxu1  ;;  %v5219_v35 = vcombine.high %v6955_v58, %v6955_v58 }
 0x1ed   :  { %v3710_v14 = vld [vmem:[#allocation2 + $0x28] sm:$0xff] }
 0x1ee   :  { %v3660_v18 = vsel %vm125_vm0, %v8300_v17, %v3645_v8  ;;  %v2835_v59 = vsel %vm125_vm0, %v2819_v27, %v2820_v9 }
 0x1ef   :  { %v3661_v60 = vsel %vm8301_vm3, %v6952_v62, %v3660_v18  ;;  %v2836_v37 = vsel %vm2823_vm4, %v7033_v36, %v2835_v59  ;;  %v7553_v63 = vpop.permute.xlu0 %2947  ;;  %v3718_v11 = vld [vmem:[#allocation2 + $0x68] sm:$0xff] }
 0x1f0   :  { %v7555_v48 = vpop.permute.xlu1 %3084  ;;  %3678 = vst [vmem:[#allocation2 + $0x370] sm:$0x33] %v3661_v60  ;;  %2853 = vst [vmem:[#allocation2 + $0x2b0] sm:$0x33] %v2836_v37  ;;  %v2958_v54 = vrot.slane %v7553_v63, 4  ;;  %v5102_v17 = vcombine.low %v3710_v14, %v3718_v11  ;;  %v5103_v62 = vcombine.high %v3710_v14, %v3718_v11 }
 0x1f1   :  { %v3095_v27 = vrot.slane %v7555_v48, 4 }
 0x1f2   :  { %v2973_v36 = vsel %vm125_vm0, %v2957_v13, %v2958_v54  ;;  %4692 = vmatprep.subr.bf16.mxu1 %v5103_v62  ;;  %v5218_v13 = vcombine.low %v6955_v58, %v6955_v58 }
 0x1f3   :  { %v3110_v18 = vsel %vm125_vm0, %v3094_v50, %v3095_v27  ;;  %v2974_v59 = vsel %vm2961_vm5, %v7035_v6, %v2973_v36  ;;  %v7575_v37 = vpop.permute.xlu0 %3222  ;;  %4693 = vmatpush1.bf16.msra.mxu1 %v5102_v17  ;;  %v8302_v6 = vrot.slane %v7063_v5, 4 }
 0x1f4   :  { %v3111_v60 = vsel %vm3098_vm6, %v7061_v52, %v3110_v18  ;;  %v3362_v14 = vpop.permute.xlu1 %3361  ;;  %2991 = vst [vmem:[#allocation2 + $0x2b0] sm:$0xcc] %v2974_v59  ;;  %v3233_v11 = vrot.slane %v7575_v37, 4  ;;  %4760 = vmatprep.subr.bf16.mxu1 %v5219_v35  ;;  %v3807_v59 = vld [vmem:[#allocation2 + $0x330] sm:$0xff] }
 0x1f5   :  { %3128 = vst [vmem:[#allocation2 + $0x2f0] sm:$0x33] %v3111_v60  ;;  %v3371_v10 = vrot.slane %v3362_v14, 4 }
 0x1f6   :  { %v3248_v50 = vsel %vm125_vm0, %v8302_v6, %v3233_v11  ;;  %4711 = vmatmul.mubr.bf16.vlgmr.msra.gmra.mxu1 %v7510_v29 }
 0x1f7   :  { %v3387_v52 = vsel %vm125_vm0, %v3370_v61, %v3371_v10  ;;  %v3249_v17 = vsel %vm3236_vm7, %v7063_v5, %v3248_v50  ;;  %v3500_v36 = vpop.permute.xlu0 %3499  ;;  %v3815_v60 = vld [vmem:[#allocation2 + $0x370] sm:$0xff]  ;;  %4761 = vmatpush1.bf16.msra.mxu1 %v5218_v13  ;;  %4792 = vmatprep.mubr.bf16.mxu1 %v6955_v58 }
 0x1f8   :  { %v3388_v62 = vsel %vm3373_vm2, %v3360_v3, %v3387_v52  ;;  %v3637_v18 = vpop.permute.xlu1 %3636  ;;  %3266 = vst [vmem:[#allocation2 + $0x2f0] sm:$0xcc] %v3249_v17  ;;  %v3509_v35 = vrot.slane %v3500_v36, 4  ;;  %v5200_v6 = vcombine.low %v3807_v59, %v3815_v60  ;;  %v5201_v10 = vcombine.high %v3807_v59, %v3815_v60  ;;  %vm8303_vm2 = vmmov %vm8299_vm1 }
 0x1f9   :  { %3404 = vst [vmem:[#allocation2 + $0x338] sm:$0x33] %v3388_v62  ;;  %v3646_v14 = vrot.slane %v3637_v18, 4  ;;  %vm8304_vm1 = vmmov %vm8301_vm3  ;;  %vm8306_vm3 = vcmask 965632  }
 0x1fa   :  { %v3525_v61 = vsel %vm125_vm0, %v3508_v41, %v3509_v35  ;;  %4721 = vmatprep.subr.bf16.mxu0 %v5201_v10  ;;  %v8305_v41 = vrot.slane %v7110_v55, 4 }
 0x1fb   :  { %v3662_v5 = vsel %vm125_vm0, %v3645_v8, %v3646_v14  ;;  %v3526_v3 = vsel %vm8303_vm2, %v7519_v43, %v3525_v61  ;;  %v7598_v50 = vpop.permute.xlu0 %2259  ;;  %4722 = vmatpush1.bf16.msra.mxu0 %v5200_v6  ;;  %vm8307_vm2 = vcmask 957440   ;;  %v3791_v59 = vld [vmem:[#allocation2 + $0x2b0] sm:$0xff] }
 0x1fc   :  { %v3663_v13 = vsel %vm8304_vm1, %v3635_v28, %v3662_v5  ;;  %v7600_v58 = vpop.permute.xlu1 %2397  ;;  %3542 = vst [vmem:[#allocation2 + $0x338] sm:$0xcc] %v3526_v3  ;;  %v2270_v52 = vrot.slane %v7598_v50, 4  ;;  %vm8309_vm1 = vcmask 318464  }
 0x1fd   :  { %3679 = vst [vmem:[#allocation2 + $0x378] sm:$0x33] %v3663_v13  ;;  %v2408_v17 = vrot.slane %v7600_v58, 4 }
 0x1fe   :  { %v2285_v8 = vsel %vm125_vm0, %v8305_v41, %v2270_v52 }
 0x1ff   :  { %v2423_v43 = vsel %vm125_vm0, %v2407_v34, %v2408_v17  ;;  %v2286_v28 = vsel %vm8306_vm3, %v7110_v55, %v2285_v8  ;;  %v7618_v36 = vpop.permute.xlu0 %2534  ;;  %v3799_v60 = vld [vmem:[#allocation2 + $0x2f0] sm:$0xff]  ;;  %vm8310_vm3 = vcmask 310272  }
 0x200   :  { %v2424_v62 = vsel %vm8307_vm2, %v7140_v56, %v2423_v43  ;;  %v7620_v18 = vpop.permute.xlu1 %2672  ;;  %2303 = vst [vmem:[#allocation2 + $0x230] sm:$0x33] %v2286_v28  ;;  %v2545_v35 = vrot.slane %v7618_v36, 4  ;;  %v5184_v6 = vcombine.low %v3791_v59, %v3799_v60  ;;  %v5185_v34 = vcombine.high %v3791_v59, %v3799_v60 }
 0x201   :  { %2441 = vst [vmem:[#allocation2 + $0x230] sm:$0xcc] %v2424_v62  ;;  %v2683_v14 = vrot.slane %v7620_v18, 4  ;;  %v8308_v56 = vrot.slane %v7165_v16, 4 }
 0x202   :  { %v2560_v55 = vsel %vm125_vm0, %v2544_v33, %v2545_v35  ;;  %4723 = vmatprep.subr.bf16.mxu0 %v5185_v34 }
 0x203   :  { %v2698_v10 = vsel %vm125_vm0, %v8308_v56, %v2683_v14  ;;  %v2561_v61 = vsel %vm8309_vm1, %v7142_v26, %v2560_v55  ;;  %v2812_v3 = vpop.permute.xlu0 %2811  ;;  %4724 = vmatpush1.bf16.msra.mxu0 %v5184_v6  ;;  %v3808_v41 = vld [vmem:[#allocation2 + $0x338] sm:$0xff] }
 0x204   :  { %v2699_v5 = vsel %vm8310_vm3, %v7165_v16, %v2698_v10  ;;  %v2950_v13 = vpop.permute.xlu1 %2949  ;;  %v3816_v8 = vld [vmem:[#allocation2 + $0x378] sm:$0xff]  ;;  %2578 = vst [vmem:[#allocation2 + $0x270] sm:$0x33] %v2561_v61  ;;  %v2821_v33 = vrot.slane %v2812_v3, 4 }
 0x205   :  { %2716 = vst [vmem:[#allocation2 + $0x270] sm:$0xcc] %v2699_v5  ;;  %v2959_v43 = vrot.slane %v2950_v13, 4  ;;  %v5202_v28 = vcombine.low %v3808_v41, %v3816_v8  ;;  %v5203_v62 = vcombine.high %v3808_v41, %v3816_v8 }
 0x206   :  { %v2837_v59 = vsel %vm125_vm0, %v2820_v9, %v2821_v33 }
 0x207   :  { %v2975_v26 = vsel %vm125_vm0, %v2958_v54, %v2959_v43  ;;  %4762 = vmatprep.subr.bf16.mxu1 %v5203_v62  ;;  %v2838_v16 = vsel %vm2823_vm4, %v7538_v40, %v2837_v59  ;;  %v3087_v6 = vpop.permute.xlu0 %3086  ;;  %vm8312_vm4 = vcmask 7168  }
 0x208   :  { %v2976_v60 = vsel %vm2961_vm5, %v7553_v63, %v2975_v26  ;;  %4763 = vmatpush1.bf16.msra.mxu1 %v5202_v28  ;;  %v3225_v34 = vpop.permute.xlu1 %3224  ;;  %2854 = vst [vmem:[#allocation2 + $0x2b8] sm:$0x33] %v2838_v16  ;;  %v3096_v55 = vrot.slane %v3087_v6, 4  ;;  %v3775_v5 = vld [vmem:[#allocation2 + $0x230] sm:$0xff]  ;;  %vm8313_vm5 = vcmask 1039360   ;;  %v8314_v26 = vrot.slane %v7245_v25, 4 }
 0x209   :  { %2992 = vst [vmem:[#allocation2 + $0x2b8] sm:$0xcc] %v2976_v60  ;;  %v3234_v56 = vrot.slane %v3225_v34, 4 }
 0x20a   :  { %v3112_v9 = vsel %vm125_vm0, %v3095_v27, %v3096_v55 }
 0x20b   :  { %v3250_v54 = vsel %vm125_vm0, %v3233_v11, %v3234_v56  ;;  %v3113_v40 = vsel %vm3098_vm6, %v7555_v48, %v3112_v9  ;;  %v7658_v10 = vpop.permute.xlu0 %1763  ;;  %vm8315_vm6 = vcmask 973824  }
 0x20c   :  { %v3251_v63 = vsel %vm3236_vm7, %v7575_v37, %v3250_v54  ;;  %v7660_v61 = vpop.permute.xlu1 %1984  ;;  %v3783_v3 = vld [vmem:[#allocation2 + $0x270] sm:$0xff]  ;;  %3129 = vst [vmem:[#allocation2 + $0x2f8] sm:$0x33] %v3113_v40  ;;  %v1774_v27 = vrot.slane %v7658_v10, 4  ;;  %v8311_v37 = vrot.slane %v7243_v46, 4  ;;  %vm8316_vm7 = vcmask 965632  }
 0x20d   :  { %3267 = vst [vmem:[#allocation2 + $0x2f8] sm:$0xcc] %v3251_v63  ;;  %v1995_v13 = vrot.slane %v7660_v61, 4  ;;  %v5168_v41 = vcombine.low %v3775_v5, %v3783_v3  ;;  %v5169_v11 = vcombine.high %v3775_v5, %v3783_v3 }
 0x20e   :  { %v1789_v48 = vsel %vm125_vm0, %v1773_v42, %v1774_v27 }
 0x20f   :  { %v2010_v8 = vsel %vm125_vm0, %v8311_v37, %v1995_v13  ;;  %4725 = vmatprep.subr.bf16.mxu0 %v5169_v11  ;;  %v1790_v33 = vsel %vm8312_vm4, %v7217_v38, %v1789_v48  ;;  %v7678_v28 = vpop.permute.xlu0 %2122  ;;  %vm8317_vm4 = vcmask 728064  }
 0x210   :  { %v2011_v43 = vsel %vm8313_vm5, %v7243_v46, %v2010_v8  ;;  %4726 = vmatpush1.bf16.msra.mxu0 %v5168_v41  ;;  %v2262_v62 = vpop.permute.xlu1 %2261  ;;  %1807 = vst [vmem:[#allocation2 + $0x1b0] sm:$0x33] %v1790_v33  ;;  %v2133_v42 = vrot.slane %v7678_v28, 4  ;;  %v3792_v55 = vld [vmem:[#allocation2 + $0x2b8] sm:$0xff]  ;;  %vm8318_vm5 = vcmask 89088  }
 0x211   :  { %2028 = vst [vmem:[#allocation2 + $0x1f0] sm:$0x33] %v2011_v43  ;;  %v2271_v59 = vrot.slane %v2262_v62, 4 }
 0x212   :  { %v2148_v16 = vsel %vm125_vm0, %v8314_v26, %v2133_v42 }
 0x213   :  { %v2287_v38 = vsel %vm125_vm0, %v2270_v52, %v2271_v59  ;;  %v2149_v46 = vsel %vm8315_vm6, %v7245_v25, %v2148_v16  ;;  %v2400_v6 = vpop.permute.xlu0 %2399  ;;  %vm8319_vm6 = vcmask 80896  }
 0x214   :  { %v2288_v60 = vsel %vm8316_vm7, %v7598_v50, %v2287_v38  ;;  %v2537_v34 = vpop.permute.xlu1 %2536  ;;  %v3800_v56 = vld [vmem:[#allocation2 + $0x2f8] sm:$0xff]  ;;  %2166 = vst [vmem:[#allocation2 + $0x1f0] sm:$0xcc] %v2149_v46  ;;  %v2409_v9 = vrot.slane %v2400_v6, 4  ;;  %vm8320_vm7 = vcmask 72704  }
 0x215   :  { %2304 = vst [vmem:[#allocation2 + $0x238] sm:$0x33] %v2288_v60  ;;  %v2546_v54 = vrot.slane %v2537_v34, 4  ;;  %v5186_v40 = vcombine.low %v3792_v55, %v3800_v56  ;;  %v5187_v63 = vcombine.high %v3792_v55, %v3800_v56 }
 0x216   :  { %v2425_v52 = vsel %vm125_vm0, %v2408_v17, %v2409_v9 }
 0x217   :  { %v2562_v25 = vsel %vm125_vm0, %v2545_v35, %v2546_v54  ;;  %4764 = vmatprep.subr.bf16.mxu1 %v5187_v63  ;;  %v2426_v50 = vsel %vm8307_vm2, %v7600_v58, %v2425_v52  ;;  %v2675_v3 = vpop.permute.xlu0 %2674  ;;  %v3759_v33 = vld [vmem:[#allocation2 + $0x1b0] sm:$0xff]  ;;  %vm8321_vm2 = vcmask 7168  }
 0x218   :  { %v2563_v5 = vsel %vm8309_vm1, %v7618_v36, %v2562_v25  ;;  %4765 = vmatpush1.bf16.msra.mxu1 %v5186_v40  ;;  %v7703_v41 = vpop.permute.xlu1 %1213  ;;  %2442 = vst [vmem:[#allocation2 + $0x238] sm:$0xcc] %v2426_v50  ;;  %v2684_v11 = vrot.slane %v2675_v3, 4  ;;  %vm8322_vm1 = vcmask 1039360  }
 0x219   :  { %2579 = vst [vmem:[#allocation2 + $0x278] sm:$0x33] %v2563_v5  ;;  %v1224_v17 = vrot.slane %v7703_v41, 4 }
 0x21a   :  { %v2700_v35 = vsel %vm125_vm0, %v2683_v14, %v2684_v11 }
 0x21b   :  { %v1239_v58 = vsel %vm125_vm0, %v1223_v22, %v1224_v17  ;;  %v2701_v36 = vsel %vm8310_vm3, %v7620_v18, %v2700_v35  ;;  %v7718_v37 = vpop.permute.xlu0 %1351  ;;  %v3767_v43 = vld [vmem:[#allocation2 + $0x1f0] sm:$0xff]  ;;  %vm8323_vm3 = vcmask 973824  }
 0x21c   :  { %v1240_v48 = vsel %vm8317_vm4, %v7317_v20, %v1239_v58  ;;  %v7720_v8 = vpop.permute.xlu1 %1488  ;;  %2717 = vst [vmem:[#allocation2 + $0x278] sm:$0xcc] %v2701_v36  ;;  %v1362_v14 = vrot.slane %v7718_v37, 4  ;;  %v5152_v59 = vcombine.low %v3759_v33, %v3767_v43  ;;  %v5153_v22 = vcombine.high %v3759_v33, %v3767_v43 }
 0x21d   :  { %1257 = vst [vmem:[#allocation2 + $0x130] sm:$0x33] %v1240_v48  ;;  %v1499_v62 = vrot.slane %v7720_v8, 4 }
 0x21e   :  { %v1377_v20 = vsel %vm125_vm0, %v1361_v23, %v1362_v14  ;;  %4727 = vmatprep.subr.bf16.mxu0 %v5153_v22 }
 0x21f   :  { %v1514_v18 = vsel %vm125_vm0, %v1498_v31, %v1499_v62  ;;  %v1378_v26 = vsel %vm8318_vm5, %v7319_v15, %v1377_v20  ;;  %v7738_v38 = vpop.permute.xlu0 %1626  ;;  %4728 = vmatpush1.bf16.msra.mxu0 %v5152_v59  ;;  %v3776_v56 = vld [vmem:[#allocation2 + $0x238] sm:$0xff] }
 0x220   :  { %v1515_v16 = vsel %vm8319_vm6, %v7345_v12, %v1514_v18  ;;  %v1766_v46 = vpop.permute.xlu1 %1765  ;;  %1395 = vst [vmem:[#allocation2 + $0x130] sm:$0xcc] %v1378_v26  ;;  %v1637_v23 = vrot.slane %v7738_v38, 4 }
 0x221   :  { %1532 = vst [vmem:[#allocation2 + $0x170] sm:$0x33] %v1515_v16  ;;  %v1775_v60 = vrot.slane %v1766_v46, 4 }
 0x222   :  { %v1652_v31 = vsel %vm125_vm0, %v1636_v57, %v1637_v23 }
 0x223   :  { %v1791_v15 = vsel %vm125_vm0, %v1774_v27, %v1775_v60  ;;  %v1653_v12 = vsel %vm8320_vm7, %v7347_v44, %v1652_v31  ;;  %v1987_v34 = vpop.permute.xlu0 %1986  ;;  %v3784_v9 = vld [vmem:[#allocation2 + $0x278] sm:$0xff] }
 0x224   :  { %v1792_v6 = vsel %vm8321_vm2, %v7658_v10, %v1791_v15  ;;  %v2125_v55 = vpop.permute.xlu1 %2124  ;;  %1670 = vst [vmem:[#allocation2 + $0x170] sm:$0xcc] %v1653_v12  ;;  %v1996_v54 = vrot.slane %v1987_v34, 4  ;;  %v5170_v63 = vcombine.low %v3776_v56, %v3784_v9  ;;  %v5171_v57 = vcombine.high %v3776_v56, %v3784_v9 }
 0x225   :  { %1808 = vst [vmem:[#allocation2 + $0x1b8] sm:$0x33] %v1792_v6  ;;  %v2134_v40 = vrot.slane %v2125_v55, 4 }
 0x226   :  { %v2012_v27 = vsel %vm125_vm0, %v1995_v13, %v1996_v54  ;;  %4766 = vmatprep.subr.bf16.mxu1 %v5171_v57 }
 0x227   :  { %v2150_v44 = vsel %vm125_vm0, %v2133_v42, %v2134_v40  ;;  %v2013_v10 = vsel %vm8322_vm1, %v7660_v61, %v2012_v27  ;;  %v7763_v25 = vpop.permute.xlu0 %663  ;;  %4767 = vmatpush1.bf16.msra.mxu1 %v5170_v63  ;;  %v3743_v58 = vld [vmem:[#allocation2 + $0x130] sm:$0xff] }
 0x228   :  { %v2151_v52 = vsel %vm8323_vm3, %v7678_v28, %v2150_v44  ;;  %v7765_v50 = vpop.permute.xlu1 %801  ;;  %2029 = vst [vmem:[#allocation2 + $0x1f8] sm:$0x33] %v2013_v10  ;;  %v674_v13 = vrot.slane %v7763_v25, 4  ;;  %v8325_v44 = vrot.slane %v7468_v1, 4 }
 0x229   :  { %2167 = vst [vmem:[#allocation2 + $0x1f8] sm:$0xcc] %v2151_v52  ;;  %v812_v5 = vrot.slane %v7765_v50, 4 }
 0x22a   :  { %v689_v61 = vsel %vm125_vm0, %v673_v39, %v674_v13 }
 0x22b   :  { %v827_v28 = vsel %vm125_vm0, %v811_v45, %v812_v5  ;;  %v690_v42 = vsel %vm677_vm12, %v7423_v0, %v689_v61  ;;  %v7783_v11 = vpop.permute.xlu0 %938  ;;  %v3751_v36 = vld [vmem:[#allocation2 + $0x170] sm:$0xff] }
 0x22c   :  { %v828_v3 = vsel %vm815_vm14, %v7425_v7, %v827_v28  ;;  %v7785_v35 = vpop.permute.xlu1 %1076  ;;  %707 = vst [vmem:[#allocation2 + $0xb0] sm:$0x33] %v690_v42  ;;  %v949_v39 = vrot.slane %v7783_v11, 4  ;;  %v5136_v33 = vcombine.low %v3743_v58, %v3751_v36  ;;  %v5137_v45 = vcombine.high %v3743_v58, %v3751_v36  ;;  %v3760_v26 = vld [vmem:[#allocation2 + $0x1b8] sm:$0xff] }
 0x22d   :  { %845 = vst [vmem:[#allocation2 + $0xb0] sm:$0xcc] %v828_v3  ;;  %v1087_v48 = vrot.slane %v7785_v35, 4  ;;  %v8324_v7 = vrot.slane %v7448_v47, 4  ;;  %v8327_v36 = vrot.slane %v7490_v32, 4 }
 0x22e   :  { %v964_v0 = vsel %vm125_vm0, %v948_v2, %v949_v39  ;;  %4729 = vmatprep.subr.bf16.mxu0 %v5137_v45 }
 0x22f   :  { %v1102_v43 = vsel %vm125_vm0, %v8324_v7, %v1087_v48  ;;  %v965_v59 = vsel %vm952_vm13, %v7446_v51, %v964_v0  ;;  %v1216_v20 = vpop.permute.xlu0 %1215  ;;  %4730 = vmatpush1.bf16.msra.mxu0 %v5136_v33 }
 0x230   :  { %v1103_v22 = vsel %vm1090_vm8, %v7448_v47, %v1102_v43  ;;  %v1354_v18 = vpop.permute.xlu1 %1353  ;;  %v3768_v16 = vld [vmem:[#allocation2 + $0x1f8] sm:$0xff]  ;;  %982 = vst [vmem:[#allocation2 + $0xf0] sm:$0x33] %v965_v59  ;;  %v1225_v2 = vrot.slane %v1216_v20, 4 }
 0x231   :  { %1120 = vst [vmem:[#allocation2 + $0xf0] sm:$0xcc] %v1103_v22  ;;  %v1363_v46 = vrot.slane %v1354_v18, 4  ;;  %v5154_v60 = vcombine.low %v3760_v26, %v3768_v16  ;;  %v5155_v31 = vcombine.high %v3760_v26, %v3768_v16 }
 0x232   :  { %v1241_v15 = vsel %vm125_vm0, %v1224_v17, %v1225_v2 }
 0x233   :  { %v1379_v51 = vsel %vm125_vm0, %v1362_v14, %v1363_v46  ;;  %4768 = vmatprep.subr.bf16.mxu1 %v5155_v31  ;;  %v1242_v47 = vsel %vm8317_vm4, %v7703_v41, %v1241_v15  ;;  %v1491_v6 = vpop.permute.xlu0 %1490 }
 0x234   :  { %v1380_v12 = vsel %vm8318_vm5, %v7718_v37, %v1379_v51  ;;  %4769 = vmatpush1.bf16.msra.mxu1 %v5154_v60  ;;  %v1629_v34 = vpop.permute.xlu1 %1628  ;;  %1258 = vst [vmem:[#allocation2 + $0x138] sm:$0x33] %v1242_v47  ;;  %v1500_v55 = vrot.slane %v1491_v6, 4  ;;  %v3727_v40 = vld [vmem:[#allocation2 + $0xb0] sm:$0xff] }
 0x235   :  { %1396 = vst [vmem:[#allocation2 + $0x138] sm:$0xcc] %v1380_v12  ;;  %v1638_v56 = vrot.slane %v1629_v34, 4 }
 0x236   :  { %v1516_v17 = vsel %vm125_vm0, %v1499_v62, %v1500_v55 }
 0x237   :  { %v1654_v14 = vsel %vm125_vm0, %v1637_v23, %v1638_v56  ;;  %v1517_v41 = vsel %vm8319_vm6, %v7720_v8, %v1516_v17  ;;  %v7823_v9 = vpop.permute.xlu0 %112 }
 0x238   :  { %v1655_v37 = vsel %vm8320_vm7, %v7738_v38, %v1654_v14  ;;  %v7825_v54 = vpop.permute.xlu1 %251  ;;  %v3735_v63 = vld [vmem:[#allocation2 + $0xf0] sm:$0xff]  ;;  %1533 = vst [vmem:[#allocation2 + $0x178] sm:$0x33] %v1517_v41  ;;  %v123_v62 = vrot.slane %v7823_v9, 4  ;;  %v8326_v38 = vrot.slane %v7470_v21, 4 }
 0x239   :  { %1671 = vst [vmem:[#allocation2 + $0x178] sm:$0xcc] %v1655_v37  ;;  %v262_v57 = vrot.slane %v7825_v54, 4  ;;  %v5120_v27 = vcombine.low %v3727_v40, %v3735_v63  ;;  %v5121_v23 = vcombine.high %v3727_v40, %v3735_v63 }
 0x23a   :  { %v139_v8 = vsel %vm125_vm0, %v8325_v44, %v123_v62 }
 0x23b   :  { %v277_v10 = vsel %vm125_vm0, %v8326_v38, %v262_v57  ;;  %4731 = vmatprep.subr.bf16.mxu0 %v5121_v23  ;;  %v140_v52 = vsel %vm127_vm11, %v7468_v1, %v139_v8  ;;  %v7839_v28 = vpop.permute.xlu0 %388  ;;  %v8328_v1 = vrot.slane %v7492_v19, 4 }
 0x23c   :  { %v278_v61 = vsel %vm265_vm9, %v7470_v21, %v277_v10  ;;  %4732 = vmatpush1.bf16.msra.mxu0 %v5120_v27  ;;  %v7841_v42 = vpop.permute.xlu1 %526  ;;  %157 = vst [vmem:[#allocation2 + $0x30] sm:$0x33] %v140_v52  ;;  %v399_v3 = vrot.slane %v7839_v28, 4  ;;  %v3744_v22 = vld [vmem:[#allocation2 + $0x138] sm:$0xff] }
 0x23d   :  { %295 = vst [vmem:[#allocation2 + $0x30] sm:$0xcc] %v278_v61  ;;  %v537_v58 = vrot.slane %v7841_v42, 4 }
 0x23e   :  { %v414_v33 = vsel %vm125_vm0, %v8327_v36, %v399_v3 }
 0x23f   :  { %v552_v45 = vsel %vm125_vm0, %v8328_v1, %v537_v58  ;;  %v7851_v21 = vpop.f32.mrf.mxu0  ;;  %v415_v0 = vsel %vm402_vm10, %v7490_v32, %v414_v33  ;;  %v666_v43 = vpop.permute.xlu0 %665 }
 0x240   :  { %v553_v7 = vsel %vm540_vm15, %v7492_v19, %v552_v45  ;;  %v804_v59 = vpop.permute.xlu1 %803  ;;  %v3752_v20 = vld [vmem:[#allocation2 + $0x178] sm:$0xff]  ;;  %432 = vst [vmem:[#allocation2 + $0x70] sm:$0x33] %v415_v0  ;;  %v675_v18 = vrot.slane %v666_v43, 4 }
 0x241   :  { %570 = vst [vmem:[#allocation2 + $0x70] sm:$0xcc] %v553_v7  ;;  %v813_v26 = vrot.slane %v804_v59, 4  ;;  %v5138_v16 = vcombine.low %v3744_v22, %v3752_v20  ;;  %v5139_v2 = vcombine.high %v3744_v22, %v3752_v20  ;;  %v7857_v46 = vpop.f32.mrf.mxu0 }
 0x242   :  { %v691_v60 = vsel %vm125_vm0, %v674_v13, %v675_v18 }
 0x243   :  { %v829_v32 = vsel %vm125_vm0, %v812_v5, %v813_v26  ;;  %4770 = vmatprep.subr.bf16.mxu1 %v5139_v2  ;;  %v4593_v19 = vpop.f32.mrf.mxu0  ;;  %v692_v31 = vsel %vm677_vm12, %v7763_v25, %v691_v60  ;;  %v941_v51 = vpop.permute.xlu0 %940  ;;  %v4811_v2 = vsub.s32 1, %v5345_v4 }
 0x244   :  { %v830_v15 = vsel %vm815_vm14, %v7765_v50, %v829_v32  ;;  %4771 = vmatpush1.bf16.msra.mxu1 %v5138_v16  ;;  %v1079_v47 = vpop.permute.xlu1 %1078  ;;  %708 = vst [vmem:[#allocation2 + $0xb8] sm:$0x33] %v692_v31  ;;  %v950_v12 = vrot.slane %v941_v51, 4  ;;  %v3711_v17 = vld [vmem:[#allocation2 + $0x30] sm:$0xff]  ;;  %v4807_v16 = vsub.s32 0, %v5345_v4  ;;  %v4815_v19 = vsub.s32 2, %v5345_v4 }
 0x245   :  { %846 = vst [vmem:[#allocation2 + $0xb8] sm:$0xcc] %v830_v15  ;;  %v1088_v6 = vrot.slane %v1079_v47, 4  ;;  %v4594_v13 = vpop.f32.mrf.mxu0  ;;  %v4819_v47 = vsub.s32 3, %v5345_v4 }
 0x246   :  { %v966_v5 = vsel %vm125_vm0, %v949_v39, %v950_v12 }
 0x247   :  { %v1104_v34 = vsel %vm125_vm0, %v1087_v48, %v1088_v6  ;;  %v967_v25 = vsel %vm952_vm13, %v7783_v11, %v966_v5  ;;  %v115_v55 = vpop.permute.xlu0 %114  ;;  %v4823_v5 = vsub.s32 4, %v5345_v4 }
 0x248   :  { %v1105_v50 = vsel %vm1090_vm8, %v7785_v35, %v1104_v34  ;;  %v254_v56 = vpop.permute.xlu1 %253  ;;  %v3719_v14 = vld [vmem:[#allocation2 + $0x70] sm:$0xff]  ;;  %983 = vst [vmem:[#allocation2 + $0xf8] sm:$0x33] %v967_v25  ;;  %v124_v41 = vrot.slane %v115_v55, 4  ;;  %v4827_v55 = vsub.s32 5, %v5345_v4 }
 0x249   :  { %1121 = vst [vmem:[#allocation2 + $0xf8] sm:$0xcc] %v1105_v50  ;;  %v263_v37 = vrot.slane %v254_v56, 4  ;;  %v5104_v40 = vcombine.low %v3711_v17, %v3719_v14  ;;  %v5105_v39 = vcombine.high %v3711_v17, %v3719_v14 }
 0x24a   :  { %v141_v63 = vsel %vm125_vm0, %v123_v62, %v124_v41  ;;  %v4831_v41 = vsub.s32 6, %v5345_v4 }
 0x24b   :  { %v279_v48 = vsel %vm125_vm0, %v262_v57, %v263_v37  ;;  %4733 = vmatprep.subr.bf16.mxu0 %v5105_v39  ;;  %v142_v11 = vsel %vm127_vm11, %v7823_v9, %v141_v63  ;;  %v391_v27 = vpop.permute.xlu0 %390  ;;  %v4835_v63 = vsub.s32 7, %v5345_v4 }
 0x24c   :  { %v280_v35 = vsel %vm265_vm9, %v7825_v54, %v279_v48  ;;  %4734 = vmatpush1.bf16.msra.mxu0 %v5104_v40  ;;  %v529_v23 = vpop.permute.xlu1 %528  ;;  %158 = vst [vmem:[#allocation2 + $0x38] sm:$0x33] %v142_v11  ;;  %v400_v44 = vrot.slane %v391_v27, 4  ;;  %v3728_v10 = vld [vmem:[#allocation2 + $0xb8] sm:$0xff]  ;;  %v4802_v27 = vld [vmem:[%s8114_s2 + $0x8] sm:$0xff] }
 0x24d   :  { %296 = vst [vmem:[#allocation2 + $0x38] sm:$0xcc] %v280_v35  ;;  %v538_v8 = vrot.slane %v529_v23, 4 }
 0x24e   :  { %v416_v38 = vsel %vm125_vm0, %v399_v3, %v400_v44  ;;  %v7888_v57 = vpop.f32.mrf.mxu1 }
 0x24f   :  { %v554_v62 = vsel %vm125_vm0, %v537_v58, %v538_v8  ;;  %4752 = vmatmul.mubr.bf16.vlgmr.msra.gmra.mxu0 %v7510_v29  ;;  %v417_v9 = vsel %vm402_vm10, %v7839_v28, %v416_v38  ;;  %v7951_v8 = vrot.slane %v4802_v27, %v4807_v16 }
 0x250   :  { %v555_v54 = vsel %vm540_vm15, %v7841_v42, %v554_v62  ;;  %v3736_v52 = vld [vmem:[#allocation2 + $0xf8] sm:$0xff]  ;;  %433 = vst [vmem:[#allocation2 + $0x78] sm:$0x33] %v417_v9  ;;  %v7894_v33 = vpop.f32.mrf.mxu1  ;;  %v7955_v62 = vrot.slane %v4802_v27, %v4811_v2 }
 0x251   :  { %571 = vst [vmem:[#allocation2 + $0x78] sm:$0xcc] %v555_v54  ;;  %v5122_v61 = vcombine.low %v3728_v10, %v3736_v52  ;;  %v5123_v36 = vcombine.high %v3728_v10, %v3736_v52  ;;  %v7959_v10 = vrot.slane %v4802_v27, %v4815_v19 }
 0x252   :  { %v4634_v3 = vpop.f32.mrf.mxu1 }
 0x253   :  { %4772 = vmatprep.subr.bf16.mxu1 %v5123_v36 }
 0x254   :  { %4773 = vmatpush1.bf16.msra.mxu1 %v5122_v61  ;;  %v4635_v58 = vpop.f32.mrf.mxu1  ;;  %v3712_v1 = vld [vmem:[#allocation2 + $0x38] sm:$0xff] }
 0x255   :  { %v7967_v58 = vrot.slane %v4802_v27, %v4819_v47 }
 0x258   :  { %v3720_v45 = vld [vmem:[#allocation2 + $0x78] sm:$0xff] }
 0x259   :  { %v5106_v0 = vcombine.low %v3712_v1, %v3720_v45  ;;  %v5107_v7 = vcombine.high %v3712_v1, %v3720_v45  ;;  %v7969_v45 = vrot.slane %v4802_v27, %v4823_v5 }
 0x25b   :  { %4774 = vmatprep.subr.bf16.mxu1 %v5107_v7 }
 0x25c   :  { %4775 = vmatpush1.bf16.msra.mxu1 %v5106_v0 }
 0x25f   :  { %4793 = vmatmul.mubr.bf16.vlgmr.msra.gmra.mxu1 %v7510_v29  ;;  %v4801_v29 = vld [vmem:[%s8114_s2] sm:$0xff] }
 0x260   :  { %v7910_v60 = vrot.slane %v4801_v29, %v4807_v16  ;;  %v7912_v32 = vrot.slane %v4801_v29, %v4811_v2  ;;  %v7919_v51 = vrot.slane %v4801_v29, %v4815_v19  ;;  %v7924_v13 = vrot.slane %v4801_v29, %v4819_v47 }
 0x261   :  { %v7929_v50 = vrot.slane %v4801_v29, %v4823_v5  ;;  %v7934_v14 = vrot.slane %v4801_v29, %v4827_v55  ;;  %v7939_v39 = vrot.slane %v4801_v29, %v4831_v41  ;;  %v7944_v35 = vrot.slane %v4801_v29, %v4835_v63 }
 0x262   :  { %v4885_v31 = vmul.f32 %v7910_v60, %v7462_v24  ;;  %v4886_v15 = vmul.f32 %v7912_v32, %v7474_v49  ;;  %v4887_v6 = vmul.f32 %v7919_v51, %v7513_v53  ;;  %v4888_v25 = vmul.f32 %v7924_v13, %v7524_v30 }
 0x263   :  { %v4889_v17 = vmul.f32 %v7929_v50, %v7851_v21  ;;  %v4890_v40 = vmul.f32 %v7934_v14, %v7857_v46  ;;  %v4891_v11 = vmul.f32 %v7939_v39, %v7888_v57  ;;  %v4892_v44 = vmul.f32 %v7944_v35, %v7894_v33 }
 0x264   :  { %v4901_v12 = vadd.f32 %v4886_v15, %v4885_v31  ;;  %v7979_v29 = vrot.slane %v4802_v27, %v4831_v41  ;;  %v7981_v19 = vrot.slane %v4802_v27, %v4835_v63 }
 0x266   :  { %v4902_v34 = vadd.f32 %v4901_v12, %v4887_v6 }
 0x268   :  { %v4903_v56 = vadd.f32 %v4902_v34, %v4888_v25 }
 0x26a   :  { %v4904_v37 = vadd.f32 %v4903_v56, %v4889_v17 }
 0x26c   :  { %v4905_v48 = vadd.f32 %v4904_v37, %v4890_v40 }
 0x26e   :  { %v4906_v23 = vadd.f32 %v4905_v48, %v4891_v11 }
 0x270   :  { %v4907_v38 = vadd.f32 %v4906_v23, %v4892_v44 }
 0x2a6   :  { %v7897_v28 = vpop.f32.mrf.mxu0 }
 0x2a7   :  { %v4893_v4 = vmul.f32 %v7951_v8, %v7897_v28 }
 0x2a8   :  { %v7899_v42 = vpop.f32.mrf.mxu0 }
 0x2a9   :  { %v4908_v9 = vadd.f32 %v4907_v38, %v4893_v4  ;;  %v4894_v54 = vmul.f32 %v7955_v62, %v7899_v42 }
 0x2aa   :  { %v4675_v43 = vpop.f32.mrf.mxu0 }
 0x2ab   :  { %v4909_v36 = vadd.f32 %v4908_v9, %v4894_v54 }
 0x2ac   :  { %v4676_v59 = vpop.f32.mrf.mxu0 }
 0x2b6   :  { %v7901_v22 = vpop.f32.mrf.mxu1 }
 0x2b7   :  { %v4895_v3 = vmul.f32 %v7959_v10, %v7901_v22 }
 0x2b8   :  { %v7903_v20 = vpop.f32.mrf.mxu1 }
 0x2b9   :  { %v4910_v7 = vadd.f32 %v4909_v36, %v4895_v3  ;;  %v4896_v43 = vmul.f32 %v7967_v58, %v7903_v20 }
 0x2ba   :  { %v4716_v18 = vpop.f32.mrf.mxu1 }
 0x2bb   :  { %v7975_v18 = vrot.slane %v4802_v27, %v4827_v55 }
 0x2bc   :  { %v4717_v26 = vpop.f32.mrf.mxu1 }
 0x2bd   :  { %v4911_v26 = vadd.f32 %v4910_v7, %v4896_v43 }
 0x30f   :  { %v7961_v52 = vpop.f32.mrf.mxu0 }
 0x310   :  { %v4897_v59 = vmul.f32 %v7969_v45, %v7961_v52 }
 0x311   :  { %v7963_v61 = vpop.f32.mrf.mxu0 }
 0x312   :  { %v4912_v16 = vadd.f32 %v4911_v26, %v4897_v59  ;;  %v4898_v2 = vmul.f32 %v7975_v18, %v7963_v61 }
 0x313   :  { %v4757_v1 = vpop.f32.mrf.mxu0 }
 0x314   :  { %v4913_v15 = vadd.f32 %v4912_v16, %v4898_v2 }
 0x315   :  { %v4758_v0 = vpop.f32.mrf.mxu0 }
 0x31f   :  { %v7983_v31 = vpop.f32.mrf.mxu1 }
 0x320   :  { %v4899_v47 = vmul.f32 %v7979_v29, %v7983_v31 }
 0x321   :  { %v7987_v12 = vpop.f32.mrf.mxu1 }
 0x322   :  { %v4914_v6 = vadd.f32 %v4913_v15, %v4899_v47  ;;  %v4900_v5 = vmul.f32 %v7981_v19, %v7987_v12 }
 0x323   :  { %v4798_v34 = vpop.f32.mrf.mxu1 }
 0x324   :  { %v4915_v25 = vadd.f32 %v4914_v6, %v4900_v5 }
 0x325   :  { %v4799_v55 = vpop.f32.mrf.mxu1 }
 0x326   :  { %4916 = vadd.xlane.f32.xlu0 %v4915_v25 }
 0x3af   :  { %v4917_v56 = vpop.xlane.xlu0 %4916 }
 0x3b0   :  { %v7991_v17 = vmul.f32 0.0009765625, %v4917_v56 }
 0x3b2   :  { %v4919_v41 = vsub.f32 %v7462_v24, %v7991_v17  ;;  %v4920_v37 = vsub.f32 %v7474_v49, %v7991_v17  ;;  %v4921_v40 = vsub.f32 %v7513_v53, %v7991_v17  ;;  %v4922_v11 = vsub.f32 %v7524_v30, %v7991_v17 }
 0x3b3   :  { %v4923_v27 = vsub.f32 %v7851_v21, %v7991_v17  ;;  %v4924_v4 = vsub.f32 %v7857_v46, %v7991_v17  ;;  %v4926_v3 = vsub.f32 %v7894_v33, %v7991_v17  ;;  %v4927_v7 = vsub.f32 %v7897_v28, %v7991_v17 }
 0x3b4   :  { %v4935_v63 = vmul.f32 %v4919_v41, %v7910_v60  ;;  %v4936_v48 = vmul.f32 %v4920_v37, %v7912_v32  ;;  %v4937_v23 = vmul.f32 %v4921_v40, %v7919_v51  ;;  %v4938_v9 = vmul.f32 %v4922_v11, %v7924_v13 }
 0x3b5   :  { %v4925_v60 = vsub.f32 %v7888_v57, %v7991_v17  ;;  %v4939_v32 = vmul.f32 %v4923_v27, %v7929_v50  ;;  %v4940_v1 = vmul.f32 %v4924_v4, %v7934_v14  ;;  %v4928_v26 = vsub.f32 %v7899_v42, %v7991_v17 }
 0x3b6   :  { %v4951_v44 = vmul.f32 %v4935_v63, %v4935_v63  ;;  %v4952_v38 = vmul.f32 %v4936_v48, %v4936_v48  ;;  %v4953_v54 = vmul.f32 %v4937_v23, %v4937_v23  ;;  %v4954_v51 = vmul.f32 %v4938_v9, %v4938_v9 }
 0x3b7   :  { %v4941_v43 = vmul.f32 %v4925_v60, %v7939_v39  ;;  %v4955_v13 = vmul.f32 %v4939_v32, %v4939_v32  ;;  %v4942_v50 = vmul.f32 %v4926_v3, %v7944_v35  ;;  %v4956_v16 = vmul.f32 %v4940_v1, %v4940_v1 }
 0x3b8   :  { %v4967_v36 = vadd.f32 %v4952_v38, %v4951_v44  ;;  %v4929_v15 = vsub.f32 %v7901_v22, %v7991_v17  ;;  %v4943_v14 = vmul.f32 %v4927_v7, %v7951_v8  ;;  %v4930_v5 = vsub.f32 %v7903_v20, %v7991_v17 }
 0x3b9   :  { %v4957_v47 = vmul.f32 %v4941_v43, %v4941_v43  ;;  %v4944_v39 = vmul.f32 %v4928_v26, %v7955_v62  ;;  %v4958_v34 = vmul.f32 %v4942_v50, %v4942_v50  ;;  %v4931_v55 = vsub.f32 %v7961_v52, %v7991_v17 }
 0x3ba   :  { %v4968_v0 = vadd.f32 %v4967_v36, %v4953_v54  ;;  %v4945_v35 = vmul.f32 %v4929_v15, %v7959_v10  ;;  %v4959_v56 = vmul.f32 %v4943_v14, %v4943_v14  ;;  %v4932_v37 = vsub.f32 %v7963_v61, %v7991_v17 }
 0x3bb   :  { %v4946_v8 = vmul.f32 %v4930_v5, %v7967_v58  ;;  %v4960_v40 = vmul.f32 %v4944_v39, %v4944_v39  ;;  %v4933_v48 = vsub.f32 %v7983_v31, %v7991_v17  ;;  %v4947_v62 = vmul.f32 %v4931_v55, %v7969_v45 }
 0x3bc   :  { %v4969_v59 = vadd.f32 %v4968_v0, %v4954_v51  ;;  %v4961_v11 = vmul.f32 %v4945_v35, %v4945_v35  ;;  %v4934_v23 = vsub.f32 %v7987_v12, %v7991_v17  ;;  %v4948_v10 = vmul.f32 %v4932_v37, %v7975_v18  ;;  %v4987_v18 = vld [vmem:[%s8115_s3] sm:$0xff] }
 0x3bd   :  { %v4962_v44 = vmul.f32 %v4946_v8, %v4946_v8  ;;  %v4949_v4 = vmul.f32 %v4933_v48, %v7979_v29  ;;  %v4963_v9 = vmul.f32 %v4947_v62, %v4947_v62 }
 0x3be   :  { %v4970_v2 = vadd.f32 %v4969_v59, %v4955_v13  ;;  %v4950_v60 = vmul.f32 %v4934_v23, %v7981_v19  ;;  %v4964_v32 = vmul.f32 %v4948_v10, %v4948_v10  ;;  %v4989_v19 = vld [vmem:[%s8116_s4] sm:$0xff] }
 0x3bf   :  { %v4965_v36 = vmul.f32 %v4949_v4, %v4949_v4 }
 0x3c0   :  { %v4971_v6 = vadd.f32 %v4970_v2, %v4956_v16  ;;  %v4966_v45 = vmul.f32 %v4950_v60, %v4950_v60 }
 0x3c2   :  { %v4972_v25 = vadd.f32 %v4971_v6, %v4957_v47 }
 0x3c4   :  { %v4973_v41 = vadd.f32 %v4972_v25, %v4958_v34 }
 0x3c6   :  { %v4974_v63 = vadd.f32 %v4973_v41, %v4959_v56 }
 0x3c8   :  { %v4975_v27 = vadd.f32 %v4974_v63, %v4960_v40 }
 0x3ca   :  { %v4976_v38 = vadd.f32 %v4975_v27, %v4961_v11 }
 0x3cc   :  { %v4977_v58 = vadd.f32 %v4976_v38, %v4962_v44 }
 0x3ce   :  { %v4978_v54 = vadd.f32 %v4977_v58, %v4963_v9 }
 0x3d0   :  { %v4979_v3 = vadd.f32 %v4978_v54, %v4964_v32 }
 0x3d2   :  { %v4980_v1 = vadd.f32 %v4979_v3, %v4965_v36 }
 0x3d4   :  { %v4981_v51 = vadd.f32 %v4980_v1, %v4966_v45 }
 0x3d6   :  { %4982 = vadd.xlane.f32.xlu1 %v4981_v51 }
 0x45f   :  { %v4983_v0 = vpop.xlane.xlu1 %4982 }
 0x460   :  { %v4984_v7 = vmul.f32 0.0009765625, %v4983_v0 }
 0x462   :  { %v4985_v43 = vadd.f32 1e-05, %v4984_v7 }
 0x464   :  { %5279 = vrsqrt.f32 %v4985_v43 }
 0x471   :  { %v5280_v29 = vpop.eup %5279 }
 0x472   :  { %v4988_v13 = vmul.f32 %v5280_v29, %v4987_v18 }
 0x474   :  { %4994 = vperm.xlu0 %5248, %v4988_v13   ;;  %v4990_v59 = vmul.f32 %v4988_v13, %v7991_v17 }
 0x476   :  { %v4991_v26 = vsub.f32 %v4989_v19, %v4990_v59 }
 0x478   :  { %5015 = vperm.xlu1 %5249, %v4991_v26  }
 0x4ef   :  { %v4995_v50 = vpop.permute.xlu0 %4994 }
 0x4f0   :  { %v4997_v16 = vmul.f32 %v4995_v50, %v7462_v24  ;;  %v4998_v2 = vmul.f32 %v4995_v50, %v7474_v49  ;;  %v4999_v15 = vmul.f32 %v4995_v50, %v7513_v53  ;;  %v5000_v14 = vmul.f32 %v4995_v50, %v7524_v30 }
 0x4f1   :  { %v5001_v47 = vmul.f32 %v4995_v50, %v7851_v21  ;;  %v5002_v6 = vmul.f32 %v4995_v50, %v7857_v46  ;;  %v5003_v5 = vmul.f32 %v4995_v50, %v7888_v57  ;;  %v5004_v39 = vmul.f32 %v4995_v50, %v7894_v33 }
 0x4f2   :  { %v5005_v17 = vmul.f32 %v4995_v50, %v7897_v28  ;;  %v5006_v34 = vmul.f32 %v4995_v50, %v7899_v42  ;;  %v5007_v24 = vmul.f32 %v4995_v50, %v7901_v22  ;;  %v5008_v49 = vmul.f32 %v4995_v50, %v7903_v20 }
 0x4f3   :  { %v5009_v53 = vmul.f32 %v4995_v50, %v7961_v52  ;;  %v5010_v30 = vmul.f32 %v4995_v50, %v7963_v61  ;;  %v5011_v21 = vmul.f32 %v4995_v50, %v7983_v31  ;;  %v5012_v46 = vmul.f32 %v4995_v50, %v7987_v12  ;;  %v5016_v25 = vpop.permute.xlu1 %5015 }
 0x4f4   :  { %v5018_v57 = vadd.f32 %v5016_v25, %v4997_v16  ;;  %v5019_v55 = vadd.f32 %v5016_v25, %v4998_v2  ;;  %v5020_v33 = vadd.f32 %v5016_v25, %v4999_v15  ;;  %v5021_v35 = vadd.f32 %v5016_v25, %v5000_v14 }
 0x4f5   :  { %v5022_v28 = vadd.f32 %v5016_v25, %v5001_v47  ;;  %v5023_v56 = vadd.f32 %v5016_v25, %v5002_v6  ;;  %v5024_v42 = vadd.f32 %v5016_v25, %v5003_v5  ;;  %v5025_v41 = vadd.f32 %v5016_v25, %v5004_v39 }
 0x4f6   :  { %v5026_v22 = vadd.f32 %v5016_v25, %v5005_v17  ;;  %v5027_v37 = vadd.f32 %v5016_v25, %v5006_v34  ;;  %v5028_v20 = vadd.f32 %v5016_v25, %v5007_v24  ;;  %v5029_v8 = vadd.f32 %v5016_v25, %v5008_v49 }
 0x4f7   :  { %v5030_v52 = vadd.f32 %v5016_v25, %v5009_v53  ;;  %v5031_v40 = vadd.f32 %v5016_v25, %v5010_v30  ;;  %v5032_v61 = vadd.f32 %v5016_v25, %v5011_v21  ;;  %v5033_v63 = vadd.f32 %v5016_v25, %v5012_v46 }
 0x4f8   :  { %v5034_v31 = vmax.f32 %v5018_v57, 0.0  ;;  %v5035_v48 = vmax.f32 %v5019_v55, 0.0  ;;  %v5036_v12 = vmax.f32 %v5020_v33, 0.0  ;;  %v5037_v62 = vmax.f32 %v5021_v35, 0.0 }
 0x4f9   :  { %v5038_v11 = vmax.f32 %v5022_v28, 0.0  ;;  %v5039_v27 = vmax.f32 %v5023_v56, 0.0  ;;  %v5040_v23 = vmax.f32 %v5024_v42, 0.0  ;;  %v5041_v10 = vmax.f32 %v5025_v41, 0.0 }
 0x4fa   :  { %v5042_v44 = vmax.f32 %v5026_v22, 0.0  ;;  %v5043_v38 = vmax.f32 %v5027_v37, 0.0  ;;  %v5044_v4 = vmax.f32 %v5028_v20, 0.0  ;;  %v5045_v9 = vmax.f32 %v5029_v8, 0.0  ;;  %5050 = vst [vmem:[%s8117_s5] sm:$0xff] %v5034_v31  ;;  %5051 = vst [vmem:[%s8117_s5 + $0x8] sm:$0xff] %v5035_v48 }
 0x4fb   :  { %5052 = vst [vmem:[%s8117_s5 + $0x10] sm:$0xff] %v5036_v12  ;;  %5053 = vst [vmem:[%s8117_s5 + $0x18] sm:$0xff] %v5037_v62  ;;  %v5046_v58 = vmax.f32 %v5030_v52, 0.0  ;;  %v5047_v60 = vmax.f32 %v5031_v40, 0.0  ;;  %v5048_v32 = vmax.f32 %v5032_v61, 0.0  ;;  %v5049_v54 = vmax.f32 %v5033_v63, 0.0 }
 0x4fc   :  { %5054 = vst [vmem:[%s8117_s5 + $0x20] sm:$0xff] %v5038_v11  ;;  %5055 = vst [vmem:[%s8117_s5 + $0x28] sm:$0xff] %v5039_v27 }
 0x4fd   :  { %5056 = vst [vmem:[%s8117_s5 + $0x30] sm:$0xff] %v5040_v23  ;;  %5057 = vst [vmem:[%s8117_s5 + $0x38] sm:$0xff] %v5041_v10 }
 0x4fe   :  { %5058 = vst [vmem:[%s8117_s5 + $0x40] sm:$0xff] %v5042_v44  ;;  %5059 = vst [vmem:[%s8117_s5 + $0x48] sm:$0xff] %v5043_v38 }
 0x4ff   :  { %5060 = vst [vmem:[%s8117_s5 + $0x50] sm:$0xff] %v5044_v4  ;;  %5061 = vst [vmem:[%s8117_s5 + $0x58] sm:$0xff] %v5045_v9 }
 0x500   :  { %5062 = vst [vmem:[%s8117_s5 + $0x60] sm:$0xff] %v5046_v58  ;;  %5063 = vst [vmem:[%s8117_s5 + $0x68] sm:$0xff] %v5047_v60 }
 0x501   :  { %5064 = vst [vmem:[%s8117_s5 + $0x70] sm:$0xff] %v5048_v32  ;;  %5065 = vst [vmem:[%s8117_s5 + $0x78] sm:$0xff] %v5049_v54 }

</bundles_post_ra>
